<compile_context>
chip_gen: v6e
topology: v6e:2x2x1
jax: 0.10.0
libtpu: 0.0.40
codegen_flags: <defaults>
</compile_context>

<pallas_src>
import functools

import jax
import jax.numpy as jnp
from jax.experimental import pallas as pl
from jax.experimental.pallas import tpu as pltpu


def _round_up(x, m):
    return ((x + m - 1) // m) * m


@functools.lru_cache(maxsize=None)
def _vmem_limit_bytes():
    """Generation-aware scoped-VMEM budget (~3/4 of physical, capped at 96 MiB)."""
    try:
        cap = pltpu.get_tpu_info().vmem_capacity_bytes
    except Exception:          # conservative fallback if the query is unavailable
        cap = 64 * 1024 * 1024
    return int(min(cap * 3 // 4, 96 * 1024 * 1024))


# ----------------------------------------------------------------------------
# Kernel 1: tiled matmul + bias  (all convs go through here via im2col)
# ----------------------------------------------------------------------------

def _mm_bias_kernel(a_ref, w_ref, b_ref, o_ref, acc_ref):
    @pl.when(pl.program_id(2) == 0)
    def _():
        acc_ref[...] = jnp.zeros_like(acc_ref)

    acc_ref[...] += jnp.dot(a_ref[...], w_ref[...],
                            preferred_element_type=jnp.float32)

    @pl.when(pl.program_id(2) == pl.num_programs(2) - 1)
    def _():
        o_ref[...] = (acc_ref[...] + b_ref[...]).astype(o_ref.dtype)


def pallas_matmul_bias(a, pw, out_dtype=jnp.float32):
    """(M,K) @ pre-packed padded bf16 weight (Kp,Np) + bias -> (M,N).
    bf16 operands, f32 VMEM accumulator, lane-dense padded tiles."""
    M, K = a.shape
    w_p, b_p, N = pw['w'], pw['b'], pw['N']
    Kp, Np = w_p.shape

    tk = 256 if Kp % 256 == 0 else 128
    tn = 256 if Np % 256 == 0 else 128
    if M >= 1024:
        tm = 512
    elif M >= 256:
        tm = 256
    else:
        tm = _round_up(M, 16)
    Mp = _round_up(M, tm)

    a_p = jnp.pad(a.astype(jnp.bfloat16), ((0, Mp - M), (0, Kp - K)))

    out = pl.pallas_call(
        _mm_bias_kernel,
        out_shape=jax.ShapeDtypeStruct((Mp, Np), out_dtype),
        grid=(Mp // tm, Np // tn, Kp // tk),
        in_specs=[pl.BlockSpec((tm, tk), lambda i, j, k: (i, k)),
                  pl.BlockSpec((tk, tn), lambda i, j, k: (k, j)),
                  pl.BlockSpec((1, tn), lambda i, j, k: (0, j))],
        out_specs=pl.BlockSpec((tm, tn), lambda i, j, k: (i, j)),
        scratch_shapes=[pltpu.VMEM((tm, tn), jnp.float32)],
        compiler_params=pltpu.CompilerParams(
            dimension_semantics=("parallel", "parallel", "arbitrary"),
            vmem_limit_bytes=_vmem_limit_bytes()),
        cost_estimate=pl.CostEstimate(
            flops=2 * Mp * Np * Kp, transcendentals=0,
            bytes_accessed=Mp * Kp * 2 + Kp * Np * 2
                           + Mp * Np * jnp.dtype(out_dtype).itemsize),
    )(a_p, w_p, b_p)
    return out[:M, :N]


# ----------------------------------------------------------------------------
# Kernel 2: fused (A @ W1 + b1) @ W2 + b2  (final 3x3 conv + 1x1 output conv)
# ----------------------------------------------------------------------------

def _mm2_bias_kernel(a_ref, w1_ref, b1_ref, w2_ref, b2_ref, o_ref):
    t = (jnp.dot(a_ref[...], w1_ref[...], preferred_element_type=jnp.float32)
         + b1_ref[...])
    o_ref[...] = (jnp.dot(t.astype(jnp.bfloat16), w2_ref[...],
                          preferred_element_type=jnp.float32) + b2_ref[...])


def pallas_matmul2_bias(a, poc):
    """Fused ((M,K)@W1+b1)@W2+b2 with pre-packed padded bf16 weights.
    tm=128 keeps the f32 intermediate inside the vreg budget.
    # TODO(synk): tile K / N1 like pallas_matmul_bias before using this kernel
    # with large channel counts (K/N1 currently live in a single block)."""
    M, K = a.shape
    w1, b1 = poc['c1']['w'], poc['c1']['b']
    w2, b2, N2 = poc['w2'], poc['b2'], poc['N2']
    Kp, N1p = w1.shape
    N2p = w2.shape[1]
    tm = 128 if M >= 128 else _round_up(M, 16)
    Mp = _round_up(M, tm)

    a_p = jnp.pad(a.astype(jnp.bfloat16), ((0, Mp - M), (0, Kp - K)))

    out = pl.pallas_call(
        _mm2_bias_kernel,
        out_shape=jax.ShapeDtypeStruct((Mp, N2p), jnp.float32),
        grid=(Mp // tm,),
        in_specs=[pl.BlockSpec((tm, Kp), lambda i: (i, 0)),
                  pl.BlockSpec((Kp, N1p), lambda i: (0, 0)),
                  pl.BlockSpec((1, N1p), lambda i: (0, 0)),
                  pl.BlockSpec((N1p, N2p), lambda i: (0, 0)),
                  pl.BlockSpec((1, N2p), lambda i: (0, 0))],
        out_specs=pl.BlockSpec((tm, N2p), lambda i: (i, 0)),
        compiler_params=pltpu.CompilerParams(
            dimension_semantics=("parallel",),
            vmem_limit_bytes=_vmem_limit_bytes()),
    )(a_p, w1, b1, w2, b2)
    return out[:M, :N2]


# ----------------------------------------------------------------------------
# Kernel 3: fused bilinear warp (sampling-matrix matmul) + 1x1 proj + GRU gate
#           tiled over destination-pixel columns (parallel grid)
# ----------------------------------------------------------------------------

def _traj_gate_kernel(xc_ref, hfull_ref, hblk_ref, st_ref, wp_ref, bp_ref,
                      o_ref, *, C, L):
    # xc_ref   : (3C, tn)    f32   column block of conv_input output (x_z|x_r|x_h)
    # hfull_ref: (C, Mp)     bf16  full transposed h_prev (warp-matmul source)
    # hblk_ref : (C, tn)     f32   column block of h_prev (gate combine)
    # st_ref   : (L, Mp, tn) bf16  column block of the bilinear sampling matrices
    # wp_ref   : (3C, L*C)   bf16  fused per-link 1x1 proj weights
    # bp_ref   : (3C, 1)     f32   pre-summed proj biases
    h_src = hfull_ref[...]
    warped = [jnp.dot(h_src, st_ref[l], preferred_element_type=jnp.float32)
              for l in range(L)]                                   # L x (C, tn)
    warped_cat = warped[0] if L == 1 else jnp.concatenate(warped, axis=0)
    traj = (jnp.dot(wp_ref[...], warped_cat.astype(jnp.bfloat16),
                    preferred_element_type=jnp.float32) + bp_ref[...])  # (3C, tn)

    xc = xc_ref[...]
    x_z, x_r, x_h = xc[:C], xc[C:2 * C], xc[2 * C:]
    h_z, h_r, h_h = traj[:C], traj[C:2 * C], traj[2 * C:]
    z = jax.nn.sigmoid(x_z + h_z)
    r = jax.nn.sigmoid(x_r + h_r)
    pre = x_h + r * h_h
    h_cand = jnp.where(pre >= 0, pre, 0.2 * pre)        # leaky_relu(slope=0.2)
    o_ref[...] = (1.0 - z) * h_cand + z * hblk_ref[...]


def pallas_traj_gate(xcT, h_bf, hT, St_bf, wp_cat, bp_sum):
    C, Mp = hT.shape
    C3 = xcT.shape[0]
    L = St_bf.shape[0]
    tn = 256 if (Mp >= 2048 and Mp % 256 == 0) else 128
    kernel = functools.partial(_traj_gate_kernel, C=C, L=L)
    return pl.pallas_call(
        kernel,
        out_shape=jax.ShapeDtypeStruct((C, Mp), jnp.float32),
        grid=(Mp // tn,),
        in_specs=[pl.BlockSpec((C3, tn), lambda j: (0, j)),
                  pl.BlockSpec((C, Mp), lambda j: (0, 0)),
                  pl.BlockSpec((C, tn), lambda j: (0, j)),
                  pl.BlockSpec((L, Mp, tn), lambda j: (0, 0, j)),
                  pl.BlockSpec((C3, L * C), lambda j: (0, 0)),
                  pl.BlockSpec((C3, 1), lambda j: (0, 0))],
        out_specs=pl.BlockSpec((C, tn), lambda j: (0, j)),
        compiler_params=pltpu.CompilerParams(
            dimension_semantics=("parallel",),
            vmem_limit_bytes=_vmem_limit_bytes()),
        cost_estimate=pl.CostEstimate(
            flops=2 * L * C * Mp * Mp + 2 * C3 * L * C * Mp,
            transcendentals=2 * C * Mp,
            bytes_accessed=(C3 * Mp * 4 + C * Mp * 2 + C * Mp * 4
                            + L * Mp * Mp * 2 + C3 * L * C * 2 + C * Mp * 4)),
    )(xcT, h_bf, hT, St_bf, wp_cat, bp_sum)


# ----------------------------------------------------------------------------
# Weight pre-packing (done once, outside the jitted forward)
# ----------------------------------------------------------------------------

def pack_conv2d(w_oihw, b):
    """PyTorch OIHW conv weight -> padded bf16 (Kp, Np) matmul weight + f32 bias."""
    Cout, Cin, kh, kw = w_oihw.shape
    wm = jnp.transpose(w_oihw, (2, 3, 1, 0)).reshape(kh * kw * Cin, Cout)
    K, N = wm.shape
    Kp, Np = _round_up(K, 128), _round_up(N, 128)
    return {'w': jnp.pad(wm.astype(jnp.bfloat16), ((0, Kp - K), (0, Np - N))),
            'b': jnp.pad(b.astype(jnp.float32).reshape(1, N), ((0, 0), (0, Np - N))),
            'K': K, 'N': N, 'kh': kh, 'kw': kw, 'Cin': Cin, 'Cout': Cout}


def pack_conv_transpose2d(w_t, b):
    """PyTorch ConvTranspose2d weight (Cin,Cout,kh,kw) -> equivalent flipped conv."""
    w_conv = jnp.transpose(w_t, (1, 0, 2, 3))[:, :, ::-1, ::-1]
    return pack_conv2d(w_conv, b)


def pack_params(params, cfg):
    packed = {'cells': [], 'deconvs': []}
    for i in range(cfg['num_layers']):
        cp = params['cells'][i]
        hd = cfg['gru_dims'][i]
        L = len(range(0, cfg['connection'], 2))         # links used by the reference
        wp_cat = jnp.concatenate(
            [cp['proj_w'][l][:, :, 0, 0] for l in range(L)], axis=1)   # (3C, L*C)
        bp_sum = sum(cp['proj_b'][l] for l in range(L)).reshape(3 * hd, 1)
        packed['cells'].append({
            'conv_input': pack_conv2d(cp['conv_input_w'], cp['conv_input_b']),
            'sub_net': pack_conv2d(cp['sub_net_w'], cp['sub_net_b']),
            'wp_cat': wp_cat.astype(jnp.bfloat16),
            'bp_sum': bp_sum.astype(jnp.float32),
        })
        dc = params['deconvs'][i]
        packed['deconvs'].append(pack_conv_transpose2d(dc['w'], dc['b']))

    oc = params['output_convs']
    c1 = pack_conv2d(oc['w1'], oc['b1'])
    wm2 = oc['w2'][:, :, 0, 0].T                         # (Cout1, output_dim)
    N1, N2 = wm2.shape
    N1p, N2p = c1['w'].shape[1], _round_up(N2, 128)
    packed['output_convs'] = {
        'c1': c1,
        'w2': jnp.pad(wm2.astype(jnp.bfloat16), ((0, N1p - N1), (0, N2p - N2))),
        'b2': jnp.pad(oc['b2'].astype(jnp.float32).reshape(1, N2),
                      ((0, 0), (0, N2p - N2))),
        'N2': N2,
    }
    return packed


# ----------------------------------------------------------------------------
# Convs (NHWC end-to-end) built on the Pallas matmul kernels
# ----------------------------------------------------------------------------

def conv2d_nhwc(x, pw, stride=1, padding=0, out_dtype=jnp.float32):
    """x: (B,H,W,Cin) NHWC, pw: pre-packed conv weight (see pack_conv2d)."""
    B, H, W, Cin = x.shape
    kh, kw = pw['kh'], pw['kw']
    if isinstance(padding, int):
        pad_h = pad_w = (padding, padding)
    else:
        pad_h, pad_w = padding
    xp = jnp.pad(x.astype(jnp.bfloat16), ((0, 0), pad_h, pad_w, (0, 0)))
    Hp, Wp = xp.shape[1], xp.shape[2]
    Ho = (Hp - kh) // stride + 1
    Wo = (Wp - kw) // stride + 1
    # TODO(synk): fold the kh*kw tap accumulation into the Pallas K grid (shifted
    # window index_map over one padded NHWC buffer) instead of materializing the
    # bf16 im2col matrix in HLO.
    taps = [xp[:, i:i + stride * (Ho - 1) + 1:stride,
               j:j + stride * (Wo - 1) + 1:stride, :]
            for i in range(kh) for j in range(kw)]
    a = jnp.concatenate(taps, axis=-1).reshape(B * Ho * Wo, kh * kw * Cin)
    out = pallas_matmul_bias(a, pw, out_dtype=out_dtype)
    return out.reshape(B, Ho, Wo, pw['Cout'])


def conv_transpose2d_nhwc(x, pw, stride, padding, output_padding,
                          out_dtype=jnp.float32):
    """PyTorch ConvTranspose2d via input dilation + flipped-kernel conv (NHWC).
    # TODO(synk): phase-decompose (sub-pixel) the stride-2 transposed conv to skip
    # the ~75% zero taps that input dilation injects."""
    B, H, W, Cin = x.shape
    kh, kw = pw['kh'], pw['kw']
    x = x.astype(jnp.bfloat16)
    if stride > 1:
        xd = jnp.zeros((B, (H - 1) * stride + 1, (W - 1) * stride + 1, Cin),
                       jnp.bfloat16)
        xd = xd.at[:, ::stride, ::stride, :].set(x)
    else:
        xd = x
    pad_h = (kh - 1 - padding, kh - 1 - padding + output_padding[0])
    pad_w = (kw - 1 - padding, kw - 1 - padding + output_padding[1])
    return conv2d_nhwc(xd, pw, stride=1, padding=(pad_h, pad_w),
                       out_dtype=out_dtype)


def fused_output_convs(x, poc, kernel):
    """Sequential(Conv2d(k x k, pad k//2), Conv2d(1x1)) fused into one kernel."""
    B, H, W, Cin = x.shape
    pad = kernel // 2
    xp = jnp.pad(x.astype(jnp.bfloat16), ((0, 0), (pad, pad), (pad, pad), (0, 0)))
    taps = [xp[:, i:i + H, j:j + W, :] for i in range(kernel) for j in range(kernel)]
    a = jnp.concatenate(taps, axis=-1).reshape(B * H * W, kernel * kernel * Cin)
    out = pallas_matmul2_bias(a, poc)
    return out.reshape(B, H, W, -1)


# ----------------------------------------------------------------------------
# Bilinear sampling matrix (replaces F.grid_sample's HLO gather with a matmul)
# ----------------------------------------------------------------------------

def build_sampling_matrix_T(grid, H, W, Mp):
    """grid: (B,H,W,2) normalized coords (x=grid[...,0], y=grid[...,1]).
    Returns St (Mp, Mp) f32, block-diagonal over batch (batch-major flat index),
    with St[k, m] = bilinear weight of source pixel k for output pixel m
    (align_corners=False, zero padding) -- so warpedT = h_prevT @ St.
    # TODO(synk): replace this O((B*H*W)^2) matrix + matmul with a 4-tap DMA/SMEM
    # gather kernel (PrefetchScalarGridSpec) for large resolutions."""
    B = grid.shape[0]
    HW = H * W
    x = grid[..., 0].reshape(B, HW)
    y = grid[..., 1].reshape(B, HW)
    ix = ((x + 1.0) * W - 1.0) / 2.0
    iy = ((y + 1.0) * H - 1.0) / 2.0
    ix0 = jnp.floor(ix)
    iy0 = jnp.floor(iy)
    ix1 = ix0 + 1.0
    iy1 = iy0 + 1.0
    wx1 = ix - ix0
    wx0 = 1.0 - wx1
    wy1 = iy - iy0
    wy0 = 1.0 - wy1

    def corner(iyf, ixf, wgt):
        valid = ((ixf >= 0) & (ixf <= W - 1) & (iyf >= 0) & (iyf <= H - 1))
        idx = (jnp.clip(iyf, 0, H - 1) * W + jnp.clip(ixf, 0, W - 1)).astype(jnp.int32)
        oh = jax.nn.one_hot(idx, HW, dtype=jnp.float32)        # (B, q, k)
        return oh * (wgt * valid.astype(jnp.float32))[..., None]

    S = (corner(iy0, ix0, wy0 * wx0) + corner(iy0, ix1, wy0 * wx1)
         + corner(iy1, ix0, wy1 * wx0) + corner(iy1, ix1, wy1 * wx1))   # (B,q,k)

    St = jnp.zeros((Mp, Mp), jnp.float32)
    for b in range(B):                                         # static, B small
        St = St.at[b * HW:(b + 1) * HW, b * HW:(b + 1) * HW].set(S[b].T)
    return St


# ----------------------------------------------------------------------------
# TrajGRUCell + DecoderBlock forward
# ----------------------------------------------------------------------------

def traj_gru_cell_forward(x, h_prev, pc, kernel_size, connection):
    """x: (B,H,W,Cin) NHWC, h_prev: (B,H,W,C) NHWC -> (h_next NHWC, h_next NCHW)."""
    B, H, W, _ = x.shape
    C = h_prev.shape[-1]
    M = B * H * W
    Mp = _round_up(M, 128)

    # input convolution (Conv2d input_dim -> 3*hidden_dim)
    xc = conv2d_nhwc(x, pc['conv_input'], stride=1, padding=kernel_size // 2)

    # __warp: flow field from sub_net, globally min/max normalized to [-1, 1]
    combined = jnp.concatenate([x, h_prev], axis=-1)
    flow = conv2d_nhwc(combined, pc['sub_net'], stride=1, padding=2)
    fmin, fmax = flow.min(), flow.max()
    flow = 2.0 * (flow - fmin) / (fmax - fmin) - 1.0       # matches reference (no eps)

    links = list(range(0, connection, 2))                  # as in the reference
    St = jnp.stack([build_sampling_matrix_T(flow[..., l:l + 2], H, W, Mp)
                    for l in links], axis=0)               # (L, Mp, Mp)
    St_bf = St.astype(jnp.bfloat16)

    # lane-dense transposed layouts for the fused warp+proj+gate kernel
    xcT = jnp.pad(xc.reshape(M, 3 * C).T, ((0, 0), (0, Mp - M)))
    hT = jnp.pad(h_prev.reshape(M, C).T.astype(jnp.float32), ((0, 0), (0, Mp - M)))

    hnT = pallas_traj_gate(xcT, hT.astype(jnp.bfloat16), hT, St_bf,
                           pc['wp_cat'], pc['bp_sum'])     # (C, Mp) f32
    hn = hnT[:, :M].reshape(C, B, H, W)
    return jnp.transpose(hn, (1, 2, 3, 0)), jnp.transpose(hn, (1, 0, 2, 3))


def decoder_block_forward(packed, cfg, input_tensor, hidden_states):
    """Public interface keeps PyTorch NCHW; internal layout is NHWC."""
    cur = jnp.transpose(input_tensor, (0, 2, 3, 1))
    layer_state_list = []
    len_states = len(hidden_states) - 1
    for layer_idx in range(cfg['num_layers']):
        h_prev = jnp.transpose(hidden_states[len_states - layer_idx], (0, 2, 3, 1))
        state_nhwc, state_nchw = traj_gru_cell_forward(
            cur, h_prev, packed['cells'][layer_idx],
            cfg['gru_kernels'][layer_idx], cfg['connection'])
        # bf16 output: the only consumer (next conv / fused output convs) re-casts
        cur = conv_transpose2d_nhwc(state_nhwc, packed['deconvs'][layer_idx],
                                    stride=cfg['conv_stride'],
                                    padding=cfg['conv_padding'],
                                    output_padding=cfg['output_padding'][layer_idx],
                                    out_dtype=jnp.bfloat16)
        layer_state_list.insert(0, state_nchw)
    out = fused_output_convs(cur, packed['output_convs'], cfg['conv_kernel'])
    return jnp.transpose(out, (0, 3, 1, 2)), layer_state_list


# ----------------------------------------------------------------------------
# Deterministic parameter construction (matches nn.Module __init__ shapes)
# ----------------------------------------------------------------------------

def init_params(key, cfg):
    def nrm(k, shape, scale=0.1):
        return scale * jax.random.normal(k, shape, jnp.float32)

    params = {'cells': [], 'deconvs': []}
    for i in range(cfg['num_layers']):
        cur_in = cfg['input_dim'] if i == 0 else cfg['conv_dims'][i - 1]
        hd = cfg['gru_dims'][i]
        k = cfg['gru_kernels'][i]
        keys = jax.random.split(jax.random.fold_in(key, i), 8)
        cell = {
            'conv_input_w': nrm(keys[0], (3 * hd, cur_in, k, k)),
            'conv_input_b': nrm(keys[1], (3 * hd,)),
            'sub_net_w': nrm(keys[2], (2 * cfg['connection'], cur_in + hd, 5, 5)),
            'sub_net_b': nrm(keys[3], (2 * cfg['connection'],)),
            'proj_w': [nrm(jax.random.fold_in(keys[4], l), (3 * hd, hd, 1, 1))
                       for l in range(cfg['connection'])],
            'proj_b': [nrm(jax.random.fold_in(keys[5], l), (3 * hd,))
                       for l in range(cfg['connection'])],
        }
        params['cells'].append(cell)
        params['deconvs'].append({
            'w': nrm(keys[6], (hd, cfg['conv_dims'][i],
                               cfg['conv_kernel'], cfg['conv_kernel'])),
            'b': nrm(keys[7], (cfg['conv_dims'][i],)),
        })
    ko = jax.random.split(jax.random.fold_in(key, 999), 4)
    params['output_convs'] = {
        'w1': nrm(ko[0], (cfg['conv_dims'][-1], cfg['conv_dims'][-1],
                          cfg['conv_kernel'], cfg['conv_kernel'])),
        'b1': nrm(ko[1], (cfg['conv_dims'][-1],)),
        'w2': nrm(ko[2], (cfg['output_dim'], cfg['conv_dims'][-1], 1, 1)),
        'b2': nrm(ko[3], (cfg['output_dim'],)),
    }
    return params


def cal_output_pad(encoder_layer_sizes):
    output_pads = [(int(not s[0] % 2), int(not s[1] % 2)) for s in encoder_layer_sizes]
    output_pads = output_pads[:-1]
    return [output_pads[i - 1] for i in range(len(output_pads), 0, -1)]


if __name__ == "__main__":
    encoder_layer_sizes = [(32, 32), (16, 16)]
    cfg = {
        'num_layers': 1,
        'input_dim': 4,
        'conv_dims': [8],
        'conv_kernel': 3,
        'conv_stride': 2,
        'conv_padding': 1,
        'gru_dims': [8],
        'gru_kernels': [3],
        'connection': 2,
        'output_dim': 1,
        'output_padding': cal_output_pad(encoder_layer_sizes),
    }

    key = jax.random.PRNGKey(0)
    k_in, k_h, k_p = jax.random.split(key, 3)

    B = 2
    H, W = encoder_layer_sizes[-1]                   # input_size = last encoder size
    input_tensor = jax.random.normal(k_in, (B, cfg['input_dim'], H, W), jnp.float32)
    hidden_states = [jax.random.normal(k_h, (B, cfg['gru_dims'][0], H, W), jnp.float32)]

    params = init_params(k_p, cfg)
    packed = pack_params(params, cfg)                # weight packing once, outside jit

    fwd = jax.jit(lambda x, hs: decoder_block_forward(packed, cfg, x, hs))
    output, layer_state_list = fwd(input_tensor, hidden_states)
    output = jax.block_until_ready(output)
    layer_state_list = [jax.block_until_ready(s) for s in layer_state_list]

    assert output.shape == (B, cfg['output_dim'], 2 * H, 2 * W), output.shape
    assert layer_state_list[0].shape == (B, cfg['gru_dims'][0], H, W)
    assert bool(jnp.all(jnp.isfinite(output)))
    print("KERNEL_OK")
</pallas_src>

<mosaic_0001>
module attributes {stable_mosaic.version = 11 : i64} {
  func.func @_mm_bias_kernel(%arg0: i32, %arg1: i32, %arg2: i32, %arg3: memref<256x128xbf16, #tpu.memory_space<vmem>>, %arg4: memref<128x128xbf16, #tpu.memory_space<vmem>>, %arg5: memref<1x128xf32, #tpu.memory_space<vmem>>, %arg6: memref<256x128xf32, #tpu.memory_space<vmem>>, %arg7: memref<256x128xf32, #tpu.memory_space<vmem>>) attributes {dimension_semantics = [#tpu.dimension_semantics<parallel>, #tpu.dimension_semantics<parallel>, #tpu.dimension_semantics<arbitrary>], iteration_bounds = array<i64: 2, 1, 1>, scalar_prefetch = 0 : i64, scratch_operands = 1 : i64, tpu.core_type = #tpu.core_type<tc>, window_params = [{transform_indices = @transform_0, window_bounds = array<i64: 256, 128>}, {transform_indices = @transform_1, window_bounds = array<i64: 128, 128>}, {transform_indices = @transform_2, window_bounds = array<i64: 1, 128>}, {transform_indices = @transform_3, window_bounds = array<i64: 256, 128>}]} {
    %c0_i32 = arith.constant 0 : i32
    %0 = arith.cmpi eq, %arg2, %c0_i32 : i32
    %1 = arith.extui %0 : i1 to i32
    %c0_i32_0 = arith.constant 0 : i32
    %2 = arith.cmpi ne, %1, %c0_i32_0 : i32
    scf.if %2 {
      %cst_10 = arith.constant 0.000000e+00 : f32
      %12 = vector.broadcast %cst_10 : f32 to vector<256x128xf32>
      %c0_11 = arith.constant 0 : index
      %c0_12 = arith.constant 0 : index
      %13 = vector.load %arg7[%c0_11, %c0_12] : memref<256x128xf32, #tpu.memory_space<vmem>>, vector<256x128xf32>
      tpu.vector_store %arg7[%c0_11, %c0_12], %12 {strides = array<i32>} : memref<256x128xf32, #tpu.memory_space<vmem>>, vector<256x128xf32>,
    } else {
    }
    %c0 = arith.constant 0 : index
    %c0_1 = arith.constant 0 : index
    %3 = vector.load %arg7[%c0, %c0_1] : memref<256x128xf32, #tpu.memory_space<vmem>>, vector<256x128xf32>
    %c0_2 = arith.constant 0 : index
    %c0_3 = arith.constant 0 : index
    %4 = vector.load %arg3[%c0_2, %c0_3] : memref<256x128xbf16, #tpu.memory_space<vmem>>, vector<256x128xbf16>
    %c0_4 = arith.constant 0 : index
    %c0_5 = arith.constant 0 : index
    %5 = vector.load %arg4[%c0_4, %c0_5] : memref<128x128xbf16, #tpu.memory_space<vmem>>, vector<128x128xbf16>
    %cst = arith.constant dense<0.000000e+00> : vector<256x128xf32>
    %6 = tpu.matmul %4, %5, %cst {dimension_numbers = #tpu.dot_dimension_numbers<[1], [0], [0], [1], [0, 0, 1, 1], [], []>} : vector<256x128xbf16>, vector<128x128xbf16>, vector<256x128xf32> -> vector<256x128xf32>
    %7 = arith.addf %3, %6 : vector<256x128xf32>
    %c0_6 = arith.constant 0 : index
    %c0_7 = arith.constant 0 : index
    %8 = vector.load %arg7[%c0_6, %c0_7] : memref<256x128xf32, #tpu.memory_space<vmem>>, vector<256x128xf32>
    tpu.vector_store %arg7[%c0_6, %c0_7], %7 {strides = array<i32>} : memref<256x128xf32, #tpu.memory_space<vmem>>, vector<256x128xf32>,
    %c0_i32_8 = arith.constant 0 : i32
    %9 = arith.cmpi eq, %arg2, %c0_i32_8 : i32
    %10 = arith.extui %9 : i1 to i32
    %c0_i32_9 = arith.constant 0 : i32
    %11 = arith.cmpi ne, %10, %c0_i32_9 : i32
    scf.if %11 {
      %c0_10 = arith.constant 0 : index
      %c0_11 = arith.constant 0 : index
      %12 = vector.load %arg7[%c0_10, %c0_11] : memref<256x128xf32, #tpu.memory_space<vmem>>, vector<256x128xf32>
      %c0_12 = arith.constant 0 : index
      %c0_13 = arith.constant 0 : index
      %13 = vector.load %arg5[%c0_12, %c0_13] : memref<1x128xf32, #tpu.memory_space<vmem>>, vector<1x128xf32>
      %14 = vector.broadcast %13 : vector<1x128xf32> to vector<256x128xf32>
      %15 = arith.addf %12, %14 : vector<256x128xf32>
      %c0_14 = arith.constant 0 : index
      %c0_15 = arith.constant 0 : index
      %16 = vector.load %arg6[%c0_14, %c0_15] : memref<256x128xf32, #tpu.memory_space<vmem>>, vector<256x128xf32>
      tpu.vector_store %arg6[%c0_14, %c0_15], %15 {strides = array<i32>} : memref<256x128xf32, #tpu.memory_space<vmem>>, vector<256x128xf32>,
    } else {
    }
    return
  }
  func.func @transform_0(%arg0: i32, %arg1: i32, %arg2: i32) -> (i32, i32) {
    %c0_i32 = arith.constant 0 : i32
    return %arg0, %arg2 : i32, i32
  }
  func.func @transform_1(%arg0: i32, %arg1: i32, %arg2: i32) -> (i32, i32) {
    %c0_i32 = arith.constant 0 : i32
    return %arg2, %arg1 : i32, i32
  }
  func.func @transform_2(%arg0: i32, %arg1: i32, %arg2: i32) -> (i32, i32) {
    %c0_i32 = arith.constant 0 : i32
    %c0_i32_0 = arith.constant 0 : i32
    return %c0_i32, %arg1 : i32, i32
  }
  func.func @transform_3(%arg0: i32, %arg1: i32, %arg2: i32) -> (i32, i32) {
    %c0_i32 = arith.constant 0 : i32
    return %arg0, %arg1 : i32, i32
  }
}

module attributes {stable_mosaic.version = 11 : i64} {
  func.func @_mm_bias_kernel(%arg0: i32, %arg1: i32, %arg2: i32, %arg3: memref<256x128xbf16, #tpu.memory_space<vmem>>, %arg4: memref<128x128xbf16, #tpu.memory_space<vmem>>, %arg5: memref<1x128xf32, #tpu.memory_space<vmem>>, %arg6: memref<256x128xf32, #tpu.memory_space<vmem>>, %arg7: memref<256x128xf32, #tpu.memory_space<vmem>>) attributes {dimension_semantics = [#tpu.dimension_semantics<parallel>, #tpu.dimension_semantics<parallel>, #tpu.dimension_semantics<arbitrary>], iteration_bounds = array<i64: 2, 1, 3>, scalar_prefetch = 0 : i64, scratch_operands = 1 : i64, tpu.core_type = #tpu.core_type<tc>, window_params = [{transform_indices = @transform_0, window_bounds = array<i64: 256, 128>}, {transform_indices = @transform_1, window_bounds = array<i64: 128, 128>}, {transform_indices = @transform_2, window_bounds = array<i64: 1, 128>}, {transform_indices = @transform_3, window_bounds = array<i64: 256, 128>}]} {
    %c0_i32 = arith.constant 0 : i32
    %0 = arith.cmpi eq, %arg2, %c0_i32 : i32
    %1 = arith.extui %0 : i1 to i32
    %c0_i32_0 = arith.constant 0 : i32
    %2 = arith.cmpi ne, %1, %c0_i32_0 : i32
    scf.if %2 {
      %cst_9 = arith.constant 0.000000e+00 : f32
      %12 = vector.broadcast %cst_9 : f32 to vector<256x128xf32>
      %c0_10 = arith.constant 0 : index
      %c0_11 = arith.constant 0 : index
      %13 = vector.load %arg7[%c0_10, %c0_11] : memref<256x128xf32, #tpu.memory_space<vmem>>, vector<256x128xf32>
      tpu.vector_store %arg7[%c0_10, %c0_11], %12 {strides = array<i32>} : memref<256x128xf32, #tpu.memory_space<vmem>>, vector<256x128xf32>,
    } else {
    }
    %c0 = arith.constant 0 : index
    %c0_1 = arith.constant 0 : index
    %3 = vector.load %arg7[%c0, %c0_1] : memref<256x128xf32, #tpu.memory_space<vmem>>, vector<256x128xf32>
    %c0_2 = arith.constant 0 : index
    %c0_3 = arith.constant 0 : index
    %4 = vector.load %arg3[%c0_2, %c0_3] : memref<256x128xbf16, #tpu.memory_space<vmem>>, vector<256x128xbf16>
    %c0_4 = arith.constant 0 : index
    %c0_5 = arith.constant 0 : index
    %5 = vector.load %arg4[%c0_4, %c0_5] : memref<128x128xbf16, #tpu.memory_space<vmem>>, vector<128x128xbf16>
    %cst = arith.constant dense<0.000000e+00> : vector<256x128xf32>
    %6 = tpu.matmul %4, %5, %cst {dimension_numbers = #tpu.dot_dimension_numbers<[1], [0], [0], [1], [0, 0, 1, 1], [], []>} : vector<256x128xbf16>, vector<128x128xbf16>, vector<256x128xf32> -> vector<256x128xf32>
    %7 = arith.addf %3, %6 : vector<256x128xf32>
    %c0_6 = arith.constant 0 : index
    %c0_7 = arith.constant 0 : index
    %8 = vector.load %arg7[%c0_6, %c0_7] : memref<256x128xf32, #tpu.memory_space<vmem>>, vector<256x128xf32>
    tpu.vector_store %arg7[%c0_6, %c0_7], %7 {strides = array<i32>} : memref<256x128xf32, #tpu.memory_space<vmem>>, vector<256x128xf32>,
    %c2_i32 = arith.constant 2 : i32
    %9 = arith.cmpi eq, %arg2, %c2_i32 : i32
    %10 = arith.extui %9 : i1 to i32
    %c0_i32_8 = arith.constant 0 : i32
    %11 = arith.cmpi ne, %10, %c0_i32_8 : i32
    scf.if %11 {
      %c0_9 = arith.constant 0 : index
      %c0_10 = arith.constant 0 : index
      %12 = vector.load %arg7[%c0_9, %c0_10] : memref<256x128xf32, #tpu.memory_space<vmem>>, vector<256x128xf32>
      %c0_11 = arith.constant 0 : index
      %c0_12 = arith.constant 0 : index
      %13 = vector.load %arg5[%c0_11, %c0_12] : memref<1x128xf32, #tpu.memory_space<vmem>>, vector<1x128xf32>
      %14 = vector.broadcast %13 : vector<1x128xf32> to vector<256x128xf32>
      %15 = arith.addf %12, %14 : vector<256x128xf32>
      %c0_13 = arith.constant 0 : index
      %c0_14 = arith.constant 0 : index
      %16 = vector.load %arg6[%c0_13, %c0_14] : memref<256x128xf32, #tpu.memory_space<vmem>>, vector<256x128xf32>
      tpu.vector_store %arg6[%c0_13, %c0_14], %15 {strides = array<i32>} : memref<256x128xf32, #tpu.memory_space<vmem>>, vector<256x128xf32>,
    } else {
    }
    return
  }
  func.func @transform_0(%arg0: i32, %arg1: i32, %arg2: i32) -> (i32, i32) {
    %c0_i32 = arith.constant 0 : i32
    return %arg0, %arg2 : i32, i32
  }
  func.func @transform_1(%arg0: i32, %arg1: i32, %arg2: i32) -> (i32, i32) {
    %c0_i32 = arith.constant 0 : i32
    return %arg2, %arg1 : i32, i32
  }
  func.func @transform_2(%arg0: i32, %arg1: i32, %arg2: i32) -> (i32, i32) {
    %c0_i32 = arith.constant 0 : i32
    %c0_i32_0 = arith.constant 0 : i32
    return %c0_i32, %arg1 : i32, i32
  }
  func.func @transform_3(%arg0: i32, %arg1: i32, %arg2: i32) -> (i32, i32) {
    %c0_i32 = arith.constant 0 : i32
    return %arg0, %arg1 : i32, i32
  }
}

module attributes {stable_mosaic.version = 11 : i64} {
  func.func @_traj_gate_kernel(%arg0: i32, %arg1: memref<24x128xf32, #tpu.memory_space<vmem>>, %arg2: memref<8x512xbf16, #tpu.memory_space<vmem>>, %arg3: memref<8x128xf32, #tpu.memory_space<vmem>>, %arg4: memref<1x512x128xbf16, #tpu.memory_space<vmem>>, %arg5: memref<24x8xbf16, #tpu.memory_space<vmem>>, %arg6: memref<24x1xf32, #tpu.memory_space<vmem>>, %arg7: memref<8x128xf32, #tpu.memory_space<vmem>>) attributes {dimension_semantics = [#tpu.dimension_semantics<parallel>], iteration_bounds = array<i64: 4>, scalar_prefetch = 0 : i64, scratch_operands = 0 : i64, tpu.core_type = #tpu.core_type<tc>, window_params = [{transform_indices = @transform_0, window_bounds = array<i64: 24, 128>}, {pipeline_mode = #tpu.pipeline_mode<synchronous>, transform_indices = @transform_1, window_bounds = array<i64: 8, 512>}, {transform_indices = @transform_2, window_bounds = array<i64: 8, 128>}, {transform_indices = @transform_3, window_bounds = array<i64: 1, 512, 128>}, {pipeline_mode = #tpu.pipeline_mode<synchronous>, transform_indices = @transform_4, window_bounds = array<i64: 24, 8>}, {pipeline_mode = #tpu.pipeline_mode<synchronous>, transform_indices = @transform_5, window_bounds = array<i64: 24, 1>}, {transform_indices = @transform_6, window_bounds = array<i64: 8, 128>}]} {
    %c0 = arith.constant 0 : index
    %c0_0 = arith.constant 0 : index
    %0 = vector.load %arg2[%c0, %c0_0] : memref<8x512xbf16, #tpu.memory_space<vmem>>, vector<8x512xbf16>
    %c0_1 = arith.constant 0 : index
    %c0_2 = arith.constant 0 : index
    %c0_3 = arith.constant 0 : index
    %1 = vector.load %arg4[%c0_1, %c0_2, %c0_3] : memref<1x512x128xbf16, #tpu.memory_space<vmem>>, vector<1x512x128xbf16>
    %2 = vector.shape_cast %1 : vector<1x512x128xbf16> to vector<512x128xbf16>
    %cst = arith.constant dense<0.000000e+00> : vector<8x128xf32>
    %3 = tpu.matmul %0, %2, %cst {dimension_numbers = #tpu.dot_dimension_numbers<[1], [0], [0], [1], [0, 0, 1, 1], [], []>} : vector<8x512xbf16>, vector<512x128xbf16>, vector<8x128xf32> -> vector<8x128xf32>
    %c0_4 = arith.constant 0 : index
    %c0_5 = arith.constant 0 : index
    %4 = vector.load %arg5[%c0_4, %c0_5] : memref<24x8xbf16, #tpu.memory_space<vmem>>, vector<24x8xbf16>
    %5 = arith.truncf %3 : vector<8x128xf32> to vector<8x128xbf16>
    %cst_6 = arith.constant dense<0.000000e+00> : vector<24x128xf32>
    %6 = tpu.matmul %4, %5, %cst_6 {dimension_numbers = #tpu.dot_dimension_numbers<[1], [0], [0], [1], [0, 0, 1, 1], [], []>} : vector<24x8xbf16>, vector<8x128xbf16>, vector<24x128xf32> -> vector<24x128xf32>
    %c0_7 = arith.constant 0 : index
    %c0_8 = arith.constant 0 : index
    %7 = vector.load %arg6[%c0_7, %c0_8] : memref<24x1xf32, #tpu.memory_space<vmem>>, vector<24x1xf32>
    %8 = vector.broadcast %7 : vector<24x1xf32> to vector<24x128xf32>
    %9 = arith.addf %6, %8 : vector<24x128xf32>
    %c0_9 = arith.constant 0 : index
    %c0_10 = arith.constant 0 : index
    %10 = vector.load %arg1[%c0_9, %c0_10] : memref<24x128xf32, #tpu.memory_space<vmem>>, vector<24x128xf32>
    %11 = vector.extract_strided_slice %10 {offsets = [0, 0], sizes = [8, 128], strides = [1, 1]} : vector<24x128xf32> to vector<8x128xf32>
    %12 = vector.extract_strided_slice %10 {offsets = [8, 0], sizes = [8, 128], strides = [1, 1]} : vector<24x128xf32> to vector<8x128xf32>
    %13 = vector.extract_strided_slice %10 {offsets = [16, 0], sizes = [8, 128], strides = [1, 1]} : vector<24x128xf32> to vector<8x128xf32>
    %14 = vector.extract_strided_slice %9 {offsets = [0, 0], sizes = [8, 128], strides = [1, 1]} : vector<24x128xf32> to vector<8x128xf32>
    %15 = vector.extract_strided_slice %9 {offsets = [8, 0], sizes = [8, 128], strides = [1, 1]} : vector<24x128xf32> to vector<8x128xf32>
    %16 = vector.extract_strided_slice %9 {offsets = [16, 0], sizes = [8, 128], strides = [1, 1]} : vector<24x128xf32> to vector<8x128xf32>
    %17 = arith.addf %11, %14 : vector<8x128xf32>
    %18 = arith.negf %17 : vector<8x128xf32>
    %19 = math.exp %18 : vector<8x128xf32>
    %cst_11 = arith.constant 1.000000e+00 : f32
    %20 = vector.broadcast %cst_11 : f32 to vector<8x128xf32>
    %21 = arith.addf %20, %19 : vector<8x128xf32>
    %22 = arith.divf %20, %21 : vector<8x128xf32>
    %23 = arith.addf %12, %15 : vector<8x128xf32>
    %24 = arith.negf %23 : vector<8x128xf32>
    %25 = math.exp %24 : vector<8x128xf32>
    %cst_12 = arith.constant 1.000000e+00 : f32
    %26 = vector.broadcast %cst_12 : f32 to vector<8x128xf32>
    %27 = arith.addf %26, %25 : vector<8x128xf32>
    %28 = arith.divf %26, %27 : vector<8x128xf32>
    %29 = arith.mulf %28, %16 : vector<8x128xf32>
    %30 = arith.addf %13, %29 : vector<8x128xf32>
    %cst_13 = arith.constant 0.000000e+00 : f32
    %31 = vector.broadcast %cst_13 : f32 to vector<8x128xf32>
    %32 = arith.cmpf oge, %30, %31 : vector<8x128xf32>
    %cst_14 = arith.constant 2.000000e-01 : f32
    %33 = vector.broadcast %cst_14 : f32 to vector<8x128xf32>
    %34 = arith.mulf %33, %30 : vector<8x128xf32>
    %35 = arith.select %32, %30, %34 : vector<8x128xi1>, vector<8x128xf32>
    %cst_15 = arith.constant 1.000000e+00 : f32
    %36 = vector.broadcast %cst_15 : f32 to vector<8x128xf32>
    %37 = arith.subf %36, %22 : vector<8x128xf32>
    %38 = arith.mulf %37, %35 : vector<8x128xf32>
    %c0_16 = arith.constant 0 : index
    %c0_17 = arith.constant 0 : index
    %39 = vector.load %arg3[%c0_16, %c0_17] : memref<8x128xf32, #tpu.memory_space<vmem>>, vector<8x128xf32>
    %40 = arith.mulf %22, %39 : vector<8x128xf32>
    %41 = arith.addf %38, %40 : vector<8x128xf32>
    %c0_18 = arith.constant 0 : index
    %c0_19 = arith.constant 0 : index
    %42 = vector.load %arg7[%c0_18, %c0_19] : memref<8x128xf32, #tpu.memory_space<vmem>>, vector<8x128xf32>
    tpu.vector_store %arg7[%c0_18, %c0_19], %41 {strides = array<i32>} : memref<8x128xf32, #tpu.memory_space<vmem>>, vector<8x128xf32>,
    return
  }
  func.func @transform_0(%arg0: i32) -> (i32, i32) {
    %c0_i32 = arith.constant 0 : i32
    %c0_i32_0 = arith.constant 0 : i32
    return %c0_i32, %arg0 : i32, i32
  }
  func.func @transform_1(%arg0: i32) -> (i32, i32) {
    %c0_i32 = arith.constant 0 : i32
    %c0_i32_0 = arith.constant 0 : i32
    %c0_i32_1 = arith.constant 0 : i32
    return %c0_i32, %c0_i32_0 : i32, i32
  }
  func.func @transform_2(%arg0: i32) -> (i32, i32) {
    %c0_i32 = arith.constant 0 : i32
    %c0_i32_0 = arith.constant 0 : i32
    return %c0_i32, %arg0 : i32, i32
  }
  func.func @transform_3(%arg0: i32) -> (i32, i32, i32) {
    %c0_i32 = arith.constant 0 : i32
    %c0_i32_0 = arith.constant 0 : i32
    %c0_i32_1 = arith.constant 0 : i32
    return %c0_i32, %c0_i32_0, %arg0 : i32, i32, i32
  }
  func.func @transform_4(%arg0: i32) -> (i32, i32) {
    %c0_i32 = arith.constant 0 : i32
    %c0_i32_0 = arith.constant 0 : i32
    %c0_i32_1 = arith.constant 0 : i32
    return %c0_i32, %c0_i32_0 : i32, i32
  }
  func.func @transform_5(%arg0: i32) -> (i32, i32) {
    %c0_i32 = arith.constant 0 : i32
    %c0_i32_0 = arith.constant 0 : i32
    %c0_i32_1 = arith.constant 0 : i32
    return %c0_i32, %c0_i32_0 : i32, i32
  }
  func.func @transform_6(%arg0: i32) -> (i32, i32) {
    %c0_i32 = arith.constant 0 : i32
    %c0_i32_0 = arith.constant 0 : i32
    return %c0_i32, %arg0 : i32, i32
  }
}

module attributes {stable_mosaic.version = 11 : i64} {
  func.func @_mm_bias_kernel(%arg0: i32, %arg1: i32, %arg2: i32, %arg3: memref<512x128xbf16, #tpu.memory_space<vmem>>, %arg4: memref<128x128xbf16, #tpu.memory_space<vmem>>, %arg5: memref<1x128xf32, #tpu.memory_space<vmem>>, %arg6: memref<512x128xbf16, #tpu.memory_space<vmem>>, %arg7: memref<512x128xf32, #tpu.memory_space<vmem>>) attributes {dimension_semantics = [#tpu.dimension_semantics<parallel>, #tpu.dimension_semantics<parallel>, #tpu.dimension_semantics<arbitrary>], iteration_bounds = array<i64: 4, 1, 1>, scalar_prefetch = 0 : i64, scratch_operands = 1 : i64, tpu.core_type = #tpu.core_type<tc>, window_params = [{transform_indices = @transform_0, window_bounds = array<i64: 512, 128>}, {transform_indices = @transform_1, window_bounds = array<i64: 128, 128>}, {transform_indices = @transform_2, window_bounds = array<i64: 1, 128>}, {transform_indices = @transform_3, window_bounds = array<i64: 512, 128>}]} {
    %c0_i32 = arith.constant 0 : i32
    %0 = arith.cmpi eq, %arg2, %c0_i32 : i32
    %1 = arith.extui %0 : i1 to i32
    %c0_i32_0 = arith.constant 0 : i32
    %2 = arith.cmpi ne, %1, %c0_i32_0 : i32
    scf.if %2 {
      %cst_10 = arith.constant 0.000000e+00 : f32
      %12 = vector.broadcast %cst_10 : f32 to vector<512x128xf32>
      %c0_11 = arith.constant 0 : index
      %c0_12 = arith.constant 0 : index
      %13 = vector.load %arg7[%c0_11, %c0_12] : memref<512x128xf32, #tpu.memory_space<vmem>>, vector<512x128xf32>
      tpu.vector_store %arg7[%c0_11, %c0_12], %12 {strides = array<i32>} : memref<512x128xf32, #tpu.memory_space<vmem>>, vector<512x128xf32>,
    } else {
    }
    %c0 = arith.constant 0 : index
    %c0_1 = arith.constant 0 : index
    %3 = vector.load %arg7[%c0, %c0_1] : memref<512x128xf32, #tpu.memory_space<vmem>>, vector<512x128xf32>
    %c0_2 = arith.constant 0 : index
    %c0_3 = arith.constant 0 : index
    %4 = vector.load %arg3[%c0_2, %c0_3] : memref<512x128xbf16, #tpu.memory_space<vmem>>, vector<512x128xbf16>
    %c0_4 = arith.constant 0 : index
    %c0_5 = arith.constant 0 : index
    %5 = vector.load %arg4[%c0_4, %c0_5] : memref<128x128xbf16, #tpu.memory_space<vmem>>, vector<128x128xbf16>
    %cst = arith.constant dense<0.000000e+00> : vector<512x128xf32>
    %6 = tpu.matmul %4, %5, %cst {dimension_numbers = #tpu.dot_dimension_numbers<[1], [0], [0], [1], [0, 0, 1, 1], [], []>} : vector<512x128xbf16>, vector<128x128xbf16>, vector<512x128xf32> -> vector<512x128xf32>
    %7 = arith.addf %3, %6 : vector<512x128xf32>
    %c0_6 = arith.constant 0 : index
    %c0_7 = arith.constant 0 : index
    %8 = vector.load %arg7[%c0_6, %c0_7] : memref<512x128xf32, #tpu.memory_space<vmem>>, vector<512x128xf32>
    tpu.vector_store %arg7[%c0_6, %c0_7], %7 {strides = array<i32>} : memref<512x128xf32, #tpu.memory_space<vmem>>, vector<512x128xf32>,
    %c0_i32_8 = arith.constant 0 : i32
    %9 = arith.cmpi eq, %arg2, %c0_i32_8 : i32
    %10 = arith.extui %9 : i1 to i32
    %c0_i32_9 = arith.constant 0 : i32
    %11 = arith.cmpi ne, %10, %c0_i32_9 : i32
    scf.if %11 {
      %c0_10 = arith.constant 0 : index
      %c0_11 = arith.constant 0 : index
      %12 = vector.load %arg7[%c0_10, %c0_11] : memref<512x128xf32, #tpu.memory_space<vmem>>, vector<512x128xf32>
      %c0_12 = arith.constant 0 : index
      %c0_13 = arith.constant 0 : index
      %13 = vector.load %arg5[%c0_12, %c0_13] : memref<1x128xf32, #tpu.memory_space<vmem>>, vector<1x128xf32>
      %14 = vector.broadcast %13 : vector<1x128xf32> to vector<512x128xf32>
      %15 = arith.addf %12, %14 : vector<512x128xf32>
      %16 = arith.truncf %15 : vector<512x128xf32> to vector<512x128xbf16>
      %c0_14 = arith.constant 0 : index
      %c0_15 = arith.constant 0 : index
      %17 = vector.load %arg6[%c0_14, %c0_15] : memref<512x128xbf16, #tpu.memory_space<vmem>>, vector<512x128xbf16>
      tpu.vector_store %arg6[%c0_14, %c0_15], %16 {strides = array<i32>} : memref<512x128xbf16, #tpu.memory_space<vmem>>, vector<512x128xbf16>,
    } else {
    }
    return
  }
  func.func @transform_0(%arg0: i32, %arg1: i32, %arg2: i32) -> (i32, i32) {
    %c0_i32 = arith.constant 0 : i32
    return %arg0, %arg2 : i32, i32
  }
  func.func @transform_1(%arg0: i32, %arg1: i32, %arg2: i32) -> (i32, i32) {
    %c0_i32 = arith.constant 0 : i32
    return %arg2, %arg1 : i32, i32
  }
  func.func @transform_2(%arg0: i32, %arg1: i32, %arg2: i32) -> (i32, i32) {
    %c0_i32 = arith.constant 0 : i32
    %c0_i32_0 = arith.constant 0 : i32
    return %c0_i32, %arg1 : i32, i32
  }
  func.func @transform_3(%arg0: i32, %arg1: i32, %arg2: i32) -> (i32, i32) {
    %c0_i32 = arith.constant 0 : i32
    return %arg0, %arg1 : i32, i32
  }
}

module attributes {stable_mosaic.version = 11 : i64} {
  func.func @_mm2_bias_kernel(%arg0: i32, %arg1: memref<128x128xbf16, #tpu.memory_space<vmem>>, %arg2: memref<128x128xbf16, #tpu.memory_space<vmem>>, %arg3: memref<1x128xf32, #tpu.memory_space<vmem>>, %arg4: memref<128x128xbf16, #tpu.memory_space<vmem>>, %arg5: memref<1x128xf32, #tpu.memory_space<vmem>>, %arg6: memref<128x128xf32, #tpu.memory_space<vmem>>) attributes {dimension_semantics = [#tpu.dimension_semantics<parallel>], iteration_bounds = array<i64: 16>, scalar_prefetch = 0 : i64, scratch_operands = 0 : i64, tpu.core_type = #tpu.core_type<tc>, window_params = [{transform_indices = @transform_0, window_bounds = array<i64: 128, 128>}, {pipeline_mode = #tpu.pipeline_mode<synchronous>, transform_indices = @transform_1, window_bounds = array<i64: 128, 128>}, {pipeline_mode = #tpu.pipeline_mode<synchronous>, transform_indices = @transform_2, window_bounds = array<i64: 1, 128>}, {pipeline_mode = #tpu.pipeline_mode<synchronous>, transform_indices = @transform_3, window_bounds = array<i64: 128, 128>}, {pipeline_mode = #tpu.pipeline_mode<synchronous>, transform_indices = @transform_4, window_bounds = array<i64: 1, 128>}, {transform_indices = @transform_5, window_bounds = array<i64: 128, 128>}]} {
    %c0 = arith.constant 0 : index
    %c0_0 = arith.constant 0 : index
    %0 = vector.load %arg1[%c0, %c0_0] : memref<128x128xbf16, #tpu.memory_space<vmem>>, vector<128x128xbf16>
    %c0_1 = arith.constant 0 : index
    %c0_2 = arith.constant 0 : index
    %1 = vector.load %arg2[%c0_1, %c0_2] : memref<128x128xbf16, #tpu.memory_space<vmem>>, vector<128x128xbf16>
    %cst = arith.constant dense<0.000000e+00> : vector<128x128xf32>
    %2 = tpu.matmul %0, %1, %cst {dimension_numbers = #tpu.dot_dimension_numbers<[1], [0], [0], [1], [0, 0, 1, 1], [], []>} : vector<128x128xbf16>, vector<128x128xbf16>, vector<128x128xf32> -> vector<128x128xf32>
    %c0_3 = arith.constant 0 : index
    %c0_4 = arith.constant 0 : index
    %3 = vector.load %arg3[%c0_3, %c0_4] : memref<1x128xf32, #tpu.memory_space<vmem>>, vector<1x128xf32>
    %4 = vector.broadcast %3 : vector<1x128xf32> to vector<128x128xf32>
    %5 = arith.addf %2, %4 : vector<128x128xf32>
    %6 = arith.truncf %5 : vector<128x128xf32> to vector<128x128xbf16>
    %c0_5 = arith.constant 0 : index
    %c0_6 = arith.constant 0 : index
    %7 = vector.load %arg4[%c0_5, %c0_6] : memref<128x128xbf16, #tpu.memory_space<vmem>>, vector<128x128xbf16>
    %cst_7 = arith.constant dense<0.000000e+00> : vector<128x128xf32>
    %8 = tpu.matmul %6, %7, %cst_7 {dimension_numbers = #tpu.dot_dimension_numbers<[1], [0], [0], [1], [0, 0, 1, 1], [], []>} : vector<128x128xbf16>, vector<128x128xbf16>, vector<128x128xf32> -> vector<128x128xf32>
    %c0_8 = arith.constant 0 : index
    %c0_9 = arith.constant 0 : index
    %9 = vector.load %arg5[%c0_8, %c0_9] : memref<1x128xf32, #tpu.memory_space<vmem>>, vector<1x128xf32>
    %10 = vector.broadcast %9 : vector<1x128xf32> to vector<128x128xf32>
    %11 = arith.addf %8, %10 : vector<128x128xf32>
    %c0_10 = arith.constant 0 : index
    %c0_11 = arith.constant 0 : index
    %12 = vector.load %arg6[%c0_10, %c0_11] : memref<128x128xf32, #tpu.memory_space<vmem>>, vector<128x128xf32>
    tpu.vector_store %arg6[%c0_10, %c0_11], %11 {strides = array<i32>} : memref<128x128xf32, #tpu.memory_space<vmem>>, vector<128x128xf32>,
    return
  }
  func.func @transform_0(%arg0: i32) -> (i32, i32) {
    %c0_i32 = arith.constant 0 : i32
    %c0_i32_0 = arith.constant 0 : i32
    return %arg0, %c0_i32 : i32, i32
  }
  func.func @transform_1(%arg0: i32) -> (i32, i32) {
    %c0_i32 = arith.constant 0 : i32
    %c0_i32_0 = arith.constant 0 : i32
    %c0_i32_1 = arith.constant 0 : i32
    return %c0_i32, %c0_i32_0 : i32, i32
  }
  func.func @transform_2(%arg0: i32) -> (i32, i32) {
    %c0_i32 = arith.constant 0 : i32
    %c0_i32_0 = arith.constant 0 : i32
    %c0_i32_1 = arith.constant 0 : i32
    return %c0_i32, %c0_i32_0 : i32, i32
  }
  func.func @transform_3(%arg0: i32) -> (i32, i32) {
    %c0_i32 = arith.constant 0 : i32
    %c0_i32_0 = arith.constant 0 : i32
    %c0_i32_1 = arith.constant 0 : i32
    return %c0_i32, %c0_i32_0 : i32, i32
  }
  func.func @transform_4(%arg0: i32) -> (i32, i32) {
    %c0_i32 = arith.constant 0 : i32
    %c0_i32_0 = arith.constant 0 : i32
    %c0_i32_1 = arith.constant 0 : i32
    return %c0_i32, %c0_i32_0 : i32, i32
  }
  func.func @transform_5(%arg0: i32) -> (i32, i32) {
    %c0_i32 = arith.constant 0 : i32
    %c0_i32_0 = arith.constant 0 : i32
    return %arg0, %c0_i32 : i32, i32
  }
}

</mosaic_0001>

<bundles_post_ra>
// kernel: _lambda_.5
= control target key start
LH: loop header
LB: loop body
LE: loop exit
PB: predicated region body
PF: predicated region fallthrough
CT: control target
= control target key end

     0   :  { %s1180_s12 = smov 0   ;;  %s1182_s13 = smov 0   ;;  %s1330_s0 = inlined_call_operand.vmem [shape: bf16[512,128], index: 0, kind: input, shape index: {}]   ;;  %s1331_s1 = inlined_call_operand.vmem [shape: bf16[128,128], index: 1, kind: input, shape index: {}]   ;;  %s1332_s2 = inlined_call_operand.vmem [shape: f32[1,128], index: 2, kind: input, shape index: {}]   ;;  %s1333_s3 = inlined_call_operand.vmem [shape: f32[512,128], index: 3, kind: output, shape index: {}]  }
   0x1   :  { %s1184_s14 = smov 0  }
   0x2 LB: > { %s32_s15 = sadd.s32 1, %s1154_s13  ;;  %p968_p0 = scmp.ge.s32.totalorder %s1158_s14, 1  ;;  %s1158_s14 = sphi %s1184_s14, %s13_s14   ;;  %s1154_s13 = sphi %s1182_s13, %s1335_s13   ;;  %s1150_s12 = sphi %s1180_s12, %s1334_s12  }
   0x3   : > { %p34_p1 = scmp.ge.s32.totalorder %s32_s15, 2  ;;  %p188_p2 = scmp.lt.s32.totalorder %s1158_s14, 3 }
   0x5   : > { %s1337_s15 = smov (%p34_p1, %s32_s15), 0  ;;  %p189_p3 = pnand %p968_p0, %p188_p2 }
   0x6   : > { %s969_s18 = sshll.u32 (!%p189_p3), %s1150_s12, 5 }
   0x7   : > { %192 = sbr.rel (%p189_p3) target bundleno = 271 (0x10f), region = 32  ;;  %p230_p4 = scmp.lt.s32.totalorder (!%p189_p3), %s969_s18, 63 }
   0xc   : > { %v1112_v0 = vld [vmem:[%s1331_s1 + $0x38] sm:$0xff]   ;;  %v1113_v1 = vld [vmem:[%s1331_s1 + $0x30] sm:$0xff]   ;;  %s1339_s18 = smov (!%p230_p4, %s969_s18), 63  ;;  %v1114_v2 = vld [vmem:[%s1331_s1 + $0x28] sm:$0xff]  }
   0xd   : > { %1024 = vmatprep.subr.bf16.mxu0 %v1112_v0  ;;  %1072 = vmatprep.subr.bf16.mxu1 %v1112_v0  ;;  %s970_s23 = sshll.u32 %s1339_s18, 2  ;;  %v1115_v3 = vld [vmem:[%s1331_s1 + $0x20] sm:$0xff]   ;;  %v1116_v6 = vld [vmem:[%s1331_s1 + $0x18] sm:$0xff]   ;;  %v1117_v7 = vld [vmem:[%s1331_s1 + $0x10] sm:$0xff]   ;;  %s972_s10 = sshll.u32 %s1339_s18, 3 }
   0xe   : > { %1025 = vmatpush3.bf16.msra.mxu0 %v1112_v0  ;;  %1080 = vmatpush3.bf16.msra.mxu1 %v1112_v0  ;;  %s1213_s26 = scalar_lea.vmem %s1330_s0, %s970_s23  ;;  %v1118_v8 = vld [vmem:[%s1331_s1 + $0x8] sm:$0xff]   ;;  %v1119_v9 = vld [vmem:[%s1331_s1] sm:$0xff]   ;;  %s1255_s19 = scalar_lea.vmem %s1333_s3, %s972_s10 }
   0xf   : > { %1026 = vmatprep.subr.bf16.mxu0 %v1113_v1  ;;  %1073 = vmatprep.subr.bf16.mxu1 %v1113_v1  ;;  %v1120_v4 = vld [vmem:[%s1213_s26] sm:$0xff]   ;;  %v1122_v10 = vld [vmem:[%s1213_s26 + $0x8] sm:$0xff]   ;;  %v1124_v12 = vld [vmem:[%s1213_s26 + $0x10] sm:$0xff]  }
  0x10   : > { %v1121_v5 = vld [vmem:[%s1213_s26 + $0x40] sm:$0xff]   ;;  %1040 = vmatprep.mubr.bf16.mxu0 %v1120_v4  ;;  %v1123_v11 = vld [vmem:[%s1213_s26 + $0x48] sm:$0xff]   ;;  %v1125_v13 = vld [vmem:[%s1213_s26 + $0x50] sm:$0xff]  }
  0x11   : > { %1056 = vmatprep.mubr.bf16.mxu1 %v1121_v5  ;;  %v1126_v14 = vld [vmem:[%s1213_s26 + $0x18] sm:$0xff]   ;;  %v1128_v16 = vld [vmem:[%s1213_s26 + $0x20] sm:$0xff]   ;;  %v1130_v18 = vld [vmem:[%s1213_s26 + $0x28] sm:$0xff]  }
  0x12   : > { %1027 = vmatpush3.bf16.msra.mxu0 %v1113_v1  ;;  %1081 = vmatpush3.bf16.msra.mxu1 %v1113_v1  ;;  %v1127_v15 = vld [vmem:[%s1213_s26 + $0x58] sm:$0xff]   ;;  %v1129_v17 = vld [vmem:[%s1213_s26 + $0x60] sm:$0xff]   ;;  %v1131_v19 = vld [vmem:[%s1213_s26 + $0x68] sm:$0xff]  }
  0x13   : > { %1028 = vmatprep.subr.bf16.mxu0 %v1114_v2  ;;  %1074 = vmatprep.subr.bf16.mxu1 %v1114_v2  ;;  %v1132_v20 = vld [vmem:[%s1213_s26 + $0x30] sm:$0xff]   ;;  %v1134_v22 = vld [vmem:[%s1213_s26 + $0x38] sm:$0xff]   ;;  %v1250_v24 = vld [vmem:[%s1332_s2] ss:$0 sm:$0xff] }
  0x14   : > { %v1133_v21 = vld [vmem:[%s1213_s26 + $0x70] sm:$0xff]   ;;  %v1135_v23 = vld [vmem:[%s1213_s26 + $0x78] sm:$0xff]  }
  0x16   : > { %1029 = vmatpush3.bf16.msra.mxu0 %v1114_v2  ;;  %1082 = vmatpush3.bf16.msra.mxu1 %v1114_v2 }
  0x17   : > { %1030 = vmatprep.subr.bf16.mxu0 %v1115_v3  ;;  %1075 = vmatprep.subr.bf16.mxu1 %v1115_v3 }
  0x1a   : > { %1031 = vmatpush3.bf16.msra.mxu0 %v1115_v3  ;;  %1083 = vmatpush3.bf16.msra.mxu1 %v1115_v3 }
  0x1b   : > { %1032 = vmatprep.subr.bf16.mxu0 %v1116_v6  ;;  %1076 = vmatprep.subr.bf16.mxu1 %v1116_v6 }
  0x1e   : > { %1033 = vmatpush3.bf16.msra.mxu0 %v1116_v6  ;;  %1084 = vmatpush3.bf16.msra.mxu1 %v1116_v6 }
  0x1f   : > { %1034 = vmatprep.subr.bf16.mxu0 %v1117_v7  ;;  %1077 = vmatprep.subr.bf16.mxu1 %v1117_v7 }
  0x22   : > { %1035 = vmatpush3.bf16.msra.mxu0 %v1117_v7  ;;  %1085 = vmatpush3.bf16.msra.mxu1 %v1117_v7 }
  0x23   : > { %1036 = vmatprep.subr.bf16.mxu0 %v1118_v8  ;;  %1078 = vmatprep.subr.bf16.mxu1 %v1118_v8 }
  0x26   : > { %1037 = vmatpush3.bf16.msra.mxu0 %v1118_v8  ;;  %1086 = vmatpush3.bf16.msra.mxu1 %v1118_v8 }
  0x27   : > { %1038 = vmatprep.subr.bf16.mxu0 %v1119_v9  ;;  %1079 = vmatprep.subr.bf16.mxu1 %v1119_v9 }
  0x2a   : > { %1039 = vmatpush3.bf16.msra.mxu0 %v1119_v9  ;;  %1087 = vmatpush3.bf16.msra.mxu1 %v1119_v9 }
  0x2d   : > { %1041 = vmatmul.mubr.bf16.vlgmr.msra.gmra.mxu0 %v1122_v10  ;;  %1057 = vmatmul.mubr.bf16.vlgmr.msra.gmra.mxu1 %v1123_v11 }
  0x2e   : > { %1044 = vmatprep.mubr.bf16.mxu0 %v1124_v12  ;;  %1060 = vmatprep.mubr.bf16.mxu1 %v1125_v13 }
  0x35   : > { %1045 = vmatmul.mubr.bf16.gmra.mxu0 %v1126_v14  ;;  %1061 = vmatmul.mubr.bf16.gmra.mxu1 %v1127_v15 }
  0x36   : > { %1048 = vmatprep.mubr.bf16.mxu0 %v1128_v16  ;;  %1064 = vmatprep.mubr.bf16.mxu1 %v1129_v17 }
  0x3d   : > { %1049 = vmatmul.mubr.bf16.gmra.mxu0 %v1130_v18  ;;  %1065 = vmatmul.mubr.bf16.gmra.mxu1 %v1131_v19 }
  0x3e   : > { %1052 = vmatprep.mubr.bf16.mxu0 %v1132_v20  ;;  %1068 = vmatprep.mubr.bf16.mxu1 %v1133_v21 }
  0x45   : > { %1053 = vmatmul.mubr.bf16.gmra.mxu0 %v1134_v22  ;;  %1069 = vmatmul.mubr.bf16.gmra.mxu1 %v1135_v23 }
  0xed   : > { %v1042_v25 = vpop.f32.mrf.mxu0  ;;  %v1058_v26 = vpop.f32.mrf.mxu1 }
  0xee   : > { %v789_v27 = vadd.f32 %v1042_v25, %v1250_v24  ;;  %v805_v28 = vadd.f32 %v1058_v26, %v1250_v24 }
  0xef   : > { %v554_v29 = vpop.f32.mrf.mxu0  ;;  %v618_v30 = vpop.f32.mrf.mxu1 }
  0xf0   : > { %821 = vst [vmem:[%s1255_s19 + $0x10] sm:$0xff] %v789_v27  ;;  %837 = vst [vmem:[%s1255_s19 + $0x90] sm:$0xff] %v805_v28  ;;  %v787_v31 = vadd.f32 %v1250_v24, %v554_v29  ;;  %v803_v32 = vadd.f32 %v1250_v24, %v618_v30 }
  0xf1   : > { %v1043_v33 = vpop.f32.mrf.mxu0  ;;  %v1059_v34 = vpop.f32.mrf.mxu1 }
  0xf2   : > { %819 = vst [vmem:[%s1255_s19] sm:$0xff] %v787_v31  ;;  %835 = vst [vmem:[%s1255_s19 + $0x80] sm:$0xff] %v803_v32  ;;  %v790_v35 = vadd.f32 %v1043_v33, %v1250_v24  ;;  %v806_v36 = vadd.f32 %v1059_v34, %v1250_v24 }
  0xf3   : > { %v557_v37 = vpop.f32.mrf.mxu0  ;;  %v621_v38 = vpop.f32.mrf.mxu1 }
  0xf4   : > { %822 = vst [vmem:[%s1255_s19 + $0x18] sm:$0xff] %v790_v35  ;;  %838 = vst [vmem:[%s1255_s19 + $0x98] sm:$0xff] %v806_v36  ;;  %v788_v39 = vadd.f32 %v1250_v24, %v557_v37  ;;  %v804_v40 = vadd.f32 %v1250_v24, %v621_v38 }
  0xf5   : > { %v1046_v41 = vpop.f32.mrf.mxu0  ;;  %v1062_v42 = vpop.f32.mrf.mxu1 }
  0xf6   : > { %820 = vst [vmem:[%s1255_s19 + $0x8] sm:$0xff] %v788_v39  ;;  %836 = vst [vmem:[%s1255_s19 + $0x88] sm:$0xff] %v804_v40  ;;  %v793_v43 = vadd.f32 %v1046_v41, %v1250_v24  ;;  %v809_v44 = vadd.f32 %v1062_v42, %v1250_v24 }
  0xf7   : > { %v570_v45 = vpop.f32.mrf.mxu0  ;;  %v634_v46 = vpop.f32.mrf.mxu1 }
  0xf8   : > { %825 = vst [vmem:[%s1255_s19 + $0x30] sm:$0xff] %v793_v43  ;;  %841 = vst [vmem:[%s1255_s19 + $0xb0] sm:$0xff] %v809_v44  ;;  %v791_v47 = vadd.f32 %v1250_v24, %v570_v45  ;;  %v807_v48 = vadd.f32 %v1250_v24, %v634_v46 }
  0xf9   : > { %v1047_v49 = vpop.f32.mrf.mxu0  ;;  %v1063_v50 = vpop.f32.mrf.mxu1 }
  0xfa   : > { %823 = vst [vmem:[%s1255_s19 + $0x20] sm:$0xff] %v791_v47  ;;  %839 = vst [vmem:[%s1255_s19 + $0xa0] sm:$0xff] %v807_v48  ;;  %v794_v51 = vadd.f32 %v1047_v49, %v1250_v24  ;;  %v810_v52 = vadd.f32 %v1063_v50, %v1250_v24 }
  0xfb   : > { %v573_v53 = vpop.f32.mrf.mxu0  ;;  %v637_v54 = vpop.f32.mrf.mxu1 }
  0xfc   : > { %826 = vst [vmem:[%s1255_s19 + $0x38] sm:$0xff] %v794_v51  ;;  %842 = vst [vmem:[%s1255_s19 + $0xb8] sm:$0xff] %v810_v52  ;;  %v792_v55 = vadd.f32 %v1250_v24, %v573_v53  ;;  %v808_v56 = vadd.f32 %v1250_v24, %v637_v54 }
  0xfd   : > { %v1050_v57 = vpop.f32.mrf.mxu0  ;;  %v1066_v58 = vpop.f32.mrf.mxu1 }
  0xfe   : > { %824 = vst [vmem:[%s1255_s19 + $0x28] sm:$0xff] %v792_v55  ;;  %840 = vst [vmem:[%s1255_s19 + $0xa8] sm:$0xff] %v808_v56  ;;  %v797_v59 = vadd.f32 %v1050_v57, %v1250_v24  ;;  %v813_v60 = vadd.f32 %v1066_v58, %v1250_v24 }
  0xff   : > { %v586_v61 = vpop.f32.mrf.mxu0  ;;  %v650_v62 = vpop.f32.mrf.mxu1 }
 0x100   : > { %829 = vst [vmem:[%s1255_s19 + $0x50] sm:$0xff] %v797_v59  ;;  %845 = vst [vmem:[%s1255_s19 + $0xd0] sm:$0xff] %v813_v60  ;;  %v795_v63 = vadd.f32 %v1250_v24, %v586_v61  ;;  %v811_v0 = vadd.f32 %v1250_v24, %v650_v62 }
 0x101   : > { %v1051_v1 = vpop.f32.mrf.mxu0  ;;  %v1067_v2 = vpop.f32.mrf.mxu1 }
 0x102   : > { %827 = vst [vmem:[%s1255_s19 + $0x40] sm:$0xff] %v795_v63  ;;  %843 = vst [vmem:[%s1255_s19 + $0xc0] sm:$0xff] %v811_v0  ;;  %v798_v3 = vadd.f32 %v1051_v1, %v1250_v24  ;;  %v814_v4 = vadd.f32 %v1067_v2, %v1250_v24 }
 0x103   : > { %v589_v5 = vpop.f32.mrf.mxu0  ;;  %v653_v6 = vpop.f32.mrf.mxu1 }
 0x104   : > { %830 = vst [vmem:[%s1255_s19 + $0x58] sm:$0xff] %v798_v3  ;;  %846 = vst [vmem:[%s1255_s19 + $0xd8] sm:$0xff] %v814_v4  ;;  %v796_v7 = vadd.f32 %v1250_v24, %v589_v5  ;;  %v812_v8 = vadd.f32 %v1250_v24, %v653_v6 }
 0x105   : > { %v1054_v9 = vpop.f32.mrf.mxu0  ;;  %v1070_v10 = vpop.f32.mrf.mxu1 }
 0x106   : > { %828 = vst [vmem:[%s1255_s19 + $0x48] sm:$0xff] %v796_v7  ;;  %844 = vst [vmem:[%s1255_s19 + $0xc8] sm:$0xff] %v812_v8  ;;  %v801_v11 = vadd.f32 %v1054_v9, %v1250_v24  ;;  %v817_v12 = vadd.f32 %v1070_v10, %v1250_v24 }
 0x107   : > { %v602_v13 = vpop.f32.mrf.mxu0  ;;  %v666_v14 = vpop.f32.mrf.mxu1 }
 0x108   : > { %833 = vst [vmem:[%s1255_s19 + $0x70] sm:$0xff] %v801_v11  ;;  %849 = vst [vmem:[%s1255_s19 + $0xf0] sm:$0xff] %v817_v12  ;;  %v799_v15 = vadd.f32 %v1250_v24, %v602_v13  ;;  %v815_v16 = vadd.f32 %v1250_v24, %v666_v14 }
 0x109   : > { %v1055_v17 = vpop.f32.mrf.mxu0  ;;  %v1071_v18 = vpop.f32.mrf.mxu1 }
 0x10a   : > { %831 = vst [vmem:[%s1255_s19 + $0x60] sm:$0xff] %v799_v15  ;;  %847 = vst [vmem:[%s1255_s19 + $0xe0] sm:$0xff] %v815_v16  ;;  %v802_v19 = vadd.f32 %v1055_v17, %v1250_v24  ;;  %v818_v20 = vadd.f32 %v1071_v18, %v1250_v24 }
 0x10b   : > { %v605_v21 = vpop.f32.mrf.mxu0  ;;  %v669_v22 = vpop.f32.mrf.mxu1 }
 0x10c   : > { %834 = vst [vmem:[%s1255_s19 + $0x78] sm:$0xff] %v802_v19  ;;  %850 = vst [vmem:[%s1255_s19 + $0xf8] sm:$0xff] %v818_v20  ;;  %v800_v23 = vadd.f32 %v1250_v24, %v605_v21  ;;  %v816_v25 = vadd.f32 %v1250_v24, %v669_v22 }
 0x10e   : > { %832 = vst [vmem:[%s1255_s19 + $0x68] sm:$0xff] %v800_v23  ;;  %848 = vst [vmem:[%s1255_s19 + $0xe8] sm:$0xff] %v816_v25 }
 0x10f PF: > { %s13_s14 = sadd.s32 1, %s1158_s14   ;;  %s1334_s12 = smov %s1154_s13 }
 0x110   : > { %p10_p5 = scmp.ge.s32.totalorder %s13_s14, 4   ;;  %s1335_s13 = smov %s1337_s15 }
 0x112   :  { %12 = sbr.rel (!%p10_p5) target bundleno = 2 (0x2), region = 76 }

// kernel: _lambda_.6
= control target key start
LH: loop header
LB: loop body
LE: loop exit
PB: predicated region body
PF: predicated region fallthrough
CT: control target
= control target key end

     0   :  { %s1419_s12 = smov 0   ;;  %s1421_s13 = smov 0   ;;  %s1680_s0 = inlined_call_operand.vmem [shape: bf16[512,384], index: 0, kind: input, shape index: {}]   ;;  %s1681_s1 = inlined_call_operand.vmem [shape: bf16[384,128], index: 1, kind: input, shape index: {}]   ;;  %s1682_s2 = inlined_call_operand.vmem [shape: f32[1,128], index: 2, kind: input, shape index: {}]   ;;  %s1683_s3 = inlined_call_operand.vmem [shape: f32[512,128], index: 3, kind: output, shape index: {}]  }
   0x1   :  { %s1423_s14 = smov 0   ;;  %s1425_s15 = smov 0  }
   0x2   :  { %s1427_s16 = smov 0   ;;  %s1429_s17 = smov 0  }
   0x3   :  { %s1431_s18 = smov 0  }
   0x4 LB: > { %s25_s19 = sadd.s32 1, %s1388_s16  ;;  %s32_s20 = sadd.s32 1, %s1392_s17  ;;  %s1396_s18 = sphi %s1431_s18, %s13_s18   ;;  %s1392_s17 = sphi %s1429_s17, %s1689_s17   ;;  %s1388_s16 = sphi %s1427_s16, %s1688_s16   ;;  %s1384_s15 = sphi %s1425_s15, %s1687_s15   ;;  %s1380_s14 = sphi %s1423_s14, %s1686_s14   ;;  %s1376_s13 = sphi %s1421_s13, %s1685_s13   ;;  %s1372_s12 = sphi %s1419_s12, %s1684_s12  }
   0x5   : > { %p26_p0 = scmp.ge.s32.totalorder %s25_s19, 3  ;;  %p48_p1 = scmp.ne.s32.totalorder %s1376_s13, %s1372_s12 }
   0x6   : > { %p49_p2 = scmp.eq.s32.totalorder %s1396_s18, 0  ;;  %s41_s24 = sadd.s32 1, %s1376_s13 }
   0x7   : > { %s1691_s19 = smov (%p26_p0, %s25_s19), 0  ;;  %s1693_s20 = smov (!%p26_p0, %s32_s20), %s1392_s17 }
   0x8   : > { %p50_p3 = por %p49_p2, %p48_p1  ;;  %p34_p4 = scmp.ge.s32.totalorder %s1693_s20, 2 }
   0x9   : > { %s37_s21 = ssub.s32 %s1388_s16, %s1691_s19  ;;  %p1132_p6 = scmp.ge.s32.totalorder %s1396_s18, 6 }
   0xa   : > { %s1695_s20 = smov (%p34_p4, %s1693_s20), 0 }
   0xb   : > { %s36_s22 = ssub.s32 %s1392_s17, %s1695_s20  ;;  %162 = sbr.rel (%p1132_p6) target bundleno = 44 (0x2c), region = 20 }
   0xc   : > { %s38_s23 = sor.u32 %s37_s21, %s36_s22 }
   0xd   : > { %p39_p5 = scmp.eq.s32.totalorder %s38_s23, 0 }
   0xf   : > { %s1470_s25 = scalar_select %p39_p5, %s1376_s13, %s41_s24  }
  0x10   : > { %165 = sbr.rel (!%p50_p3) target bundleno = 44 (0x2c), region = 24  ;;  %s167_s26 = sand.u32 (%p50_p3), 1, %s1376_s13  }
  0x11   : > { %s1260_s27 = smul.u32 (%p50_p3), 96, %s1392_s17  ;;  %s1133_s28 = sshll.u32 (%p50_p3), %s167_s26, 7 }
  0x12   : > { %s1484_s7 = scalar_lea.vmem (%p50_p3), [#allocation3], %s1133_s28 }
  0x13   : > { %s172_s29 = sadd.s32 (%p50_p3), %s1388_s16, %s1260_s27 }
  0x14   : > { %s1136_s30 = sshll.u32 (%p50_p3), %s172_s29, 2 }
  0x15   : > { %s1479_s6 = scalar_lea.vmem %s1680_s0, %s1136_s30 }
  0x16   : > { %v191_v0 = vld [vmem:[%s1479_s6] sm:$0xf]  ;;  %v193_v1 = vld [vmem:[%s1479_s6 + $0xc] sm:$0xf]  ;;  %v195_v2 = vld [vmem:[%s1479_s6 + $0x18] sm:$0xf] }
  0x17   : > { %192 = vst [vmem:[%s1484_s7] sm:$0xf] %v191_v0  ;;  %194 = vst [vmem:[%s1484_s7 + $0x4] sm:$0xf] %v193_v1  ;;  %v197_v3 = vld [vmem:[%s1479_s6 + $0x24] sm:$0xf] }
  0x18   : > { %196 = vst [vmem:[%s1484_s7 + $0x8] sm:$0xf] %v195_v2  ;;  %v199_v4 = vld [vmem:[%s1479_s6 + $0x30] sm:$0xf]  ;;  %v201_v5 = vld [vmem:[%s1479_s6 + $0x3c] sm:$0xf] }
  0x19   : > { %198 = vst [vmem:[%s1484_s7 + $0xc] sm:$0xf] %v197_v3  ;;  %200 = vst [vmem:[%s1484_s7 + $0x10] sm:$0xf] %v199_v4  ;;  %v203_v6 = vld [vmem:[%s1479_s6 + $0x48] sm:$0xf] }
  0x1a   : > { %202 = vst [vmem:[%s1484_s7 + $0x14] sm:$0xf] %v201_v5  ;;  %v205_v7 = vld [vmem:[%s1479_s6 + $0x54] sm:$0xf]  ;;  %v207_v8 = vld [vmem:[%s1479_s6 + $0x60] sm:$0xf] }
  0x1b   : > { %204 = vst [vmem:[%s1484_s7 + $0x18] sm:$0xf] %v203_v6  ;;  %206 = vst [vmem:[%s1484_s7 + $0x1c] sm:$0xf] %v205_v7  ;;  %v209_v9 = vld [vmem:[%s1479_s6 + $0x6c] sm:$0xf] }
  0x1c   : > { %208 = vst [vmem:[%s1484_s7 + $0x20] sm:$0xf] %v207_v8  ;;  %v211_v10 = vld [vmem:[%s1479_s6 + $0x78] sm:$0xf]  ;;  %v213_v11 = vld [vmem:[%s1479_s6 + $0x84] sm:$0xf] }
  0x1d   : > { %210 = vst [vmem:[%s1484_s7 + $0x24] sm:$0xf] %v209_v9  ;;  %212 = vst [vmem:[%s1484_s7 + $0x28] sm:$0xf] %v211_v10  ;;  %v215_v12 = vld [vmem:[%s1479_s6 + $0x90] sm:$0xf] }
  0x1e   : > { %214 = vst [vmem:[%s1484_s7 + $0x2c] sm:$0xf] %v213_v11  ;;  %v217_v13 = vld [vmem:[%s1479_s6 + $0x9c] sm:$0xf]  ;;  %v219_v14 = vld [vmem:[%s1479_s6 + $0xa8] sm:$0xf] }
  0x1f   : > { %216 = vst [vmem:[%s1484_s7 + $0x30] sm:$0xf] %v215_v12  ;;  %218 = vst [vmem:[%s1484_s7 + $0x34] sm:$0xf] %v217_v13  ;;  %v221_v15 = vld [vmem:[%s1479_s6 + $0xb4] sm:$0xf] }
  0x20   : > { %220 = vst [vmem:[%s1484_s7 + $0x38] sm:$0xf] %v219_v14  ;;  %v223_v16 = vld [vmem:[%s1479_s6 + $0xc0] sm:$0xf]  ;;  %v225_v17 = vld [vmem:[%s1479_s6 + $0xcc] sm:$0xf] }
  0x21   : > { %222 = vst [vmem:[%s1484_s7 + $0x3c] sm:$0xf] %v221_v15  ;;  %224 = vst [vmem:[%s1484_s7 + $0x40] sm:$0xf] %v223_v16  ;;  %v227_v18 = vld [vmem:[%s1479_s6 + $0xd8] sm:$0xf] }
  0x22   : > { %226 = vst [vmem:[%s1484_s7 + $0x44] sm:$0xf] %v225_v17  ;;  %v229_v19 = vld [vmem:[%s1479_s6 + $0xe4] sm:$0xf]  ;;  %v231_v20 = vld [vmem:[%s1479_s6 + $0xf0] sm:$0xf] }
  0x23   : > { %228 = vst [vmem:[%s1484_s7 + $0x48] sm:$0xf] %v227_v18  ;;  %230 = vst [vmem:[%s1484_s7 + $0x4c] sm:$0xf] %v229_v19  ;;  %v233_v21 = vld [vmem:[%s1479_s6 + $0xfc] sm:$0xf] }
  0x24   : > { %232 = vst [vmem:[%s1484_s7 + $0x50] sm:$0xf] %v231_v20  ;;  %v235_v22 = vld [vmem:[%s1479_s6 + $0x108] sm:$0xf]  ;;  %v237_v23 = vld [vmem:[%s1479_s6 + $0x114] sm:$0xf] }
  0x25   : > { %234 = vst [vmem:[%s1484_s7 + $0x54] sm:$0xf] %v233_v21  ;;  %236 = vst [vmem:[%s1484_s7 + $0x58] sm:$0xf] %v235_v22  ;;  %v239_v24 = vld [vmem:[%s1479_s6 + $0x120] sm:$0xf] }
  0x26   : > { %238 = vst [vmem:[%s1484_s7 + $0x5c] sm:$0xf] %v237_v23  ;;  %v241_v25 = vld [vmem:[%s1479_s6 + $0x12c] sm:$0xf]  ;;  %v243_v26 = vld [vmem:[%s1479_s6 + $0x138] sm:$0xf] }
  0x27   : > { %240 = vst [vmem:[%s1484_s7 + $0x60] sm:$0xf] %v239_v24  ;;  %242 = vst [vmem:[%s1484_s7 + $0x64] sm:$0xf] %v241_v25  ;;  %v245_v27 = vld [vmem:[%s1479_s6 + $0x144] sm:$0xf] }
  0x28   : > { %244 = vst [vmem:[%s1484_s7 + $0x68] sm:$0xf] %v243_v26  ;;  %v247_v28 = vld [vmem:[%s1479_s6 + $0x150] sm:$0xf]  ;;  %v249_v29 = vld [vmem:[%s1479_s6 + $0x15c] sm:$0xf] }
  0x29   : > { %246 = vst [vmem:[%s1484_s7 + $0x6c] sm:$0xf] %v245_v27  ;;  %248 = vst [vmem:[%s1484_s7 + $0x70] sm:$0xf] %v247_v28  ;;  %v251_v30 = vld [vmem:[%s1479_s6 + $0x168] sm:$0xf] }
  0x2a   : > { %250 = vst [vmem:[%s1484_s7 + $0x74] sm:$0xf] %v249_v29  ;;  %v253_v31 = vld [vmem:[%s1479_s6 + $0x174] sm:$0xf]  ;;  %252 = vst [vmem:[%s1484_s7 + $0x78] sm:$0xf] %v251_v30 }
  0x2b   : > { %254 = vst [vmem:[%s1484_s7 + $0x7c] sm:$0xf] %v253_v31 }
  0x2c PF: > { %p1137_p7 = scmp.ge.s32.totalorder %s1396_s18, 1  ;;  %p353_p8 = scmp.lt.s32.totalorder %s1396_s18, 7 }
  0x2e   : > { %p354_p9 = pnand %p1137_p7, %p353_p8 }
  0x2f   : > { %s360_s8 = sand.u32 (!%p354_p9), 1, %s1372_s12   ;;  %s1139_s9 = sshll.u32 (!%p354_p9), %s1380_s14, 4 }
  0x30   : > { %357 = sbr.rel (%p354_p9) target bundleno = 356 (0x164), region = 69  ;;  %s1138_s10 = sshll.u32 (!%p354_p9), %s360_s8, 7 }
  0x31   : > { %p399_p10 = scmp.lt.s32.totalorder (!%p354_p9), %s1139_s9, 47  ;;  %s1141_s11 = sshll.u32 (!%p354_p9), %s1384_s15, 5 }
  0x32   : > { %p411_p11 = scmp.lt.s32.totalorder (!%p354_p9), %s1141_s11, 63  ;;  %s1562_s12 = scalar_lea.vmem (!%p354_p9), [#allocation3], %s1138_s10 }
  0x33   : > { %p1143_p12 = scmp.ne.s32.totalorder (!%p354_p9), %s1380_s14, 0 }
  0x35   : > { %s1697_s9 = smov (!%p399_p10, %s1139_s9), 47  ;;  %s1699_s11 = smov (!%p411_p11, %s1141_s11), 63 }
  0x36   : > { %s1140_s21 = sshll.u32 %s1697_s9, 2  ;;  %s1142_s26 = sshll.u32 %s1699_s11, 3 }
  0x37   : > { %s1555_s24 = scalar_lea.vmem %s1681_s1, %s1140_s21  ;;  %s1560_s29 = scalar_lea.vmem %s1683_s3, %s1142_s26 }
  0x38   : > { %423 = sbr.rel (%p1143_p12) target bundleno = 78 (0x4e), region = 77 }
  0x3d   : > { %v1398_v32 = vmov 0.0  }
  0x3e   : > { %424 = vst [vmem:[#allocation2 + $0xb0] sm:$0xff] %v1398_v32  ;;  %425 = vst [vmem:[#allocation2] sm:$0xff] %v1398_v32 }
  0x3f   : > { %426 = vst [vmem:[#allocation2 + $0xd8] sm:$0xff] %v1398_v32  ;;  %427 = vst [vmem:[#allocation2 + $0x18] sm:$0xff] %v1398_v32 }
  0x40   : > { %428 = vst [vmem:[#allocation2 + $0x50] sm:$0xff] %v1398_v32  ;;  %429 = vst [vmem:[#allocation2 + $0x68] sm:$0xff] %v1398_v32 }
  0x41   : > { %430 = vst [vmem:[#allocation2 + $0x30] sm:$0xff] %v1398_v32  ;;  %431 = vst [vmem:[#allocation2 + $0x48] sm:$0xff] %v1398_v32 }
  0x42   : > { %432 = vst [vmem:[#allocation2 + $0x80] sm:$0xff] %v1398_v32  ;;  %433 = vst [vmem:[#allocation2 + $0x88] sm:$0xff] %v1398_v32 }
  0x43   : > { %434 = vst [vmem:[#allocation2 + $0xe8] sm:$0xff] %v1398_v32  ;;  %435 = vst [vmem:[#allocation2 + $0xb8] sm:$0xff] %v1398_v32 }
  0x44   : > { %436 = vst [vmem:[#allocation2 + $0x60] sm:$0xff] %v1398_v32  ;;  %437 = vst [vmem:[#allocation2 + $0xf0] sm:$0xff] %v1398_v32 }
  0x45   : > { %438 = vst [vmem:[#allocation2 + $0x8] sm:$0xff] %v1398_v32  ;;  %439 = vst [vmem:[#allocation2 + $0x78] sm:$0xff] %v1398_v32 }
  0x46   : > { %440 = vst [vmem:[#allocation2 + $0x38] sm:$0xff] %v1398_v32  ;;  %441 = vst [vmem:[#allocation2 + $0x58] sm:$0xff] %v1398_v32 }
  0x47   : > { %442 = vst [vmem:[#allocation2 + $0x40] sm:$0xff] %v1398_v32  ;;  %443 = vst [vmem:[#allocation2 + $0xc8] sm:$0xff] %v1398_v32 }
  0x48   : > { %444 = vst [vmem:[#allocation2 + $0xe0] sm:$0xff] %v1398_v32  ;;  %445 = vst [vmem:[#allocation2 + $0x90] sm:$0xff] %v1398_v32 }
  0x49   : > { %446 = vst [vmem:[#allocation2 + $0x70] sm:$0xff] %v1398_v32  ;;  %447 = vst [vmem:[#allocation2 + $0xc0] sm:$0xff] %v1398_v32 }
  0x4a   : > { %448 = vst [vmem:[#allocation2 + $0xa8] sm:$0xff] %v1398_v32  ;;  %449 = vst [vmem:[#allocation2 + $0xd0] sm:$0xff] %v1398_v32 }
  0x4b   : > { %450 = vst [vmem:[#allocation2 + $0x10] sm:$0xff] %v1398_v32  ;;  %451 = vst [vmem:[#allocation2 + $0x28] sm:$0xff] %v1398_v32 }
  0x4c   : > { %452 = vst [vmem:[#allocation2 + $0xa0] sm:$0xff] %v1398_v32  ;;  %453 = vst [vmem:[#allocation2 + $0xf8] sm:$0xff] %v1398_v32 }
  0x4d   : > { %454 = vst [vmem:[#allocation2 + $0x20] sm:$0xff] %v1398_v32  ;;  %455 = vst [vmem:[#allocation2 + $0x98] sm:$0xff] %v1398_v32 }
  0x4e PF: > { %v1318_v33 = vld [vmem:[%s1555_s24 + $0x38] sm:$0xff]   ;;  %v1319_v34 = vld [vmem:[%s1555_s24 + $0x30] sm:$0xff]   ;;  %v1320_v35 = vld [vmem:[%s1555_s24 + $0x28] sm:$0xff]   ;;  %p1168_p13 = scmp.ne.s32.totalorder %s1380_s14, 2 }
  0x4f   : > { %1196 = vmatprep.subr.bf16.mxu0 %v1318_v33  ;;  %1244 = vmatprep.subr.bf16.mxu1 %v1318_v33  ;;  %v1321_v36 = vld [vmem:[%s1555_s24 + $0x20] sm:$0xff]   ;;  %v1322_v39 = vld [vmem:[%s1555_s24 + $0x18] sm:$0xff]   ;;  %v1323_v40 = vld [vmem:[%s1555_s24 + $0x10] sm:$0xff]  }
  0x50   : > { %1197 = vmatpush3.bf16.msra.mxu0 %v1318_v33  ;;  %1252 = vmatpush3.bf16.msra.mxu1 %v1318_v33  ;;  %v1326_v37 = vld [vmem:[%s1562_s12] sm:$0xff]   ;;  %v1324_v41 = vld [vmem:[%s1555_s24 + $0x8] sm:$0xff]   ;;  %v1330_v45 = vld [vmem:[%s1562_s12 + $0x10] sm:$0xff]  }
  0x51   : > { %1198 = vmatprep.subr.bf16.mxu0 %v1319_v34  ;;  %1245 = vmatprep.subr.bf16.mxu1 %v1319_v34  ;;  %v1327_v38 = vld [vmem:[%s1562_s12 + $0x40] sm:$0xff]   ;;  %v1328_v43 = vld [vmem:[%s1562_s12 + $0x8] sm:$0xff]   ;;  %v1331_v46 = vld [vmem:[%s1562_s12 + $0x50] sm:$0xff]  }
  0x52   : > { %1212 = vmatprep.mubr.bf16.mxu0 %v1326_v37  ;;  %1228 = vmatprep.mubr.bf16.mxu1 %v1327_v38  ;;  %v1325_v42 = vld [vmem:[%s1555_s24] sm:$0xff]   ;;  %v1329_v44 = vld [vmem:[%s1562_s12 + $0x48] sm:$0xff]   ;;  %v1332_v47 = vld [vmem:[%s1562_s12 + $0x18] sm:$0xff]  }
  0x53   : > { %v1333_v48 = vld [vmem:[%s1562_s12 + $0x58] sm:$0xff]   ;;  %v1334_v49 = vld [vmem:[%s1562_s12 + $0x20] sm:$0xff]   ;;  %v1336_v51 = vld [vmem:[%s1562_s12 + $0x28] sm:$0xff]  }
  0x54   : > { %1199 = vmatpush3.bf16.msra.mxu0 %v1319_v34  ;;  %1253 = vmatpush3.bf16.msra.mxu1 %v1319_v34  ;;  %v1335_v50 = vld [vmem:[%s1562_s12 + $0x60] sm:$0xff]   ;;  %v1337_v52 = vld [vmem:[%s1562_s12 + $0x68] sm:$0xff]   ;;  %v1338_v53 = vld [vmem:[%s1562_s12 + $0x30] sm:$0xff]  }
  0x55   : > { %1200 = vmatprep.subr.bf16.mxu0 %v1320_v35  ;;  %1246 = vmatprep.subr.bf16.mxu1 %v1320_v35  ;;  %v1339_v54 = vld [vmem:[%s1562_s12 + $0x70] sm:$0xff]   ;;  %v1340_v55 = vld [vmem:[%s1562_s12 + $0x38] sm:$0xff]   ;;  %v474_v58 = vld [vmem:[#allocation2 + $0x40] sm:$0xff] }
  0x56   : > { %v1341_v56 = vld [vmem:[%s1562_s12 + $0x78] sm:$0xff]   ;;  %v456_v61 = vld [vmem:[#allocation2 + $0xb0] sm:$0xff]  ;;  %v475_v4 = vld [vmem:[#allocation2 + $0xc8] sm:$0xff] }
  0x57   : > { %v458_v57 = vld [vmem:[#allocation2 + $0xd8] sm:$0xff]  ;;  %v457_v9 = vld [vmem:[#allocation2] sm:$0xff]  ;;  %v462_v15 = vld [vmem:[#allocation2 + $0x30] sm:$0xff] }
  0x58   : > { %1201 = vmatpush3.bf16.msra.mxu0 %v1320_v35  ;;  %1254 = vmatpush3.bf16.msra.mxu1 %v1320_v35  ;;  %v472_v62 = vld [vmem:[#allocation2 + $0x38] sm:$0xff]  ;;  %v478_v16 = vld [vmem:[#allocation2 + $0x70] sm:$0xff]  ;;  %v476_v22 = vld [vmem:[#allocation2 + $0xe0] sm:$0xff] }
  0x59   : > { %1202 = vmatprep.subr.bf16.mxu0 %v1321_v36  ;;  %1247 = vmatprep.subr.bf16.mxu1 %v1321_v36  ;;  %v459_v3 = vld [vmem:[#allocation2 + $0x18] sm:$0xff]  ;;  %v460_v21 = vld [vmem:[#allocation2 + $0x50] sm:$0xff]  ;;  %v463_v27 = vld [vmem:[#allocation2 + $0x48] sm:$0xff] }
  0x5a   : > { %v473_v10 = vld [vmem:[#allocation2 + $0x58] sm:$0xff]  ;;  %v479_v28 = vld [vmem:[#allocation2 + $0xc0] sm:$0xff]  ;;  %v461_v33 = vld [vmem:[#allocation2 + $0x68] sm:$0xff] }
  0x5b   : > { %v477_v34 = vld [vmem:[#allocation2 + $0x90] sm:$0xff] }
  0x5c   : > { %1203 = vmatpush3.bf16.msra.mxu0 %v1321_v36  ;;  %1255 = vmatpush3.bf16.msra.mxu1 %v1321_v36 }
  0x5d   : > { %1204 = vmatprep.subr.bf16.mxu0 %v1322_v39  ;;  %1248 = vmatprep.subr.bf16.mxu1 %v1322_v39 }
  0x60   : > { %1205 = vmatpush3.bf16.msra.mxu0 %v1322_v39  ;;  %1256 = vmatpush3.bf16.msra.mxu1 %v1322_v39  ;;  %v466_v39 = vld [vmem:[#allocation2 + $0xe8] sm:$0xff] }
  0x61   : > { %1206 = vmatprep.subr.bf16.mxu0 %v1323_v40  ;;  %1249 = vmatprep.subr.bf16.mxu1 %v1323_v40 }
  0x64   : > { %1207 = vmatpush3.bf16.msra.mxu0 %v1323_v40  ;;  %1257 = vmatpush3.bf16.msra.mxu1 %v1323_v40  ;;  %v482_v40 = vld [vmem:[#allocation2 + $0x10] sm:$0xff] }
  0x65   : > { %1208 = vmatprep.subr.bf16.mxu0 %v1324_v41  ;;  %1250 = vmatprep.subr.bf16.mxu1 %v1324_v41 }
  0x68   : > { %1209 = vmatpush3.bf16.msra.mxu0 %v1324_v41  ;;  %1258 = vmatpush3.bf16.msra.mxu1 %v1324_v41 }
  0x69   : > { %1210 = vmatprep.subr.bf16.mxu0 %v1325_v42  ;;  %1251 = vmatprep.subr.bf16.mxu1 %v1325_v42 }
  0x6c   : > { %1211 = vmatpush3.bf16.msra.mxu0 %v1325_v42  ;;  %1259 = vmatpush3.bf16.msra.mxu1 %v1325_v42 }
  0x6f   : > { %1213 = vmatmul.mubr.bf16.vlgmr.msra.gmra.mxu0 %v1328_v43  ;;  %1229 = vmatmul.mubr.bf16.vlgmr.msra.gmra.mxu1 %v1329_v44 }
  0x70   : > { %1216 = vmatprep.mubr.bf16.mxu0 %v1330_v45  ;;  %1232 = vmatprep.mubr.bf16.mxu1 %v1331_v46  ;;  %v464_v45 = vld [vmem:[#allocation2 + $0x80] sm:$0xff]  ;;  %v480_v46 = vld [vmem:[#allocation2 + $0xa8] sm:$0xff] }
  0x77   : > { %1217 = vmatmul.mubr.bf16.gmra.mxu0 %v1332_v47  ;;  %1233 = vmatmul.mubr.bf16.gmra.mxu1 %v1333_v48 }
  0x78   : > { %1220 = vmatprep.mubr.bf16.mxu0 %v1334_v49  ;;  %1236 = vmatprep.mubr.bf16.mxu1 %v1335_v50 }
  0x7f   : > { %1221 = vmatmul.mubr.bf16.gmra.mxu0 %v1336_v51  ;;  %1237 = vmatmul.mubr.bf16.gmra.mxu1 %v1337_v52  ;;  %v467_v51 = vld [vmem:[#allocation2 + $0xb8] sm:$0xff]  ;;  %v483_v52 = vld [vmem:[#allocation2 + $0x28] sm:$0xff] }
  0x80   : > { %1224 = vmatprep.mubr.bf16.mxu0 %v1338_v53  ;;  %1240 = vmatprep.mubr.bf16.mxu1 %v1339_v54 }
  0x87   : > { %1225 = vmatmul.mubr.bf16.gmra.mxu0 %v1340_v55  ;;  %1241 = vmatmul.mubr.bf16.gmra.mxu1 %v1341_v56 }
 0x12f   : > { %v1214_v59 = vpop.f32.mrf.mxu0  ;;  %v1230_v60 = vpop.f32.mrf.mxu1 }
 0x130   : > { %v843_v63 = vadd.f32 %v1214_v59, %v458_v57  ;;  %v859_v0 = vadd.f32 %v1230_v60, %v474_v58  ;;  %v465_v57 = vld [vmem:[#allocation2 + $0x88] sm:$0xff]  ;;  %v481_v58 = vld [vmem:[#allocation2 + $0xd0] sm:$0xff] }
 0x131   : > { %v714_v1 = vpop.f32.mrf.mxu0  ;;  %v778_v2 = vpop.f32.mrf.mxu1 }
 0x132   : > { %875 = vst [vmem:[#allocation2 + $0xd8] sm:$0xff] %v843_v63  ;;  %891 = vst [vmem:[#allocation2 + $0x40] sm:$0xff] %v859_v0  ;;  %v841_v5 = vadd.f32 %v714_v1, %v456_v61  ;;  %v857_v6 = vadd.f32 %v778_v2, %v472_v62  ;;  %v470_v63 = vld [vmem:[#allocation2 + $0x8] sm:$0xff]  ;;  %v486_v0 = vld [vmem:[#allocation2 + $0x20] sm:$0xff] }
 0x133   : > { %v1215_v7 = vpop.f32.mrf.mxu0  ;;  %v1231_v8 = vpop.f32.mrf.mxu1 }
 0x134   : > { %873 = vst [vmem:[#allocation2 + $0xb0] sm:$0xff] %v841_v5  ;;  %889 = vst [vmem:[#allocation2 + $0x38] sm:$0xff] %v857_v6  ;;  %v844_v11 = vadd.f32 %v1215_v7, %v459_v3  ;;  %v860_v12 = vadd.f32 %v1231_v8, %v475_v4  ;;  %v468_v5 = vld [vmem:[#allocation2 + $0x60] sm:$0xff] }
 0x135   : > { %v717_v13 = vpop.f32.mrf.mxu0  ;;  %v781_v14 = vpop.f32.mrf.mxu1  ;;  %v484_v6 = vld [vmem:[#allocation2 + $0xa0] sm:$0xff] }
 0x136   : > { %876 = vst [vmem:[#allocation2 + $0x18] sm:$0xff] %v844_v11  ;;  %892 = vst [vmem:[#allocation2 + $0xc8] sm:$0xff] %v860_v12  ;;  %v842_v17 = vadd.f32 %v717_v13, %v457_v9  ;;  %v858_v18 = vadd.f32 %v781_v14, %v473_v10  ;;  %v471_v11 = vld [vmem:[#allocation2 + $0x78] sm:$0xff] }
 0x137   : > { %v1218_v19 = vpop.f32.mrf.mxu0  ;;  %v1234_v20 = vpop.f32.mrf.mxu1  ;;  %v487_v12 = vld [vmem:[#allocation2 + $0x98] sm:$0xff] }
 0x138   : > { %874 = vst [vmem:[#allocation2] sm:$0xff] %v842_v17  ;;  %890 = vst [vmem:[#allocation2 + $0x58] sm:$0xff] %v858_v18  ;;  %v847_v23 = vadd.f32 %v1218_v19, %v462_v15  ;;  %v863_v24 = vadd.f32 %v1234_v20, %v478_v16  ;;  %v469_v17 = vld [vmem:[#allocation2 + $0xf0] sm:$0xff]  ;;  %v485_v18 = vld [vmem:[#allocation2 + $0xf8] sm:$0xff] }
 0x139   : > { %v730_v25 = vpop.f32.mrf.mxu0  ;;  %v794_v26 = vpop.f32.mrf.mxu1 }
 0x13a   : > { %879 = vst [vmem:[#allocation2 + $0x30] sm:$0xff] %v847_v23  ;;  %895 = vst [vmem:[#allocation2 + $0x70] sm:$0xff] %v863_v24  ;;  %v845_v29 = vadd.f32 %v730_v25, %v460_v21  ;;  %v861_v30 = vadd.f32 %v794_v26, %v476_v22 }
 0x13b   : > { %v1219_v31 = vpop.f32.mrf.mxu0  ;;  %v1235_v32 = vpop.f32.mrf.mxu1 }
 0x13c   : > { %877 = vst [vmem:[#allocation2 + $0x50] sm:$0xff] %v845_v29  ;;  %893 = vst [vmem:[#allocation2 + $0xe0] sm:$0xff] %v861_v30  ;;  %v848_v35 = vadd.f32 %v1219_v31, %v463_v27  ;;  %v864_v36 = vadd.f32 %v1235_v32, %v479_v28 }
 0x13d   : > { %v733_v37 = vpop.f32.mrf.mxu0  ;;  %v797_v38 = vpop.f32.mrf.mxu1 }
 0x13e   : > { %880 = vst [vmem:[#allocation2 + $0x48] sm:$0xff] %v848_v35  ;;  %896 = vst [vmem:[#allocation2 + $0xc0] sm:$0xff] %v864_v36  ;;  %v846_v41 = vadd.f32 %v733_v37, %v461_v33  ;;  %v862_v42 = vadd.f32 %v797_v38, %v477_v34 }
 0x13f   : > { %v1222_v43 = vpop.f32.mrf.mxu0  ;;  %v1238_v44 = vpop.f32.mrf.mxu1 }
 0x140   : > { %878 = vst [vmem:[#allocation2 + $0x68] sm:$0xff] %v846_v41  ;;  %894 = vst [vmem:[#allocation2 + $0x90] sm:$0xff] %v862_v42  ;;  %v851_v47 = vadd.f32 %v1222_v43, %v466_v39  ;;  %v867_v48 = vadd.f32 %v1238_v44, %v482_v40 }
 0x141   : > { %v746_v49 = vpop.f32.mrf.mxu0  ;;  %v810_v50 = vpop.f32.mrf.mxu1 }
 0x142   : > { %883 = vst [vmem:[#allocation2 + $0xe8] sm:$0xff] %v851_v47  ;;  %899 = vst [vmem:[#allocation2 + $0x10] sm:$0xff] %v867_v48  ;;  %v849_v53 = vadd.f32 %v746_v49, %v464_v45  ;;  %v865_v54 = vadd.f32 %v810_v50, %v480_v46 }
 0x143   : > { %v1223_v55 = vpop.f32.mrf.mxu0  ;;  %v1239_v56 = vpop.f32.mrf.mxu1 }
 0x144   : > { %881 = vst [vmem:[#allocation2 + $0x80] sm:$0xff] %v849_v53  ;;  %897 = vst [vmem:[#allocation2 + $0xa8] sm:$0xff] %v865_v54  ;;  %v852_v59 = vadd.f32 %v1223_v55, %v467_v51  ;;  %v868_v60 = vadd.f32 %v1239_v56, %v483_v52 }
 0x145   : > { %v749_v61 = vpop.f32.mrf.mxu0  ;;  %v813_v62 = vpop.f32.mrf.mxu1 }
 0x146   : > { %884 = vst [vmem:[#allocation2 + $0xb8] sm:$0xff] %v852_v59  ;;  %900 = vst [vmem:[#allocation2 + $0x28] sm:$0xff] %v868_v60  ;;  %v850_v1 = vadd.f32 %v749_v61, %v465_v57  ;;  %v866_v2 = vadd.f32 %v813_v62, %v481_v58 }
 0x147   : > { %v1226_v3 = vpop.f32.mrf.mxu0  ;;  %v1242_v4 = vpop.f32.mrf.mxu1 }
 0x148   : > { %882 = vst [vmem:[#allocation2 + $0x88] sm:$0xff] %v850_v1  ;;  %898 = vst [vmem:[#allocation2 + $0xd0] sm:$0xff] %v866_v2  ;;  %v855_v7 = vadd.f32 %v1226_v3, %v470_v63  ;;  %v871_v8 = vadd.f32 %v1242_v4, %v486_v0 }
 0x149   : > { %v762_v9 = vpop.f32.mrf.mxu0  ;;  %v826_v10 = vpop.f32.mrf.mxu1 }
 0x14a   : > { %887 = vst [vmem:[#allocation2 + $0x8] sm:$0xff] %v855_v7  ;;  %903 = vst [vmem:[#allocation2 + $0x20] sm:$0xff] %v871_v8  ;;  %v853_v13 = vadd.f32 %v762_v9, %v468_v5  ;;  %v869_v14 = vadd.f32 %v826_v10, %v484_v6 }
 0x14b   : > { %v1227_v15 = vpop.f32.mrf.mxu0  ;;  %v1243_v16 = vpop.f32.mrf.mxu1 }
 0x14c   : > { %885 = vst [vmem:[#allocation2 + $0x60] sm:$0xff] %v853_v13  ;;  %901 = vst [vmem:[#allocation2 + $0xa0] sm:$0xff] %v869_v14  ;;  %v856_v19 = vadd.f32 %v1227_v15, %v471_v11  ;;  %v872_v20 = vadd.f32 %v1243_v16, %v487_v12  ;;  %908 = sbr.rel (%p1168_p13) target bundleno = 356 (0x164), region = 81 }
 0x14d   : > { %v765_v21 = vpop.f32.mrf.mxu0  ;;  %v829_v22 = vpop.f32.mrf.mxu1 }
 0x14e   : > { %888 = vst [vmem:[#allocation2 + $0x78] sm:$0xff] %v856_v19  ;;  %904 = vst [vmem:[#allocation2 + $0x98] sm:$0xff] %v872_v20  ;;  %v854_v23 = vadd.f32 %v765_v21, %v469_v17  ;;  %v870_v24 = vadd.f32 %v829_v22, %v485_v18 }
 0x150   : > { %886 = vst [vmem:[#allocation2 + $0xf0] sm:$0xff] %v854_v23  ;;  %902 = vst [vmem:[#allocation2 + $0xf8] sm:$0xff] %v870_v24 }
 0x151   : > { %v909_v25 = vld [vmem:[#allocation2 + $0xb0] sm:$0xff]  ;;  %v1593_v26 = vld [vmem:[%s1682_s2] ss:$0 sm:$0xff]  ;;  %v911_v30 = vld [vmem:[#allocation2 + $0xd8] sm:$0xff] }
 0x152   : > { %v910_v27 = vld [vmem:[#allocation2] sm:$0xff]  ;;  %v948_v28 = vadd.f32 %v1593_v26, %v909_v25  ;;  %v912_v31 = vld [vmem:[#allocation2 + $0x18] sm:$0xff]  ;;  %v913_v32 = vld [vmem:[#allocation2 + $0x50] sm:$0xff]  ;;  %v950_v33 = vadd.f32 %v1593_v26, %v911_v30 }
 0x153   : > { %v949_v29 = vadd.f32 %v1593_v26, %v910_v27  ;;  %v951_v34 = vadd.f32 %v1593_v26, %v912_v31  ;;  %v952_v35 = vadd.f32 %v1593_v26, %v913_v32  ;;  %v914_v36 = vld [vmem:[#allocation2 + $0x68] sm:$0xff]  ;;  %v915_v37 = vld [vmem:[#allocation2 + $0x30] sm:$0xff]  ;;  %v917_v42 = vld [vmem:[#allocation2 + $0x80] sm:$0xff] }
 0x154   : > { %v916_v38 = vld [vmem:[#allocation2 + $0x48] sm:$0xff]  ;;  %980 = vst [vmem:[%s1560_s29] sm:$0xff] %v948_v28  ;;  %v953_v39 = vadd.f32 %v1593_v26, %v914_v36  ;;  %v954_v40 = vadd.f32 %v1593_v26, %v915_v37  ;;  %982 = vst [vmem:[%s1560_s29 + $0x10] sm:$0xff] %v950_v33  ;;  %v956_v45 = vadd.f32 %v1593_v26, %v917_v42  ;;  %v920_v48 = vld [vmem:[#allocation2 + $0xb8] sm:$0xff] }
 0x155   : > { %981 = vst [vmem:[%s1560_s29 + $0x8] sm:$0xff] %v949_v29  ;;  %v955_v41 = vadd.f32 %v1593_v26, %v916_v38  ;;  %v918_v43 = vld [vmem:[#allocation2 + $0x88] sm:$0xff]  ;;  %983 = vst [vmem:[%s1560_s29 + $0x18] sm:$0xff] %v951_v34  ;;  %v921_v49 = vld [vmem:[#allocation2 + $0x60] sm:$0xff]  ;;  %v959_v51 = vadd.f32 %v1593_v26, %v920_v48 }
 0x156   : > { %v919_v44 = vld [vmem:[#allocation2 + $0xe8] sm:$0xff]  ;;  %984 = vst [vmem:[%s1560_s29 + $0x20] sm:$0xff] %v952_v35  ;;  %v957_v46 = vadd.f32 %v1593_v26, %v918_v43  ;;  %985 = vst [vmem:[%s1560_s29 + $0x28] sm:$0xff] %v953_v39  ;;  %v960_v52 = vadd.f32 %v1593_v26, %v921_v49  ;;  %v924_v55 = vld [vmem:[#allocation2 + $0x78] sm:$0xff] }
 0x157   : > { %v958_v47 = vadd.f32 %v1593_v26, %v919_v44  ;;  %v922_v50 = vld [vmem:[#allocation2 + $0xf0] sm:$0xff]  ;;  %986 = vst [vmem:[%s1560_s29 + $0x30] sm:$0xff] %v954_v40  ;;  %987 = vst [vmem:[%s1560_s29 + $0x38] sm:$0xff] %v955_v41  ;;  %v923_v54 = vld [vmem:[#allocation2 + $0x8] sm:$0xff]  ;;  %v963_v58 = vadd.f32 %v1593_v26, %v924_v55 }
 0x158   : > { %v961_v53 = vadd.f32 %v1593_v26, %v922_v50  ;;  %v925_v56 = vld [vmem:[#allocation2 + $0x38] sm:$0xff]  ;;  %988 = vst [vmem:[%s1560_s29 + $0x40] sm:$0xff] %v956_v45  ;;  %989 = vst [vmem:[%s1560_s29 + $0x48] sm:$0xff] %v957_v46  ;;  %v962_v57 = vadd.f32 %v1593_v26, %v923_v54  ;;  %v927_v61 = vld [vmem:[#allocation2 + $0x40] sm:$0xff] }
 0x159   : > { %990 = vst [vmem:[%s1560_s29 + $0x50] sm:$0xff] %v958_v47  ;;  %v964_v59 = vadd.f32 %v1593_v26, %v925_v56  ;;  %v926_v60 = vld [vmem:[#allocation2 + $0x58] sm:$0xff]  ;;  %v928_v62 = vld [vmem:[#allocation2 + $0xc8] sm:$0xff]  ;;  %991 = vst [vmem:[%s1560_s29 + $0x58] sm:$0xff] %v959_v51  ;;  %v966_v0 = vadd.f32 %v1593_v26, %v927_v61 }
 0x15a   : > { %992 = vst [vmem:[%s1560_s29 + $0x60] sm:$0xff] %v960_v52  ;;  %993 = vst [vmem:[%s1560_s29 + $0x68] sm:$0xff] %v961_v53  ;;  %v965_v63 = vadd.f32 %v1593_v26, %v926_v60  ;;  %v967_v1 = vadd.f32 %v1593_v26, %v928_v62  ;;  %v929_v2 = vld [vmem:[#allocation2 + $0xe0] sm:$0xff]  ;;  %v930_v3 = vld [vmem:[#allocation2 + $0x90] sm:$0xff] }
 0x15b   : > { %v931_v4 = vld [vmem:[#allocation2 + $0x70] sm:$0xff]  ;;  %994 = vst [vmem:[%s1560_s29 + $0x70] sm:$0xff] %v962_v57  ;;  %995 = vst [vmem:[%s1560_s29 + $0x78] sm:$0xff] %v963_v58  ;;  %v968_v5 = vadd.f32 %v1593_v26, %v929_v2  ;;  %v969_v6 = vadd.f32 %v1593_v26, %v930_v3  ;;  %v932_v8 = vld [vmem:[#allocation2 + $0xc0] sm:$0xff] }
 0x15c   : > { %996 = vst [vmem:[%s1560_s29 + $0x80] sm:$0xff] %v964_v59  ;;  %v970_v7 = vadd.f32 %v1593_v26, %v931_v4  ;;  %v933_v9 = vld [vmem:[#allocation2 + $0xa8] sm:$0xff]  ;;  %v934_v10 = vld [vmem:[#allocation2 + $0xd0] sm:$0xff]  ;;  %997 = vst [vmem:[%s1560_s29 + $0x88] sm:$0xff] %v965_v63  ;;  %v971_v11 = vadd.f32 %v1593_v26, %v932_v8 }
 0x15d   : > { %998 = vst [vmem:[%s1560_s29 + $0x90] sm:$0xff] %v966_v0  ;;  %999 = vst [vmem:[%s1560_s29 + $0x98] sm:$0xff] %v967_v1  ;;  %v972_v12 = vadd.f32 %v1593_v26, %v933_v9  ;;  %v973_v13 = vadd.f32 %v1593_v26, %v934_v10  ;;  %v935_v14 = vld [vmem:[#allocation2 + $0x10] sm:$0xff]  ;;  %v936_v15 = vld [vmem:[#allocation2 + $0x28] sm:$0xff] }
 0x15e   : > { %v937_v16 = vld [vmem:[#allocation2 + $0xa0] sm:$0xff]  ;;  %1000 = vst [vmem:[%s1560_s29 + $0xa0] sm:$0xff] %v968_v5  ;;  %1001 = vst [vmem:[%s1560_s29 + $0xa8] sm:$0xff] %v969_v6  ;;  %v974_v17 = vadd.f32 %v1593_v26, %v935_v14  ;;  %v975_v18 = vadd.f32 %v1593_v26, %v936_v15  ;;  %v938_v20 = vld [vmem:[#allocation2 + $0xf8] sm:$0xff] }
 0x15f   : > { %1002 = vst [vmem:[%s1560_s29 + $0xb0] sm:$0xff] %v970_v7  ;;  %v976_v19 = vadd.f32 %v1593_v26, %v937_v16  ;;  %v939_v21 = vld [vmem:[#allocation2 + $0x20] sm:$0xff]  ;;  %v940_v22 = vld [vmem:[#allocation2 + $0x98] sm:$0xff]  ;;  %1003 = vst [vmem:[%s1560_s29 + $0xb8] sm:$0xff] %v971_v11  ;;  %v977_v23 = vadd.f32 %v1593_v26, %v938_v20 }
 0x160   : > { %1004 = vst [vmem:[%s1560_s29 + $0xc0] sm:$0xff] %v972_v12  ;;  %1005 = vst [vmem:[%s1560_s29 + $0xc8] sm:$0xff] %v973_v13  ;;  %v978_v24 = vadd.f32 %v1593_v26, %v939_v21  ;;  %v979_v25 = vadd.f32 %v1593_v26, %v940_v22 }
 0x161   : > { %1006 = vst [vmem:[%s1560_s29 + $0xd0] sm:$0xff] %v974_v17  ;;  %1007 = vst [vmem:[%s1560_s29 + $0xd8] sm:$0xff] %v975_v18 }
 0x162   : > { %1008 = vst [vmem:[%s1560_s29 + $0xe0] sm:$0xff] %v976_v19  ;;  %1009 = vst [vmem:[%s1560_s29 + $0xe8] sm:$0xff] %v977_v23 }
 0x163   : > { %1010 = vst [vmem:[%s1560_s29 + $0xf0] sm:$0xff] %v978_v24  ;;  %1011 = vst [vmem:[%s1560_s29 + $0xf8] sm:$0xff] %v979_v25 }
 0x164 PF: > { %s13_s18 = sadd.s32 1, %s1396_s18   ;;  %s1684_s12 = smov %s1376_s13 }
 0x165   : > { %p10_p0 = scmp.ge.s32.totalorder %s13_s18, 8   ;;  %s1685_s13 = smov %s1470_s25 }
 0x166   : > { %s1686_s14 = smov %s1388_s16  ;;  %s1687_s15 = smov %s1392_s17 }
 0x167   : > { %s1688_s16 = smov %s1691_s19  ;;  %s1689_s17 = smov %s1695_s20 }
 0x168   :  { %12 = sbr.rel (!%p10_p0) target bundleno = 4 (0x4), region = 122 }

// kernel: _lambda_.7
= control target key start
LH: loop header
LB: loop body
LE: loop exit
PB: predicated region body
PF: predicated region fallthrough
CT: control target
= control target key end

     0   :  { %s1428_s21 = smov 0   ;;  %s1430_s22 = smov 0   ;;  %s1703_s0 = inlined_call_operand.vmem [shape: f32[24,512], index: 0, kind: input, shape index: {}]   ;;  %s1704_s1 = inlined_call_operand.vmem [shape: bf16[8,512], index: 1, kind: input, shape index: {}]   ;;  %s1705_s2 = inlined_call_operand.vmem [shape: f32[8,512], index: 2, kind: input, shape index: {}]   ;;  %s1706_s3 = inlined_call_operand.vmem [shape: bf16[1,512,512], index: 3, kind: input, shape index: {}]   ;;  %s1707_s4 = inlined_call_operand.vmem [shape: bf16[24,8], index: 4, kind: input, shape index: {}]   ;;  %s1708_s5 = inlined_call_operand.vmem [shape: f32[24,1], index: 5, kind: input, shape index: {}]   ;;  %s1709_s6 = inlined_call_operand.vmem [shape: f32[8,512], index: 6, kind: output, shape index: {}]  }
   0x1   :  { %s1432_s23 = smov 0  }
   0x2 LB: > { %s1184_s24 = sadd.s32 4294967295, %s1390_s23   ;;  %s1445_s25 = sadd.s32 1, %s1390_s23   ;;  %s1390_s23 = sphi %s1432_s23, %s1713_s23   ;;  %s1386_s22 = sphi %s1430_s22, %s1712_s22   ;;  %s1382_s21 = sphi %s1428_s21, %s1711_s21  }
   0x3   : > { %s20_s26 = ssub.s32 %s1390_s23, %s1445_s25  ;;  %s23_s27 = sadd.s32 1, %s1386_s22 }
   0x4   : > { %p21_p0 = scmp.eq.s32.totalorder %s20_s26, 0  ;;  %p30_p1 = scmp.ne.s32.totalorder %s1386_s22, %s1382_s21 }
   0x5   : > { %p31_p2 = scmp.eq.s32.totalorder %s1390_s23, 0  ;;  %p1187_p4 = scmp.ge.s32.totalorder %s1390_s23, 4 }
   0x6   : > { %s1454_s28 = scalar_select %p21_p0, %s1386_s22, %s23_s27  }
   0x7   : > { %p1456_p3 = por %p31_p2, %p30_p1  ;;  %206 = sbr.rel (%p1187_p4) target bundleno = 66 (0x42), region = 28 }
   0xc   : > { %209 = sbr.rel (!%p1456_p3) target bundleno = 19 (0x13), region = 32  ;;  %s211_s30 = sand.u32 (%p1456_p3), 1, %s1386_s22  }
   0xd   : > { %s1188_s7 = sshll.u32 (%p1456_p3), %s1390_s23, 3  ;;  %s1293_s8 = smul.u32 (%p1456_p3), 24, %s211_s30 }
   0xe   : > { %s215_s11 = scalar_lea.vmem (%p1456_p3), %s1703_s0, %s1188_s7 }
   0xf   : > { %v248_v0 = vld [vmem:[%s215_s11] sm:$0xff] (%p1456_p3)  ;;  %s213_s12 = scalar_lea.vmem (%p1456_p3), [#allocation2], %s1293_s8 }
  0x10   : > { %v250_v1 = vld [vmem:[%s215_s11 + $0x20] sm:$0xff] (%p1456_p3)  ;;  %249 = vst [vmem:[%s213_s12] sm:$0xff] (%p1456_p3), %v248_v0 }
  0x11   : > { %v252_v2 = vld [vmem:[%s215_s11 + $0x40] sm:$0xff]  ;;  %251 = vst [vmem:[%s213_s12 + $0x8] sm:$0xff] %v250_v1 }
  0x12   : > { %253 = vst [vmem:[%s213_s12 + $0x10] sm:$0xff] %v252_v2 }
  0x13 PF: > { %266 = sbr.rel (!%p1456_p3) target bundleno = 66 (0x42), region = 74  ;;  %s268_s13 = sand.u32 (%p1456_p3), 1, %s1386_s22  }
  0x14   : > { %s1190_s14 = sshll.u32 (%p1456_p3), %s1390_s23, 2  ;;  %s1189_s15 = sshll.u32 (%p1456_p3), %s268_s13, 8 }
  0x15   : > { %s1475_s18 = scalar_lea.vmem (%p1456_p3), %s1706_s3, %s1190_s14  ;;  %s1479_s19 = scalar_lea.vmem (%p1456_p3), [#allocation3], %s1189_s15 }
  0x16   : > { %v289_v3 = vld [vmem:[%s1475_s18] sm:$0xf] (%p1456_p3)  ;;  %v291_v4 = vld [vmem:[%s1475_s18 + $0x10] sm:$0xf] (%p1456_p3) }
  0x17   : > { %290 = vst [vmem:[%s1479_s19] sm:$0xf] (%p1456_p3), %v289_v3  ;;  %292 = vst [vmem:[%s1479_s19 + $0x4] sm:$0xf] (%p1456_p3), %v291_v4  ;;  %v293_v5 = vld [vmem:[%s1475_s18 + $0x20] sm:$0xf] (%p1456_p3) }
  0x18   : > { %v295_v6 = vld [vmem:[%s1475_s18 + $0x30] sm:$0xf]  ;;  %v297_v7 = vld [vmem:[%s1475_s18 + $0x40] sm:$0xf]  ;;  %294 = vst [vmem:[%s1479_s19 + $0x8] sm:$0xf] %v293_v5 }
  0x19   : > { %296 = vst [vmem:[%s1479_s19 + $0xc] sm:$0xf] %v295_v6  ;;  %298 = vst [vmem:[%s1479_s19 + $0x10] sm:$0xf] %v297_v7  ;;  %v299_v8 = vld [vmem:[%s1475_s18 + $0x50] sm:$0xf] }
  0x1a   : > { %v301_v9 = vld [vmem:[%s1475_s18 + $0x60] sm:$0xf]  ;;  %v303_v10 = vld [vmem:[%s1475_s18 + $0x70] sm:$0xf]  ;;  %300 = vst [vmem:[%s1479_s19 + $0x14] sm:$0xf] %v299_v8 }
  0x1b   : > { %302 = vst [vmem:[%s1479_s19 + $0x18] sm:$0xf] %v301_v9  ;;  %304 = vst [vmem:[%s1479_s19 + $0x1c] sm:$0xf] %v303_v10  ;;  %v305_v11 = vld [vmem:[%s1475_s18 + $0x80] sm:$0xf] }
  0x1c   : > { %v307_v12 = vld [vmem:[%s1475_s18 + $0x90] sm:$0xf]  ;;  %v309_v13 = vld [vmem:[%s1475_s18 + $0xa0] sm:$0xf]  ;;  %306 = vst [vmem:[%s1479_s19 + $0x20] sm:$0xf] %v305_v11 }
  0x1d   : > { %308 = vst [vmem:[%s1479_s19 + $0x24] sm:$0xf] %v307_v12  ;;  %310 = vst [vmem:[%s1479_s19 + $0x28] sm:$0xf] %v309_v13  ;;  %v311_v14 = vld [vmem:[%s1475_s18 + $0xb0] sm:$0xf] }
  0x1e   : > { %v313_v15 = vld [vmem:[%s1475_s18 + $0xc0] sm:$0xf]  ;;  %v315_v16 = vld [vmem:[%s1475_s18 + $0xd0] sm:$0xf]  ;;  %312 = vst [vmem:[%s1479_s19 + $0x2c] sm:$0xf] %v311_v14 }
  0x1f   : > { %314 = vst [vmem:[%s1479_s19 + $0x30] sm:$0xf] %v313_v15  ;;  %316 = vst [vmem:[%s1479_s19 + $0x34] sm:$0xf] %v315_v16  ;;  %v317_v17 = vld [vmem:[%s1475_s18 + $0xe0] sm:$0xf] }
  0x20   : > { %v319_v18 = vld [vmem:[%s1475_s18 + $0xf0] sm:$0xf]  ;;  %v321_v19 = vld [vmem:[%s1475_s18 + $0x100] sm:$0xf]  ;;  %318 = vst [vmem:[%s1479_s19 + $0x38] sm:$0xf] %v317_v17 }
  0x21   : > { %320 = vst [vmem:[%s1479_s19 + $0x3c] sm:$0xf] %v319_v18  ;;  %322 = vst [vmem:[%s1479_s19 + $0x40] sm:$0xf] %v321_v19  ;;  %v323_v20 = vld [vmem:[%s1475_s18 + $0x110] sm:$0xf] }
  0x22   : > { %v325_v21 = vld [vmem:[%s1475_s18 + $0x120] sm:$0xf]  ;;  %v327_v22 = vld [vmem:[%s1475_s18 + $0x130] sm:$0xf]  ;;  %324 = vst [vmem:[%s1479_s19 + $0x44] sm:$0xf] %v323_v20 }
  0x23   : > { %326 = vst [vmem:[%s1479_s19 + $0x48] sm:$0xf] %v325_v21  ;;  %328 = vst [vmem:[%s1479_s19 + $0x4c] sm:$0xf] %v327_v22  ;;  %v329_v23 = vld [vmem:[%s1475_s18 + $0x140] sm:$0xf] }
  0x24   : > { %v331_v24 = vld [vmem:[%s1475_s18 + $0x150] sm:$0xf]  ;;  %v333_v25 = vld [vmem:[%s1475_s18 + $0x160] sm:$0xf]  ;;  %330 = vst [vmem:[%s1479_s19 + $0x50] sm:$0xf] %v329_v23 }
  0x25   : > { %332 = vst [vmem:[%s1479_s19 + $0x54] sm:$0xf] %v331_v24  ;;  %334 = vst [vmem:[%s1479_s19 + $0x58] sm:$0xf] %v333_v25  ;;  %v335_v26 = vld [vmem:[%s1475_s18 + $0x170] sm:$0xf] }
  0x26   : > { %v337_v27 = vld [vmem:[%s1475_s18 + $0x180] sm:$0xf]  ;;  %v339_v28 = vld [vmem:[%s1475_s18 + $0x190] sm:$0xf]  ;;  %336 = vst [vmem:[%s1479_s19 + $0x5c] sm:$0xf] %v335_v26 }
  0x27   : > { %338 = vst [vmem:[%s1479_s19 + $0x60] sm:$0xf] %v337_v27  ;;  %340 = vst [vmem:[%s1479_s19 + $0x64] sm:$0xf] %v339_v28  ;;  %v341_v29 = vld [vmem:[%s1475_s18 + $0x1a0] sm:$0xf] }
  0x28   : > { %v343_v30 = vld [vmem:[%s1475_s18 + $0x1b0] sm:$0xf]  ;;  %v345_v31 = vld [vmem:[%s1475_s18 + $0x1c0] sm:$0xf]  ;;  %342 = vst [vmem:[%s1479_s19 + $0x68] sm:$0xf] %v341_v29 }
  0x29   : > { %344 = vst [vmem:[%s1479_s19 + $0x6c] sm:$0xf] %v343_v30  ;;  %346 = vst [vmem:[%s1479_s19 + $0x70] sm:$0xf] %v345_v31  ;;  %v347_v32 = vld [vmem:[%s1475_s18 + $0x1d0] sm:$0xf] }
  0x2a   : > { %v349_v33 = vld [vmem:[%s1475_s18 + $0x1e0] sm:$0xf]  ;;  %v351_v34 = vld [vmem:[%s1475_s18 + $0x1f0] sm:$0xf]  ;;  %348 = vst [vmem:[%s1479_s19 + $0x74] sm:$0xf] %v347_v32 }
  0x2b   : > { %350 = vst [vmem:[%s1479_s19 + $0x78] sm:$0xf] %v349_v33  ;;  %352 = vst [vmem:[%s1479_s19 + $0x7c] sm:$0xf] %v351_v34  ;;  %v353_v35 = vld [vmem:[%s1475_s18 + $0x200] sm:$0xf] }
  0x2c   : > { %v355_v36 = vld [vmem:[%s1475_s18 + $0x210] sm:$0xf]  ;;  %v357_v37 = vld [vmem:[%s1475_s18 + $0x220] sm:$0xf]  ;;  %354 = vst [vmem:[%s1479_s19 + $0x80] sm:$0xf] %v353_v35 }
  0x2d   : > { %356 = vst [vmem:[%s1479_s19 + $0x84] sm:$0xf] %v355_v36  ;;  %358 = vst [vmem:[%s1479_s19 + $0x88] sm:$0xf] %v357_v37  ;;  %v359_v38 = vld [vmem:[%s1475_s18 + $0x230] sm:$0xf] }
  0x2e   : > { %v361_v39 = vld [vmem:[%s1475_s18 + $0x240] sm:$0xf]  ;;  %v363_v40 = vld [vmem:[%s1475_s18 + $0x250] sm:$0xf]  ;;  %360 = vst [vmem:[%s1479_s19 + $0x8c] sm:$0xf] %v359_v38 }
  0x2f   : > { %362 = vst [vmem:[%s1479_s19 + $0x90] sm:$0xf] %v361_v39  ;;  %364 = vst [vmem:[%s1479_s19 + $0x94] sm:$0xf] %v363_v40  ;;  %v365_v41 = vld [vmem:[%s1475_s18 + $0x260] sm:$0xf] }
  0x30   : > { %v367_v42 = vld [vmem:[%s1475_s18 + $0x270] sm:$0xf]  ;;  %v369_v43 = vld [vmem:[%s1475_s18 + $0x280] sm:$0xf]  ;;  %366 = vst [vmem:[%s1479_s19 + $0x98] sm:$0xf] %v365_v41 }
  0x31   : > { %368 = vst [vmem:[%s1479_s19 + $0x9c] sm:$0xf] %v367_v42  ;;  %370 = vst [vmem:[%s1479_s19 + $0xa0] sm:$0xf] %v369_v43  ;;  %v371_v44 = vld [vmem:[%s1475_s18 + $0x290] sm:$0xf] }
  0x32   : > { %v373_v45 = vld [vmem:[%s1475_s18 + $0x2a0] sm:$0xf]  ;;  %v375_v46 = vld [vmem:[%s1475_s18 + $0x2b0] sm:$0xf]  ;;  %372 = vst [vmem:[%s1479_s19 + $0xa4] sm:$0xf] %v371_v44 }
  0x33   : > { %374 = vst [vmem:[%s1479_s19 + $0xa8] sm:$0xf] %v373_v45  ;;  %376 = vst [vmem:[%s1479_s19 + $0xac] sm:$0xf] %v375_v46  ;;  %v377_v47 = vld [vmem:[%s1475_s18 + $0x2c0] sm:$0xf] }
  0x34   : > { %v379_v48 = vld [vmem:[%s1475_s18 + $0x2d0] sm:$0xf]  ;;  %v381_v49 = vld [vmem:[%s1475_s18 + $0x2e0] sm:$0xf]  ;;  %378 = vst [vmem:[%s1479_s19 + $0xb0] sm:$0xf] %v377_v47 }
  0x35   : > { %380 = vst [vmem:[%s1479_s19 + $0xb4] sm:$0xf] %v379_v48  ;;  %382 = vst [vmem:[%s1479_s19 + $0xb8] sm:$0xf] %v381_v49  ;;  %v383_v50 = vld [vmem:[%s1475_s18 + $0x2f0] sm:$0xf] }
  0x36   : > { %v385_v51 = vld [vmem:[%s1475_s18 + $0x300] sm:$0xf]  ;;  %v387_v52 = vld [vmem:[%s1475_s18 + $0x310] sm:$0xf]  ;;  %384 = vst [vmem:[%s1479_s19 + $0xbc] sm:$0xf] %v383_v50 }
  0x37   : > { %386 = vst [vmem:[%s1479_s19 + $0xc0] sm:$0xf] %v385_v51  ;;  %388 = vst [vmem:[%s1479_s19 + $0xc4] sm:$0xf] %v387_v52  ;;  %v389_v53 = vld [vmem:[%s1475_s18 + $0x320] sm:$0xf] }
  0x38   : > { %v391_v54 = vld [vmem:[%s1475_s18 + $0x330] sm:$0xf]  ;;  %v393_v55 = vld [vmem:[%s1475_s18 + $0x340] sm:$0xf]  ;;  %390 = vst [vmem:[%s1479_s19 + $0xc8] sm:$0xf] %v389_v53 }
  0x39   : > { %392 = vst [vmem:[%s1479_s19 + $0xcc] sm:$0xf] %v391_v54  ;;  %394 = vst [vmem:[%s1479_s19 + $0xd0] sm:$0xf] %v393_v55  ;;  %v395_v56 = vld [vmem:[%s1475_s18 + $0x350] sm:$0xf] }
  0x3a   : > { %v397_v57 = vld [vmem:[%s1475_s18 + $0x360] sm:$0xf]  ;;  %v399_v58 = vld [vmem:[%s1475_s18 + $0x370] sm:$0xf]  ;;  %396 = vst [vmem:[%s1479_s19 + $0xd4] sm:$0xf] %v395_v56 }
  0x3b   : > { %398 = vst [vmem:[%s1479_s19 + $0xd8] sm:$0xf] %v397_v57  ;;  %400 = vst [vmem:[%s1479_s19 + $0xdc] sm:$0xf] %v399_v58  ;;  %v401_v59 = vld [vmem:[%s1475_s18 + $0x380] sm:$0xf] }
  0x3c   : > { %v403_v60 = vld [vmem:[%s1475_s18 + $0x390] sm:$0xf]  ;;  %v405_v61 = vld [vmem:[%s1475_s18 + $0x3a0] sm:$0xf]  ;;  %402 = vst [vmem:[%s1479_s19 + $0xe0] sm:$0xf] %v401_v59 }
  0x3d   : > { %404 = vst [vmem:[%s1479_s19 + $0xe4] sm:$0xf] %v403_v60  ;;  %406 = vst [vmem:[%s1479_s19 + $0xe8] sm:$0xf] %v405_v61  ;;  %v407_v62 = vld [vmem:[%s1475_s18 + $0x3b0] sm:$0xf] }
  0x3e   : > { %v409_v63 = vld [vmem:[%s1475_s18 + $0x3c0] sm:$0xf]  ;;  %v411_v0 = vld [vmem:[%s1475_s18 + $0x3d0] sm:$0xf]  ;;  %408 = vst [vmem:[%s1479_s19 + $0xec] sm:$0xf] %v407_v62 }
  0x3f   : > { %410 = vst [vmem:[%s1479_s19 + $0xf0] sm:$0xf] %v409_v63  ;;  %412 = vst [vmem:[%s1479_s19 + $0xf4] sm:$0xf] %v411_v0  ;;  %v413_v1 = vld [vmem:[%s1475_s18 + $0x3e0] sm:$0xf] }
  0x40   : > { %v415_v2 = vld [vmem:[%s1475_s18 + $0x3f0] sm:$0xf]  ;;  %414 = vst [vmem:[%s1479_s19 + $0xf8] sm:$0xf] %v413_v1 }
  0x41   : > { %416 = vst [vmem:[%s1479_s19 + $0xfc] sm:$0xf] %v415_v2 }
  0x42 PF: > { %p1191_p5 = scmp.ge.s32.totalorder %s1390_s23, 1  ;;  %p567_p6 = scmp.lt.s32.totalorder %s1390_s23, 5 }
  0x44   : > { %p568_p7 = pnand %p1191_p5, %p567_p6 }
  0x45   : > { %s574_s20 = sand.u32 (!%p568_p7), 1, %s1382_s21   ;;  %p617_p8 = scmp.lt.s32.totalorder (!%p568_p7), %s1184_s24, 3 }
  0x46   : > { %571 = sbr.rel (%p568_p7) target bundleno = 563 (0x233), region = 115  ;;  %s1192_s7 = sshll.u32 (!%p568_p7), %s574_s20, 8 }
  0x47   : > { %s1626_s8 = scalar_lea.vmem (!%p568_p7), [#allocation3], %s1192_s7  ;;  %s1294_s19 = smul.u32 (!%p568_p7), 24, %s574_s20 }
  0x49   : > { %s576_s26 = scalar_lea.vmem (!%p568_p7), [#allocation2], %s1294_s19 }
  0x4b   : > { %v1613_v3 = vld [vmem:[%s1704_s1] sm:$0xff]  ;;  %v1618_v4 = vld [vmem:[%s1704_s1 + $0x8] sm:$0xff]  ;;  %v1330_v15 = vld [vmem:[%s1626_s8 + $0x68] sm:$0xff]   ;;  %vm1008_vm0 = vcmask 64512   ;;  %v1392_v44 = vmov 0   ;;  %vm1015_vm1 = vcmask 1043456  }
  0x4c   : > { %v1196_v5 = vcombine.high %v1613_v3, %v1613_v3  ;;  %v1198_v6 = vcombine.high %v1618_v4, %v1618_v4  ;;  %v1322_v7 = vld [vmem:[%s1626_s8 + $0x78] sm:$0xff]   ;;  %v1326_v11 = vld [vmem:[%s1626_s8 + $0x70] sm:$0xff]   ;;  %v1331_v16 = vld [vmem:[%s1626_s8 + $0xe8] sm:$0xff]   ;;  %v1195_v39 = vcombine.low %v1613_v3, %v1613_v3  ;;  %v1197_v40 = vcombine.low %v1618_v4, %v1618_v4  ;;  %1320 = vset.pattern.permute.xlu0 %v1392_v44  ;;  %s1715_s24 = smov (!%p617_p8, %s1184_s24), 3 }
  0x4d   : > { %v1323_v8 = vld [vmem:[%s1626_s8 + $0xf8] sm:$0xff]   ;;  %1239 = vmatprep.subr.bf16.mxu0 %v1322_v7  ;;  %v1327_v12 = vld [vmem:[%s1626_s8 + $0xf0] sm:$0xff]   ;;  %v1332_v17 = vld [vmem:[%s1626_s8 + $0x28] sm:$0xff]   ;;  %1321 = vset.pattern.permute.xlu1 %v1392_v44  ;;  %s1193_s21 = sshll.u32 %s1715_s24, 3 }
  0x4e   : > { %930 = vmatprep.mubr.bf16.mxu0 %v1196_v5  ;;  %970 = vmatprep.mubr.bf16.mxu1 %v1198_v6  ;;  %v1324_v9 = vld [vmem:[%s1626_s8 + $0x38] sm:$0xff]   ;;  %v1328_v13 = vld [vmem:[%s1626_s8 + $0x30] sm:$0xff]   ;;  %v1333_v18 = vld [vmem:[%s1626_s8 + $0xa8] sm:$0xff]   ;;  %s620_s29 = scalar_lea.vmem %s1705_s2, %s1193_s21  ;;  %s624_s24 = scalar_lea.vmem %s1709_s6, %s1193_s21 }
  0x4f   : > { %1261 = vmatprep.subr.bf16.mxu1 %v1323_v8  ;;  %v1325_v10 = vld [vmem:[%s1626_s8 + $0xb8] sm:$0xff]   ;;  %1240 = vmatpush3.bf16.msra.mxu0 %v1324_v9  ;;  %v1329_v14 = vld [vmem:[%s1626_s8 + $0xb0] sm:$0xff]   ;;  %v1334_v19 = vld [vmem:[%s1626_s8 + $0x60] sm:$0xff]  }
  0x50   : > { %1262 = vmatpush3.bf16.msra.mxu1 %v1325_v10  ;;  %1241 = vmatprep.subr.bf16.mxu0 %v1326_v11  ;;  %v1335_v20 = vld [vmem:[%s1626_s8 + $0xe0] sm:$0xff]   ;;  %v1338_v23 = vld [vmem:[%s1626_s8 + $0x58] sm:$0xff]   ;;  %v1342_v27 = vld [vmem:[%s1626_s8 + $0x50] sm:$0xff]  }
  0x51   : > { %1263 = vmatprep.subr.bf16.mxu1 %v1327_v12  ;;  %v1336_v21 = vld [vmem:[%s1626_s8 + $0x20] sm:$0xff]   ;;  %v1339_v24 = vld [vmem:[%s1626_s8 + $0xd8] sm:$0xff]   ;;  %v1343_v28 = vld [vmem:[%s1626_s8 + $0xd0] sm:$0xff]  }
  0x52   : > { %v1337_v22 = vld [vmem:[%s1626_s8 + $0xa0] sm:$0xff]   ;;  %v1340_v25 = vld [vmem:[%s1626_s8 + $0x18] sm:$0xff]   ;;  %v1344_v29 = vld [vmem:[%s1626_s8 + $0x10] sm:$0xff]  }
  0x53   : > { %1242 = vmatpush3.bf16.msra.mxu0 %v1328_v13  ;;  %v1341_v26 = vld [vmem:[%s1626_s8 + $0x98] sm:$0xff]   ;;  %v1345_v30 = vld [vmem:[%s1626_s8 + $0x90] sm:$0xff]   ;;  %v1346_v31 = vld [vmem:[%s1626_s8 + $0x48] sm:$0xff]  }
  0x54   : > { %1264 = vmatpush3.bf16.msra.mxu1 %v1329_v14  ;;  %1243 = vmatprep.subr.bf16.mxu0 %v1330_v15  ;;  %v1347_v32 = vld [vmem:[%s1626_s8 + $0xc8] sm:$0xff]   ;;  %v1350_v35 = vld [vmem:[%s1626_s8 + $0x40] sm:$0xff]   ;;  %v1358_v41 = vld [vmem:[%s1707_s4] sm:$0xff]  }
  0x55   : > { %1265 = vmatprep.subr.bf16.mxu1 %v1331_v16  ;;  %v1348_v33 = vld [vmem:[%s1626_s8 + $0x8] sm:$0xff]   ;;  %v1351_v36 = vld [vmem:[%s1626_s8 + $0xc0] sm:$0xff]   ;;  %v983_v42 = vld [vmem:[%s1708_s5 + $0x8] sm:$0xff] }
  0x56   : > { %v1349_v34 = vld [vmem:[%s1626_s8 + $0x88] sm:$0xff]   ;;  %v1352_v37 = vld [vmem:[%s1626_s8] sm:$0xff]   ;;  %992 = vperm.xlu0 %1320, %v983_v42   ;;  %v982_v45 = vld [vmem:[%s1708_s5] sm:$0xff] }
  0x57   : > { %1244 = vmatpush3.bf16.msra.mxu0 %v1332_v17  ;;  %v1353_v38 = vld [vmem:[%s1626_s8 + $0x80] sm:$0xff]   ;;  %v1359_v59 = vld [vmem:[%s1707_s4 + $0x8] ss:$0 sps:$4 sm:$0xff]   ;;  %v1067_v0 = vld [vmem:[%s576_s26] sm:$0xff] }
  0x58   : > { %1266 = vmatpush3.bf16.msra.mxu1 %v1333_v18  ;;  %1245 = vmatprep.subr.bf16.mxu0 %v1334_v19  ;;  %v984_v43 = vld [vmem:[%s1708_s5 + $0x10] sm:$0xff]  ;;  %v1068_v5 = vld [vmem:[%s576_s26 + $0x8] sm:$0xff] }
  0x59   : > { %1267 = vmatprep.subr.bf16.mxu1 %v1335_v20  ;;  %997 = vperm.xlu1 %1321, %v984_v43   ;;  %v1069_v17 = vld [vmem:[%s576_s26 + $0x10] sm:$0xff] }
  0x5a   : > { %987 = vperm.xlu0 %1320, %v982_v45  }
  0x5b   : > { %1246 = vmatpush3.bf16.msra.mxu0 %v1336_v21  ;;  %v1091_v21 = vld [vmem:[%s620_s29] sm:$0xff] }
  0x5c   : > { %1268 = vmatpush3.bf16.msra.mxu1 %v1337_v22  ;;  %1247 = vmatprep.subr.bf16.mxu0 %v1338_v23 }
  0x5d   : > { %1269 = vmatprep.subr.bf16.mxu1 %v1339_v24 }
  0x5f   : > { %1248 = vmatpush3.bf16.msra.mxu0 %v1340_v25 }
  0x60   : > { %1270 = vmatpush3.bf16.msra.mxu1 %v1341_v26  ;;  %1249 = vmatprep.subr.bf16.mxu0 %v1342_v27 }
  0x61   : > { %1271 = vmatprep.subr.bf16.mxu1 %v1343_v28 }
  0x63   : > { %1250 = vmatpush3.bf16.msra.mxu0 %v1344_v29 }
  0x64   : > { %1272 = vmatpush3.bf16.msra.mxu1 %v1345_v30  ;;  %1251 = vmatprep.subr.bf16.mxu0 %v1346_v31 }
  0x65   : > { %1273 = vmatprep.subr.bf16.mxu1 %v1347_v32 }
  0x67   : > { %1252 = vmatpush3.bf16.msra.mxu0 %v1348_v33 }
  0x68   : > { %1274 = vmatpush3.bf16.msra.mxu1 %v1349_v34  ;;  %1253 = vmatprep.subr.bf16.mxu0 %v1350_v35 }
  0x69   : > { %1275 = vmatprep.subr.bf16.mxu1 %v1351_v36 }
  0x6b   : > { %1254 = vmatpush3.bf16.msra.mxu0 %v1352_v37 }
  0x6c   : > { %1276 = vmatpush3.bf16.msra.mxu1 %v1353_v38 }
  0x6e   : > { %931 = vmatmul.mubr.bf16.vlgmr.msra.gmra.mxu0 %v1195_v39 }
  0x6f   : > { %971 = vmatmul.mubr.bf16.vlgmr.msra.gmra.mxu1 %v1197_v40  ;;  %1288 = vmatprep.mubr.msk.bf16.mxu0 %vm1008_vm0, %v1358_v41 }
  0xd1   : > { %v993_v60 = vpop.permute.xlu0 %992 }
  0xd4   : > { %v998_v14 = vpop.permute.xlu1 %997 }
  0xd5   : > { %v988_v62 = vpop.permute.xlu0 %987 }
 0x12e   : > { %v1255_v46 = vpop.f32.mrf.mxu0 }
 0x12f   : > { %v1277_v47 = vpop.f32.mrf.mxu1 }
 0x130   : > { %v1256_v48 = vpop.f32.mrf.mxu0 }
 0x131   : > { %v1257_v49 = vadd.f32 %v1256_v48, %v1255_v46  ;;  %v1278_v50 = vpop.f32.mrf.mxu1 }
 0x132   : > { %v1279_v51 = vadd.f32 %v1278_v50, %v1277_v47  ;;  %v1258_v52 = vpop.f32.mrf.mxu0 }
 0x133   : > { %v1280_v53 = vpop.f32.mrf.mxu1 }
 0x134   : > { %v973_v54 = vadd.f32 %v1279_v51, %v1257_v49  ;;  %v1259_v55 = vpop.f32.mrf.mxu0 }
 0x135   : > { %v1281_v56 = vpop.f32.mrf.mxu1 }
 0x136   : > { %v981_v57 = vpack.c.bf16 %v973_v54, %v973_v54 }
 0x138   : > { %1292 = vmatprep.subr.msk.bf16.mxu0 %vm1015_vm1, %v981_v57  ;;  %v1017_v58 = vsel %vm1015_vm1, %v981_v57, 0 }
 0x139   : > { %1287 = vmatpush3.bf16.msra.mxu0 %v1017_v58 }
 0x13c   : > { %1289 = vmatmul.mubr.msk.bf16.vlgmr.msra.gmra.mxu0 %vm1008_vm0, %v1359_v59 }
 0x1fc   : > { %v1290_v61 = vpop.f32.mrf.mxu0 }
 0x1fd   : > { %v1062_v15 = vadd.f32 %v1290_v61, %v998_v14 }
 0x1fe   : > { %v1053_v63 = vpop.f32.mrf.mxu0 }
 0x1ff   : > { %v1054_v1 = vadd.f32 %v1053_v63, %v988_v62 }
 0x200   : > { %v1291_v2 = vpop.f32.mrf.mxu0 }
 0x201   : > { %v1070_v3 = vadd.f32 %v1067_v0, %v1054_v1 }
 0x202   : > { %v1056_v4 = vpop.f32.mrf.mxu0 }
 0x203   : > { %v1057_v6 = vadd.f32 %v1056_v4, %v993_v60  ;;  %v1235_v7 = vmul.f32 -1.442695, %v1070_v3 }
 0x205   : > { %v1077_v8 = vadd.f32 %v1068_v5, %v1057_v6  ;;  %1360 = vpow2.f32 %v1235_v7 }
 0x207   : > { %v1236_v9 = vmul.f32 -1.442695, %v1077_v8 }
 0x209   : > { %1362 = vpow2.f32 %v1236_v9 }
 0x212   : > { %v1361_v10 = vpop.eup %1360 }
 0x213   : > { %v1074_v13 = vadd.f32 1.0, %v1361_v10 }
 0x216   : > { %v1363_v11 = vpop.eup %1362 }
 0x217   : > { %v1081_v12 = vadd.f32 1.0, %v1363_v11 }
 0x219   : > { %1364 = vrcp.f32 %v1081_v12 }
 0x21a   : > { %1366 = vrcp.f32 %v1074_v13 }
 0x226   : > { %v1365_v16 = vpop.eup %1364 }
 0x227   : > { %v1084_v18 = vmul.f32 %v1365_v16, %v1062_v15  ;;  %v1367_v19 = vpop.eup %1366 }
 0x228   : > { %v1089_v23 = vsub.f32 1.0, %v1367_v19  ;;  %v1092_v25 = vmul.f32 %v1367_v19, %v1091_v21 }
 0x229   : > { %v1085_v20 = vadd.f32 %v1084_v18, %v1069_v17 }
 0x22b   : > { %vm1086_vm2 = vcmp.ge.f32.partialorder %v1085_v20, 0.0  ;;  %v1087_v22 = vmul.f32 0.2, %v1085_v20 }
 0x22d   : > { %v1088_v24 = vsel %vm1086_vm2, %v1085_v20, %v1087_v22 }
 0x22e   : > { %v1090_v26 = vmul.f32 %v1089_v23, %v1088_v24 }
 0x230   : > { %v1093_v27 = vadd.f32 %v1092_v25, %v1090_v26 }
 0x232   : > { %1094 = vst [vmem:[%s624_s24] sm:$0xff] %v1093_v27 }
 0x233 PF: > { %p13_p9 = scmp.ge.s32.totalorder %s1445_s25, 6   ;;  %s1711_s21 = smov %s1386_s22 }
 0x234   : > { %s1712_s22 = smov %s1454_s28  ;;  %s1713_s23 = smov %s1445_s25 }
 0x235   :  { %15 = sbr.rel (!%p13_p9) target bundleno = 2 (0x2), region = 169 }

// kernel: _lambda_.8
= control target key start
LH: loop header
LB: loop body
LE: loop exit
PB: predicated region body
PF: predicated region fallthrough
CT: control target
= control target key end

     0   :  { %s2315_s12 = smov 0   ;;  %s2317_s13 = smov 0   ;;  %s2516_s0 = inlined_call_operand.vmem [shape: bf16[2048,128], index: 0, kind: input, shape index: {}]   ;;  %s2517_s1 = inlined_call_operand.vmem [shape: bf16[128,128], index: 1, kind: input, shape index: {}]   ;;  %s2518_s2 = inlined_call_operand.vmem [shape: f32[1,128], index: 2, kind: input, shape index: {}]   ;;  %s2519_s3 = inlined_call_operand.vmem [shape: bf16[2048,128], index: 3, kind: output, shape index: {}]  }
   0x1   :  { %s2319_s14 = smov 0  }
   0x2 LB: > { %s32_s15 = sadd.s32 1, %s2289_s13  ;;  %p1704_p0 = scmp.ge.s32.totalorder %s2293_s14, 1  ;;  %s2293_s14 = sphi %s2319_s14, %s13_s14   ;;  %s2289_s13 = sphi %s2317_s13, %s2521_s13   ;;  %s2285_s12 = sphi %s2315_s12, %s2520_s12  }
   0x3   : > { %p34_p1 = scmp.ge.s32.totalorder %s32_s15, 4  ;;  %p188_p2 = scmp.lt.s32.totalorder %s2293_s14, 5 }
   0x5   : > { %s2523_s15 = smov (%p34_p1, %s32_s15), 0  ;;  %p189_p3 = pnand %p1704_p0, %p188_p2 }
   0x6   : > { %s1705_s18 = sshll.u32 (!%p189_p3), %s2285_s12, 6 }
   0x7   : > { %192 = sbr.rel (%p189_p3) target bundleno = 305 (0x131), region = 32  ;;  %p230_p4 = scmp.lt.s32.totalorder (!%p189_p3), %s1705_s18, 255 }
   0xc   : > { %v2231_v0 = vld [vmem:[%s2517_s1 + $0x38] sm:$0xff]   ;;  %v2232_v1 = vld [vmem:[%s2517_s1 + $0x30] sm:$0xff]   ;;  %s2525_s18 = smov (!%p230_p4, %s1705_s18), 255  ;;  %v2233_v2 = vld [vmem:[%s2517_s1 + $0x28] sm:$0xff]  }
   0xd   : > { %2111 = vmatprep.subr.bf16.mxu0 %v2231_v0  ;;  %2191 = vmatprep.subr.bf16.mxu1 %v2231_v0  ;;  %s1706_s23 = sshll.u32 %s2525_s18, 2  ;;  %v2234_v3 = vld [vmem:[%s2517_s1 + $0x20] sm:$0xff]   ;;  %v2235_v6 = vld [vmem:[%s2517_s1 + $0x18] sm:$0xff]   ;;  %v2236_v7 = vld [vmem:[%s2517_s1 + $0x10] sm:$0xff]  }
   0xe   : > { %2112 = vmatpush3.bf16.msra.mxu0 %v2231_v0  ;;  %2199 = vmatpush3.bf16.msra.mxu1 %v2231_v0  ;;  %s2350_s26 = scalar_lea.vmem %s2516_s0, %s1706_s23  ;;  %v2237_v8 = vld [vmem:[%s2517_s1 + $0x8] sm:$0xff]   ;;  %v2238_v9 = vld [vmem:[%s2517_s1] sm:$0xff]   ;;  %s2415_s17 = scalar_lea.vmem %s2519_s3, %s1706_s23 }
   0xf   : > { %2113 = vmatprep.subr.bf16.mxu0 %v2232_v1  ;;  %2192 = vmatprep.subr.bf16.mxu1 %v2232_v1  ;;  %v2239_v4 = vld [vmem:[%s2350_s26] sm:$0xff]   ;;  %v2241_v10 = vld [vmem:[%s2350_s26 + $0x8] sm:$0xff]   ;;  %v2243_v12 = vld [vmem:[%s2350_s26 + $0x10] sm:$0xff]  }
  0x10   : > { %v2240_v5 = vld [vmem:[%s2350_s26 + $0x80] sm:$0xff]   ;;  %2127 = vmatprep.mubr.bf16.mxu0 %v2239_v4  ;;  %v2242_v11 = vld [vmem:[%s2350_s26 + $0x88] sm:$0xff]   ;;  %v2244_v13 = vld [vmem:[%s2350_s26 + $0x90] sm:$0xff]  }
  0x11   : > { %2159 = vmatprep.mubr.bf16.mxu1 %v2240_v5  ;;  %v2245_v14 = vld [vmem:[%s2350_s26 + $0x18] sm:$0xff]   ;;  %v2247_v16 = vld [vmem:[%s2350_s26 + $0x20] sm:$0xff]   ;;  %v2249_v18 = vld [vmem:[%s2350_s26 + $0x28] sm:$0xff]  }
  0x12   : > { %2114 = vmatpush3.bf16.msra.mxu0 %v2232_v1  ;;  %2200 = vmatpush3.bf16.msra.mxu1 %v2232_v1  ;;  %v2246_v15 = vld [vmem:[%s2350_s26 + $0x98] sm:$0xff]   ;;  %v2248_v17 = vld [vmem:[%s2350_s26 + $0xa0] sm:$0xff]   ;;  %v2250_v19 = vld [vmem:[%s2350_s26 + $0xa8] sm:$0xff]  }
  0x13   : > { %2115 = vmatprep.subr.bf16.mxu0 %v2233_v2  ;;  %2193 = vmatprep.subr.bf16.mxu1 %v2233_v2  ;;  %v2251_v20 = vld [vmem:[%s2350_s26 + $0x30] sm:$0xff]   ;;  %v2253_v22 = vld [vmem:[%s2350_s26 + $0x38] sm:$0xff]   ;;  %v2255_v24 = vld [vmem:[%s2350_s26 + $0x40] sm:$0xff]  }
  0x14   : > { %v2252_v21 = vld [vmem:[%s2350_s26 + $0xb0] sm:$0xff]   ;;  %v2254_v23 = vld [vmem:[%s2350_s26 + $0xb8] sm:$0xff]   ;;  %v2256_v25 = vld [vmem:[%s2350_s26 + $0xc0] sm:$0xff]  }
  0x15   : > { %v2257_v26 = vld [vmem:[%s2350_s26 + $0x48] sm:$0xff]   ;;  %v2259_v28 = vld [vmem:[%s2350_s26 + $0x50] sm:$0xff]   ;;  %v2261_v30 = vld [vmem:[%s2350_s26 + $0x58] sm:$0xff]  }
  0x16   : > { %2116 = vmatpush3.bf16.msra.mxu0 %v2233_v2  ;;  %2201 = vmatpush3.bf16.msra.mxu1 %v2233_v2  ;;  %v2258_v27 = vld [vmem:[%s2350_s26 + $0xc8] sm:$0xff]   ;;  %v2260_v29 = vld [vmem:[%s2350_s26 + $0xd0] sm:$0xff]   ;;  %v2262_v31 = vld [vmem:[%s2350_s26 + $0xd8] sm:$0xff]  }
  0x17   : > { %2117 = vmatprep.subr.bf16.mxu0 %v2234_v3  ;;  %2194 = vmatprep.subr.bf16.mxu1 %v2234_v3  ;;  %v2263_v32 = vld [vmem:[%s2350_s26 + $0x60] sm:$0xff]   ;;  %v2265_v34 = vld [vmem:[%s2350_s26 + $0x68] sm:$0xff]   ;;  %v2267_v36 = vld [vmem:[%s2350_s26 + $0x70] sm:$0xff]  }
  0x18   : > { %v2264_v33 = vld [vmem:[%s2350_s26 + $0xe0] sm:$0xff]   ;;  %v2266_v35 = vld [vmem:[%s2350_s26 + $0xe8] sm:$0xff]   ;;  %v2268_v37 = vld [vmem:[%s2350_s26 + $0xf0] sm:$0xff]  }
  0x19   : > { %v2269_v38 = vld [vmem:[%s2350_s26 + $0x78] sm:$0xff]   ;;  %v2402_v42 = vld [vmem:[%s2518_s2] ss:$0 sm:$0xff] }
  0x1a   : > { %2118 = vmatpush3.bf16.msra.mxu0 %v2234_v3  ;;  %2202 = vmatpush3.bf16.msra.mxu1 %v2234_v3  ;;  %v2270_v39 = vld [vmem:[%s2350_s26 + $0xf8] sm:$0xff]  }
  0x1b   : > { %2119 = vmatprep.subr.bf16.mxu0 %v2235_v6  ;;  %2195 = vmatprep.subr.bf16.mxu1 %v2235_v6 }
  0x1e   : > { %2120 = vmatpush3.bf16.msra.mxu0 %v2235_v6  ;;  %2203 = vmatpush3.bf16.msra.mxu1 %v2235_v6 }
  0x1f   : > { %2121 = vmatprep.subr.bf16.mxu0 %v2236_v7  ;;  %2196 = vmatprep.subr.bf16.mxu1 %v2236_v7 }
  0x22   : > { %2122 = vmatpush3.bf16.msra.mxu0 %v2236_v7  ;;  %2204 = vmatpush3.bf16.msra.mxu1 %v2236_v7 }
  0x23   : > { %2123 = vmatprep.subr.bf16.mxu0 %v2237_v8  ;;  %2197 = vmatprep.subr.bf16.mxu1 %v2237_v8 }
  0x26   : > { %2124 = vmatpush3.bf16.msra.mxu0 %v2237_v8  ;;  %2205 = vmatpush3.bf16.msra.mxu1 %v2237_v8 }
  0x27   : > { %2125 = vmatprep.subr.bf16.mxu0 %v2238_v9  ;;  %2198 = vmatprep.subr.bf16.mxu1 %v2238_v9 }
  0x2a   : > { %2126 = vmatpush3.bf16.msra.mxu0 %v2238_v9  ;;  %2206 = vmatpush3.bf16.msra.mxu1 %v2238_v9 }
  0x2d   : > { %2128 = vmatmul.mubr.bf16.vlgmr.msra.gmra.mxu0 %v2241_v10  ;;  %2160 = vmatmul.mubr.bf16.vlgmr.msra.gmra.mxu1 %v2242_v11 }
  0x2e   : > { %2131 = vmatprep.mubr.bf16.mxu0 %v2243_v12  ;;  %2163 = vmatprep.mubr.bf16.mxu1 %v2244_v13 }
  0x35   : > { %2132 = vmatmul.mubr.bf16.gmra.mxu0 %v2245_v14  ;;  %2164 = vmatmul.mubr.bf16.gmra.mxu1 %v2246_v15 }
  0x36   : > { %2135 = vmatprep.mubr.bf16.mxu0 %v2247_v16  ;;  %2167 = vmatprep.mubr.bf16.mxu1 %v2248_v17 }
  0x3d   : > { %2136 = vmatmul.mubr.bf16.gmra.mxu0 %v2249_v18  ;;  %2168 = vmatmul.mubr.bf16.gmra.mxu1 %v2250_v19 }
  0x3e   : > { %2139 = vmatprep.mubr.bf16.mxu0 %v2251_v20  ;;  %2171 = vmatprep.mubr.bf16.mxu1 %v2252_v21 }
  0x45   : > { %2140 = vmatmul.mubr.bf16.gmra.mxu0 %v2253_v22  ;;  %2172 = vmatmul.mubr.bf16.gmra.mxu1 %v2254_v23 }
  0x46   : > { %2143 = vmatprep.mubr.bf16.mxu0 %v2255_v24  ;;  %2175 = vmatprep.mubr.bf16.mxu1 %v2256_v25 }
  0x4d   : > { %2144 = vmatmul.mubr.bf16.gmra.mxu0 %v2257_v26  ;;  %2176 = vmatmul.mubr.bf16.gmra.mxu1 %v2258_v27 }
  0x4e   : > { %2147 = vmatprep.mubr.bf16.mxu0 %v2259_v28  ;;  %2179 = vmatprep.mubr.bf16.mxu1 %v2260_v29 }
  0x55   : > { %2148 = vmatmul.mubr.bf16.gmra.mxu0 %v2261_v30  ;;  %2180 = vmatmul.mubr.bf16.gmra.mxu1 %v2262_v31 }
  0x56   : > { %2151 = vmatprep.mubr.bf16.mxu0 %v2263_v32  ;;  %2183 = vmatprep.mubr.bf16.mxu1 %v2264_v33 }
  0x5d   : > { %2152 = vmatmul.mubr.bf16.gmra.mxu0 %v2265_v34  ;;  %2184 = vmatmul.mubr.bf16.gmra.mxu1 %v2266_v35 }
  0x5e   : > { %2155 = vmatprep.mubr.bf16.mxu0 %v2267_v36  ;;  %2187 = vmatprep.mubr.bf16.mxu1 %v2268_v37 }
  0x65   : > { %2156 = vmatmul.mubr.bf16.gmra.mxu0 %v2269_v38  ;;  %2188 = vmatmul.mubr.bf16.gmra.mxu1 %v2270_v39 }
  0xed   : > { %v2129_v40 = vpop.f32.mrf.mxu0  ;;  %v2161_v41 = vpop.f32.mrf.mxu1 }
  0xee   : > { %v1205_v47 = vadd.f32 %v2129_v40, %v2402_v42  ;;  %v1237_v48 = vadd.f32 %v2161_v41, %v2402_v42 }
  0xef   : > { %v746_v43 = vpop.f32.mrf.mxu0  ;;  %v874_v44 = vpop.f32.mrf.mxu1 }
  0xf0   : > { %v1203_v51 = vadd.f32 %v2402_v42, %v746_v43  ;;  %v1235_v52 = vadd.f32 %v2402_v42, %v874_v44 }
  0xf1   : > { %v2130_v45 = vpop.f32.mrf.mxu0  ;;  %v2162_v46 = vpop.f32.mrf.mxu1 }
  0xf2   : > { %v1206_v49 = vadd.f32 %v2130_v45, %v2402_v42  ;;  %v1238_v50 = vadd.f32 %v2162_v46, %v2402_v42 }
  0xf3   : > { %v749_v53 = vpop.f32.mrf.mxu0  ;;  %v877_v54 = vpop.f32.mrf.mxu1 }
  0xf4   : > { %v1888_v55 = vpack.c.bf16 %v1206_v49, %v1205_v47  ;;  %v1968_v56 = vpack.c.bf16 %v1238_v50, %v1237_v48  ;;  %v1204_v57 = vadd.f32 %v2402_v42, %v749_v53  ;;  %v1236_v58 = vadd.f32 %v2402_v42, %v877_v54 }
  0xf5   : > { %v2133_v59 = vpop.f32.mrf.mxu0  ;;  %v2165_v60 = vpop.f32.mrf.mxu1 }
  0xf6   : > { %2040 = vst [vmem:[%s2415_s17 + $0x8] sm:$0xff] %v1888_v55   ;;  %2056 = vst [vmem:[%s2415_s17 + $0x88] sm:$0xff] %v1968_v56   ;;  %v1883_v61 = vpack.c.bf16 %v1204_v57, %v1203_v51  ;;  %v1963_v62 = vpack.c.bf16 %v1236_v58, %v1235_v52  ;;  %v1209_v3 = vadd.f32 %v2133_v59, %v2402_v42 }
  0xf7   : > { %v762_v63 = vpop.f32.mrf.mxu0  ;;  %v890_v0 = vpop.f32.mrf.mxu1  ;;  %v1241_v4 = vadd.f32 %v2165_v60, %v2402_v42 }
  0xf8   : > { %1884 = vst [vmem:[%s2415_s17] sm:$0xff] %v1883_v61   ;;  %2055 = vst [vmem:[%s2415_s17 + $0x80] sm:$0xff] %v1963_v62   ;;  %v1207_v7 = vadd.f32 %v2402_v42, %v762_v63  ;;  %v1239_v8 = vadd.f32 %v2402_v42, %v890_v0 }
  0xf9   : > { %v2134_v1 = vpop.f32.mrf.mxu0  ;;  %v2166_v2 = vpop.f32.mrf.mxu1 }
  0xfa   : > { %v1210_v5 = vadd.f32 %v2134_v1, %v2402_v42  ;;  %v1242_v6 = vadd.f32 %v2166_v2, %v2402_v42 }
  0xfb   : > { %v765_v9 = vpop.f32.mrf.mxu0  ;;  %v893_v10 = vpop.f32.mrf.mxu1 }
  0xfc   : > { %v1898_v11 = vpack.c.bf16 %v1210_v5, %v1209_v3  ;;  %v1978_v12 = vpack.c.bf16 %v1242_v6, %v1241_v4  ;;  %v1208_v13 = vadd.f32 %v2402_v42, %v765_v9  ;;  %v1240_v14 = vadd.f32 %v2402_v42, %v893_v10 }
  0xfd   : > { %v2137_v15 = vpop.f32.mrf.mxu0  ;;  %v2169_v16 = vpop.f32.mrf.mxu1 }
  0xfe   : > { %2042 = vst [vmem:[%s2415_s17 + $0x18] sm:$0xff] %v1898_v11   ;;  %2058 = vst [vmem:[%s2415_s17 + $0x98] sm:$0xff] %v1978_v12   ;;  %v1893_v17 = vpack.c.bf16 %v1208_v13, %v1207_v7  ;;  %v1973_v18 = vpack.c.bf16 %v1240_v14, %v1239_v8  ;;  %v1213_v23 = vadd.f32 %v2137_v15, %v2402_v42 }
  0xff   : > { %v778_v19 = vpop.f32.mrf.mxu0  ;;  %v906_v20 = vpop.f32.mrf.mxu1  ;;  %v1245_v24 = vadd.f32 %v2169_v16, %v2402_v42 }
 0x100   : > { %2041 = vst [vmem:[%s2415_s17 + $0x10] sm:$0xff] %v1893_v17   ;;  %2057 = vst [vmem:[%s2415_s17 + $0x90] sm:$0xff] %v1973_v18   ;;  %v1211_v27 = vadd.f32 %v2402_v42, %v778_v19  ;;  %v1243_v28 = vadd.f32 %v2402_v42, %v906_v20 }
 0x101   : > { %v2138_v21 = vpop.f32.mrf.mxu0  ;;  %v2170_v22 = vpop.f32.mrf.mxu1 }
 0x102   : > { %v1214_v25 = vadd.f32 %v2138_v21, %v2402_v42  ;;  %v1246_v26 = vadd.f32 %v2170_v22, %v2402_v42 }
 0x103   : > { %v781_v29 = vpop.f32.mrf.mxu0  ;;  %v909_v30 = vpop.f32.mrf.mxu1 }
 0x104   : > { %v1908_v31 = vpack.c.bf16 %v1214_v25, %v1213_v23  ;;  %v1988_v32 = vpack.c.bf16 %v1246_v26, %v1245_v24  ;;  %v1212_v33 = vadd.f32 %v2402_v42, %v781_v29  ;;  %v1244_v34 = vadd.f32 %v2402_v42, %v909_v30 }
 0x105   : > { %v2141_v35 = vpop.f32.mrf.mxu0  ;;  %v2173_v36 = vpop.f32.mrf.mxu1 }
 0x106   : > { %2044 = vst [vmem:[%s2415_s17 + $0x28] sm:$0xff] %v1908_v31   ;;  %2060 = vst [vmem:[%s2415_s17 + $0xa8] sm:$0xff] %v1988_v32   ;;  %v1903_v37 = vpack.c.bf16 %v1212_v33, %v1211_v27  ;;  %v1983_v38 = vpack.c.bf16 %v1244_v34, %v1243_v28  ;;  %v1217_v44 = vadd.f32 %v2141_v35, %v2402_v42 }
 0x107   : > { %v794_v39 = vpop.f32.mrf.mxu0  ;;  %v922_v40 = vpop.f32.mrf.mxu1  ;;  %v1249_v45 = vadd.f32 %v2173_v36, %v2402_v42 }
 0x108   : > { %2043 = vst [vmem:[%s2415_s17 + $0x20] sm:$0xff] %v1903_v37   ;;  %2059 = vst [vmem:[%s2415_s17 + $0xa0] sm:$0xff] %v1983_v38   ;;  %v1215_v48 = vadd.f32 %v2402_v42, %v794_v39  ;;  %v1247_v49 = vadd.f32 %v2402_v42, %v922_v40 }
 0x109   : > { %v2142_v41 = vpop.f32.mrf.mxu0  ;;  %v2174_v43 = vpop.f32.mrf.mxu1 }
 0x10a   : > { %v1218_v46 = vadd.f32 %v2142_v41, %v2402_v42  ;;  %v1250_v47 = vadd.f32 %v2174_v43, %v2402_v42 }
 0x10b   : > { %v797_v50 = vpop.f32.mrf.mxu0  ;;  %v925_v51 = vpop.f32.mrf.mxu1 }
 0x10c   : > { %v1918_v52 = vpack.c.bf16 %v1218_v46, %v1217_v44  ;;  %v1998_v53 = vpack.c.bf16 %v1250_v47, %v1249_v45  ;;  %v1216_v54 = vadd.f32 %v2402_v42, %v797_v50  ;;  %v1248_v55 = vadd.f32 %v2402_v42, %v925_v51 }
 0x10d   : > { %v2145_v56 = vpop.f32.mrf.mxu0  ;;  %v2177_v57 = vpop.f32.mrf.mxu1 }
 0x10e   : > { %2046 = vst [vmem:[%s2415_s17 + $0x38] sm:$0xff] %v1918_v52   ;;  %2062 = vst [vmem:[%s2415_s17 + $0xb8] sm:$0xff] %v1998_v53   ;;  %v1913_v58 = vpack.c.bf16 %v1216_v54, %v1215_v48  ;;  %v1993_v59 = vpack.c.bf16 %v1248_v55, %v1247_v49  ;;  %v1221_v0 = vadd.f32 %v2145_v56, %v2402_v42 }
 0x10f   : > { %v810_v60 = vpop.f32.mrf.mxu0  ;;  %v938_v61 = vpop.f32.mrf.mxu1  ;;  %v1253_v1 = vadd.f32 %v2177_v57, %v2402_v42 }
 0x110   : > { %2045 = vst [vmem:[%s2415_s17 + $0x30] sm:$0xff] %v1913_v58   ;;  %2061 = vst [vmem:[%s2415_s17 + $0xb0] sm:$0xff] %v1993_v59   ;;  %v1219_v4 = vadd.f32 %v2402_v42, %v810_v60  ;;  %v1251_v5 = vadd.f32 %v2402_v42, %v938_v61 }
 0x111   : > { %v2146_v62 = vpop.f32.mrf.mxu0  ;;  %v2178_v63 = vpop.f32.mrf.mxu1 }
 0x112   : > { %v1222_v2 = vadd.f32 %v2146_v62, %v2402_v42  ;;  %v1254_v3 = vadd.f32 %v2178_v63, %v2402_v42 }
 0x113   : > { %v813_v6 = vpop.f32.mrf.mxu0  ;;  %v941_v7 = vpop.f32.mrf.mxu1 }
 0x114   : > { %v1928_v8 = vpack.c.bf16 %v1222_v2, %v1221_v0  ;;  %v2008_v9 = vpack.c.bf16 %v1254_v3, %v1253_v1  ;;  %v1220_v10 = vadd.f32 %v2402_v42, %v813_v6  ;;  %v1252_v11 = vadd.f32 %v2402_v42, %v941_v7 }
 0x115   : > { %v2149_v12 = vpop.f32.mrf.mxu0  ;;  %v2181_v13 = vpop.f32.mrf.mxu1 }
 0x116   : > { %2048 = vst [vmem:[%s2415_s17 + $0x48] sm:$0xff] %v1928_v8   ;;  %2064 = vst [vmem:[%s2415_s17 + $0xc8] sm:$0xff] %v2008_v9   ;;  %v1923_v14 = vpack.c.bf16 %v1220_v10, %v1219_v4  ;;  %v2003_v15 = vpack.c.bf16 %v1252_v11, %v1251_v5  ;;  %v1225_v20 = vadd.f32 %v2149_v12, %v2402_v42 }
 0x117   : > { %v826_v16 = vpop.f32.mrf.mxu0  ;;  %v954_v17 = vpop.f32.mrf.mxu1  ;;  %v1257_v21 = vadd.f32 %v2181_v13, %v2402_v42 }
 0x118   : > { %2047 = vst [vmem:[%s2415_s17 + $0x40] sm:$0xff] %v1923_v14   ;;  %2063 = vst [vmem:[%s2415_s17 + $0xc0] sm:$0xff] %v2003_v15   ;;  %v1223_v24 = vadd.f32 %v2402_v42, %v826_v16  ;;  %v1255_v25 = vadd.f32 %v2402_v42, %v954_v17 }
 0x119   : > { %v2150_v18 = vpop.f32.mrf.mxu0  ;;  %v2182_v19 = vpop.f32.mrf.mxu1 }
 0x11a   : > { %v1226_v22 = vadd.f32 %v2150_v18, %v2402_v42  ;;  %v1258_v23 = vadd.f32 %v2182_v19, %v2402_v42 }
 0x11b   : > { %v829_v26 = vpop.f32.mrf.mxu0  ;;  %v957_v27 = vpop.f32.mrf.mxu1 }
 0x11c   : > { %v1938_v28 = vpack.c.bf16 %v1226_v22, %v1225_v20  ;;  %v2018_v29 = vpack.c.bf16 %v1258_v23, %v1257_v21  ;;  %v1224_v30 = vadd.f32 %v2402_v42, %v829_v26  ;;  %v1256_v31 = vadd.f32 %v2402_v42, %v957_v27 }
 0x11d   : > { %v2153_v32 = vpop.f32.mrf.mxu0  ;;  %v2185_v33 = vpop.f32.mrf.mxu1 }
 0x11e   : > { %2050 = vst [vmem:[%s2415_s17 + $0x58] sm:$0xff] %v1938_v28   ;;  %2066 = vst [vmem:[%s2415_s17 + $0xd8] sm:$0xff] %v2018_v29   ;;  %v1933_v34 = vpack.c.bf16 %v1224_v30, %v1223_v24  ;;  %v2013_v35 = vpack.c.bf16 %v1256_v31, %v1255_v25  ;;  %v1229_v40 = vadd.f32 %v2153_v32, %v2402_v42 }
 0x11f   : > { %v842_v36 = vpop.f32.mrf.mxu0  ;;  %v970_v37 = vpop.f32.mrf.mxu1  ;;  %v1261_v41 = vadd.f32 %v2185_v33, %v2402_v42 }
 0x120   : > { %2049 = vst [vmem:[%s2415_s17 + $0x50] sm:$0xff] %v1933_v34   ;;  %2065 = vst [vmem:[%s2415_s17 + $0xd0] sm:$0xff] %v2013_v35   ;;  %v1227_v45 = vadd.f32 %v2402_v42, %v842_v36  ;;  %v1259_v46 = vadd.f32 %v2402_v42, %v970_v37 }
 0x121   : > { %v2154_v38 = vpop.f32.mrf.mxu0  ;;  %v2186_v39 = vpop.f32.mrf.mxu1 }
 0x122   : > { %v1230_v43 = vadd.f32 %v2154_v38, %v2402_v42  ;;  %v1262_v44 = vadd.f32 %v2186_v39, %v2402_v42 }
 0x123   : > { %v845_v47 = vpop.f32.mrf.mxu0  ;;  %v973_v48 = vpop.f32.mrf.mxu1 }
 0x124   : > { %v1948_v49 = vpack.c.bf16 %v1230_v43, %v1229_v40  ;;  %v2028_v50 = vpack.c.bf16 %v1262_v44, %v1261_v41  ;;  %v1228_v51 = vadd.f32 %v2402_v42, %v845_v47  ;;  %v1260_v52 = vadd.f32 %v2402_v42, %v973_v48 }
 0x125   : > { %v2157_v53 = vpop.f32.mrf.mxu0  ;;  %v2189_v54 = vpop.f32.mrf.mxu1 }
 0x126   : > { %2052 = vst [vmem:[%s2415_s17 + $0x68] sm:$0xff] %v1948_v49   ;;  %2068 = vst [vmem:[%s2415_s17 + $0xe8] sm:$0xff] %v2028_v50   ;;  %v1943_v55 = vpack.c.bf16 %v1228_v51, %v1227_v45  ;;  %v2023_v56 = vpack.c.bf16 %v1260_v52, %v1259_v46  ;;  %v1233_v61 = vadd.f32 %v2157_v53, %v2402_v42 }
 0x127   : > { %v858_v57 = vpop.f32.mrf.mxu0  ;;  %v986_v58 = vpop.f32.mrf.mxu1  ;;  %v1265_v62 = vadd.f32 %v2189_v54, %v2402_v42 }
 0x128   : > { %2051 = vst [vmem:[%s2415_s17 + $0x60] sm:$0xff] %v1943_v55   ;;  %2067 = vst [vmem:[%s2415_s17 + $0xe0] sm:$0xff] %v2023_v56   ;;  %v1231_v1 = vadd.f32 %v2402_v42, %v858_v57  ;;  %v1263_v2 = vadd.f32 %v2402_v42, %v986_v58 }
 0x129   : > { %v2158_v59 = vpop.f32.mrf.mxu0  ;;  %v2190_v60 = vpop.f32.mrf.mxu1 }
 0x12a   : > { %v1234_v63 = vadd.f32 %v2158_v59, %v2402_v42  ;;  %v1266_v0 = vadd.f32 %v2190_v60, %v2402_v42 }
 0x12b   : > { %v861_v3 = vpop.f32.mrf.mxu0  ;;  %v989_v4 = vpop.f32.mrf.mxu1 }
 0x12c   : > { %v1958_v5 = vpack.c.bf16 %v1234_v63, %v1233_v61  ;;  %v2038_v6 = vpack.c.bf16 %v1266_v0, %v1265_v62  ;;  %v1232_v7 = vadd.f32 %v2402_v42, %v861_v3  ;;  %v1264_v8 = vadd.f32 %v2402_v42, %v989_v4 }
 0x12e   : > { %2054 = vst [vmem:[%s2415_s17 + $0x78] sm:$0xff] %v1958_v5   ;;  %2070 = vst [vmem:[%s2415_s17 + $0xf8] sm:$0xff] %v2038_v6   ;;  %v1953_v9 = vpack.c.bf16 %v1232_v7, %v1231_v1  ;;  %v2033_v10 = vpack.c.bf16 %v1264_v8, %v1263_v2 }
 0x130   : > { %2053 = vst [vmem:[%s2415_s17 + $0x70] sm:$0xff] %v1953_v9   ;;  %2069 = vst [vmem:[%s2415_s17 + $0xf0] sm:$0xff] %v2033_v10  }
 0x131 PF: > { %s13_s14 = sadd.s32 1, %s2293_s14   ;;  %s2520_s12 = smov %s2289_s13 }
 0x132   : > { %p10_p5 = scmp.ge.s32.totalorder %s13_s14, 6   ;;  %s2521_s13 = smov %s2523_s15 }
 0x134   :  { %12 = sbr.rel (!%p10_p5) target bundleno = 2 (0x2), region = 76 }

// kernel: _lambda_.9
= control target key start
LH: loop header
LB: loop body
LE: loop exit
PB: predicated region body
PF: predicated region fallthrough
CT: control target
= control target key end

     0   :  { %s912_s18 = smov 0   ;;  %s1015_s0 = inlined_call_operand.vmem [shape: bf16[2048,128], index: 0, kind: input, shape index: {}]   ;;  %s1016_s1 = inlined_call_operand.vmem [shape: bf16[128,128], index: 1, kind: input, shape index: {}]   ;;  %s1017_s2 = inlined_call_operand.vmem [shape: f32[1,128], index: 2, kind: input, shape index: {}]   ;;  %s1018_s3 = inlined_call_operand.vmem [shape: bf16[128,128], index: 3, kind: input, shape index: {}]   ;;  %s1019_s4 = inlined_call_operand.vmem [shape: f32[1,128], index: 4, kind: input, shape index: {}]   ;;  %s1020_s5 = inlined_call_operand.vmem [shape: f32[2048,128], index: 5, kind: output, shape index: {}]  }
   0x1 LB: > { %s709_s19 = sadd.s32 4294967295, %s880_s18   ;;  %p713_p0 = scmp.ge.s32.totalorder %s880_s18, 1  ;;  %s880_s18 = sphi %s912_s18, %s15_s18  }
   0x2   : > { %p188_p1 = scmp.lt.s32.totalorder %s880_s18, 17 }
   0x4   : > { %p189_p2 = pnand %p713_p0, %p188_p1 }
   0x5   : > { %s714_s22 = sshll.u32 (!%p189_p2), %s709_s19, 4 }
   0x6   : > { %192 = sbr.rel (%p189_p2) target bundleno = 474 (0x1da), region = 40  ;;  %p217_p3 = scmp.lt.s32.totalorder (!%p189_p2), %s714_s22, 255 }
   0xb   : > { %v850_v0 = vld [vmem:[%s1016_s1 + $0x38] sm:$0xff]   ;;  %v851_v1 = vld [vmem:[%s1016_s1 + $0x30] sm:$0xff]   ;;  %s1022_s22 = smov (!%p217_p3, %s714_s22), 255  ;;  %v852_v2 = vld [vmem:[%s1016_s1 + $0x28] sm:$0xff]  }
   0xc   : > { %778 = vmatprep.subr.bf16.mxu0 %v850_v0  ;;  %s715_s27 = sshll.u32 %s1022_s22, 2  ;;  %v853_v3 = vld [vmem:[%s1016_s1 + $0x20] sm:$0xff]   ;;  %v854_v5 = vld [vmem:[%s1016_s1 + $0x18] sm:$0xff]   ;;  %v855_v6 = vld [vmem:[%s1016_s1 + $0x10] sm:$0xff]   ;;  %s717_s11 = sshll.u32 %s1022_s22, 3 }
   0xd   : > { %779 = vmatpush3.bf16.msra.mxu0 %v850_v0  ;;  %s935_s30 = scalar_lea.vmem %s1015_s0, %s715_s27  ;;  %v866_v7 = vld [vmem:[%s1018_s3 + $0x38] sm:$0xff]   ;;  %v867_v8 = vld [vmem:[%s1018_s3 + $0x30] sm:$0xff]   ;;  %v856_v9 = vld [vmem:[%s1016_s1 + $0x8] sm:$0xff]   ;;  %s994_s16 = scalar_lea.vmem %s1020_s5, %s717_s11 }
   0xe   : > { %780 = vmatprep.subr.bf16.mxu0 %v851_v1  ;;  %v858_v4 = vld [vmem:[%s935_s30] sm:$0xff]   ;;  %810 = vmatprep.subr.bf16.mxu1 %v866_v7  ;;  %v868_v10 = vld [vmem:[%s1018_s3 + $0x28] sm:$0xff]   ;;  %v870_v13 = vld [vmem:[%s1018_s3 + $0x18] sm:$0xff]  }
   0xf   : > { %794 = vmatprep.mubr.bf16.mxu0 %v858_v4  ;;  %811 = vmatpush3.bf16.msra.mxu1 %v866_v7  ;;  %v857_v11 = vld [vmem:[%s1016_s1] sm:$0xff]   ;;  %v859_v14 = vld [vmem:[%s935_s30 + $0x8] sm:$0xff]   ;;  %v860_v15 = vld [vmem:[%s935_s30 + $0x10] sm:$0xff]  }
  0x10   : > { %812 = vmatprep.subr.bf16.mxu1 %v867_v8  ;;  %v869_v12 = vld [vmem:[%s1018_s3 + $0x20] sm:$0xff]   ;;  %v861_v16 = vld [vmem:[%s935_s30 + $0x18] sm:$0xff]   ;;  %v863_v18 = vld [vmem:[%s935_s30 + $0x28] sm:$0xff]  }
  0x11   : > { %781 = vmatpush3.bf16.msra.mxu0 %v851_v1  ;;  %v862_v17 = vld [vmem:[%s935_s30 + $0x20] sm:$0xff]   ;;  %v864_v19 = vld [vmem:[%s935_s30 + $0x30] sm:$0xff]   ;;  %v865_v20 = vld [vmem:[%s935_s30 + $0x38] sm:$0xff]  }
  0x12   : > { %782 = vmatprep.subr.bf16.mxu0 %v852_v2  ;;  %v871_v21 = vld [vmem:[%s1018_s3 + $0x10] sm:$0xff]   ;;  %v872_v22 = vld [vmem:[%s1018_s3 + $0x8] sm:$0xff]   ;;  %v873_v23 = vld [vmem:[%s1018_s3] sm:$0xff]  }
  0x13   : > { %813 = vmatpush3.bf16.msra.mxu1 %v867_v8  ;;  %v718_v27 = vld [vmem:[%s1017_s2] ss:$0 sm:$0xff] }
  0x14   : > { %814 = vmatprep.subr.bf16.mxu1 %v868_v10  ;;  %v735_v1 = vld [vmem:[%s1019_s4] ss:$0 sm:$0xff] }
  0x15   : > { %783 = vmatpush3.bf16.msra.mxu0 %v852_v2 }
  0x16   : > { %784 = vmatprep.subr.bf16.mxu0 %v853_v3 }
  0x17   : > { %815 = vmatpush3.bf16.msra.mxu1 %v868_v10 }
  0x18   : > { %816 = vmatprep.subr.bf16.mxu1 %v869_v12 }
  0x19   : > { %785 = vmatpush3.bf16.msra.mxu0 %v853_v3 }
  0x1a   : > { %786 = vmatprep.subr.bf16.mxu0 %v854_v5 }
  0x1b   : > { %817 = vmatpush3.bf16.msra.mxu1 %v869_v12 }
  0x1c   : > { %818 = vmatprep.subr.bf16.mxu1 %v870_v13 }
  0x1d   : > { %787 = vmatpush3.bf16.msra.mxu0 %v854_v5 }
  0x1e   : > { %788 = vmatprep.subr.bf16.mxu0 %v855_v6 }
  0x1f   : > { %819 = vmatpush3.bf16.msra.mxu1 %v870_v13 }
  0x20   : > { %820 = vmatprep.subr.bf16.mxu1 %v871_v21 }
  0x21   : > { %789 = vmatpush3.bf16.msra.mxu0 %v855_v6 }
  0x22   : > { %790 = vmatprep.subr.bf16.mxu0 %v856_v9 }
  0x23   : > { %821 = vmatpush3.bf16.msra.mxu1 %v871_v21 }
  0x24   : > { %822 = vmatprep.subr.bf16.mxu1 %v872_v22 }
  0x25   : > { %791 = vmatpush3.bf16.msra.mxu0 %v856_v9 }
  0x26   : > { %792 = vmatprep.subr.bf16.mxu0 %v857_v11 }
  0x27   : > { %823 = vmatpush3.bf16.msra.mxu1 %v872_v22 }
  0x28   : > { %824 = vmatprep.subr.bf16.mxu1 %v873_v23 }
  0x29   : > { %793 = vmatpush3.bf16.msra.mxu0 %v857_v11 }
  0x2b   : > { %825 = vmatpush3.bf16.msra.mxu1 %v873_v23 }
  0x2c   : > { %795 = vmatmul.mubr.bf16.vlgmr.msra.gmra.mxu0 %v859_v14 }
  0x2d   : > { %798 = vmatprep.mubr.bf16.mxu0 %v860_v15 }
  0x34   : > { %799 = vmatmul.mubr.bf16.gmra.mxu0 %v861_v16 }
  0x35   : > { %802 = vmatprep.mubr.bf16.mxu0 %v862_v17 }
  0x3c   : > { %803 = vmatmul.mubr.bf16.gmra.mxu0 %v863_v18 }
  0x3d   : > { %806 = vmatprep.mubr.bf16.mxu0 %v864_v19 }
  0x44   : > { %807 = vmatmul.mubr.bf16.gmra.mxu0 %v865_v20 }
  0xec   : > { %v796_v24 = vpop.f32.mrf.mxu0 }
  0xed   : > { %v407_v32 = vadd.f32 %v796_v24, %v718_v27 }
  0xee   : > { %v398_v25 = vpop.f32.mrf.mxu0 }
  0xef   : > { %v399_v30 = vadd.f32 %v718_v27, %v398_v25 }
  0xf0   : > { %v797_v26 = vpop.f32.mrf.mxu0 }
  0xf1   : > { %v410_v28 = vadd.f32 %v797_v26, %v718_v27 }
  0xf2   : > { %v401_v29 = vpop.f32.mrf.mxu0 }
  0xf3   : > { %v402_v31 = vadd.f32 %v718_v27, %v401_v29  ;;  %v462_v35 = vpack.c.bf16 %v410_v28, %v407_v32 }
  0xf4   : > { %v800_v33 = vpop.f32.mrf.mxu0 }
  0xf5   : > { %v461_v34 = vpack.c.bf16 %v402_v31, %v399_v30  ;;  %v423_v42 = vadd.f32 %v800_v33, %v718_v27 }
  0xf6   : > { %v414_v36 = vpop.f32.mrf.mxu0 }
  0xf7   : > { %826 = vmatprep.mubr.bf16.mxu1 %v461_v34  ;;  %v415_v40 = vadd.f32 %v718_v27, %v414_v36 }
  0xf8   : > { %v801_v37 = vpop.f32.mrf.mxu0  ;;  %827 = vmatmul.mubr.bf16.vlgmr.msra.gmra.mxu1 %v462_v35 }
  0xf9   : > { %v426_v38 = vadd.f32 %v801_v37, %v718_v27 }
  0xfa   : > { %v417_v39 = vpop.f32.mrf.mxu0 }
  0xfb   : > { %v418_v41 = vadd.f32 %v718_v27, %v417_v39  ;;  %v464_v45 = vpack.c.bf16 %v426_v38, %v423_v42 }
  0xfc   : > { %v804_v43 = vpop.f32.mrf.mxu0 }
  0xfd   : > { %v463_v44 = vpack.c.bf16 %v418_v41, %v415_v40  ;;  %v439_v52 = vadd.f32 %v804_v43, %v718_v27 }
  0xfe   : > { %v430_v46 = vpop.f32.mrf.mxu0 }
  0xff   : > { %830 = vmatprep.mubr.bf16.mxu1 %v463_v44  ;;  %v431_v50 = vadd.f32 %v718_v27, %v430_v46 }
 0x100   : > { %v805_v47 = vpop.f32.mrf.mxu0  ;;  %831 = vmatmul.mubr.bf16.gmra.mxu1 %v464_v45 }
 0x101   : > { %v442_v48 = vadd.f32 %v805_v47, %v718_v27 }
 0x102   : > { %v433_v49 = vpop.f32.mrf.mxu0 }
 0x103   : > { %v434_v51 = vadd.f32 %v718_v27, %v433_v49  ;;  %v466_v55 = vpack.c.bf16 %v442_v48, %v439_v52 }
 0x104   : > { %v808_v53 = vpop.f32.mrf.mxu0 }
 0x105   : > { %v465_v54 = vpack.c.bf16 %v434_v51, %v431_v50  ;;  %v455_v62 = vadd.f32 %v808_v53, %v718_v27 }
 0x106   : > { %v446_v56 = vpop.f32.mrf.mxu0 }
 0x107   : > { %834 = vmatprep.mubr.bf16.mxu1 %v465_v54  ;;  %v447_v60 = vadd.f32 %v718_v27, %v446_v56 }
 0x108   : > { %v809_v57 = vpop.f32.mrf.mxu0  ;;  %835 = vmatmul.mubr.bf16.gmra.mxu1 %v466_v55 }
 0x109   : > { %v458_v58 = vadd.f32 %v809_v57, %v718_v27 }
 0x10a   : > { %v449_v59 = vpop.f32.mrf.mxu0 }
 0x10b   : > { %v450_v61 = vadd.f32 %v718_v27, %v449_v59  ;;  %v468_v0 = vpack.c.bf16 %v458_v58, %v455_v62 }
 0x10d   : > { %v467_v63 = vpack.c.bf16 %v450_v61, %v447_v60 }
 0x10f   : > { %838 = vmatprep.mubr.bf16.mxu1 %v467_v63 }
 0x110   : > { %839 = vmatmul.mubr.bf16.gmra.mxu1 %v468_v0 }
 0x1b8   : > { %v828_v2 = vpop.f32.mrf.mxu1 }
 0x1b9   : > { %v583_v3 = vadd.f32 %v828_v2, %v735_v1 }
 0x1ba   : > { %v574_v4 = vpop.f32.mrf.mxu1 }
 0x1bb   : > { %639 = vst [vmem:[%s994_s16 + $0x10] sm:$0xff] %v583_v3  ;;  %v575_v5 = vadd.f32 %v735_v1, %v574_v4 }
 0x1bc   : > { %v829_v6 = vpop.f32.mrf.mxu1 }
 0x1bd   : > { %637 = vst [vmem:[%s994_s16] sm:$0xff] %v575_v5  ;;  %v586_v7 = vadd.f32 %v829_v6, %v735_v1 }
 0x1be   : > { %v577_v8 = vpop.f32.mrf.mxu1 }
 0x1bf   : > { %640 = vst [vmem:[%s994_s16 + $0x18] sm:$0xff] %v586_v7  ;;  %v578_v9 = vadd.f32 %v735_v1, %v577_v8 }
 0x1c0   : > { %v832_v10 = vpop.f32.mrf.mxu1 }
 0x1c1   : > { %638 = vst [vmem:[%s994_s16 + $0x8] sm:$0xff] %v578_v9  ;;  %v599_v11 = vadd.f32 %v832_v10, %v735_v1 }
 0x1c2   : > { %v590_v12 = vpop.f32.mrf.mxu1 }
 0x1c3   : > { %643 = vst [vmem:[%s994_s16 + $0x30] sm:$0xff] %v599_v11  ;;  %v591_v13 = vadd.f32 %v735_v1, %v590_v12 }
 0x1c4   : > { %v833_v14 = vpop.f32.mrf.mxu1 }
 0x1c5   : > { %641 = vst [vmem:[%s994_s16 + $0x20] sm:$0xff] %v591_v13  ;;  %v602_v15 = vadd.f32 %v833_v14, %v735_v1 }
 0x1c6   : > { %v593_v16 = vpop.f32.mrf.mxu1 }
 0x1c7   : > { %644 = vst [vmem:[%s994_s16 + $0x38] sm:$0xff] %v602_v15  ;;  %v594_v17 = vadd.f32 %v735_v1, %v593_v16 }
 0x1c8   : > { %v836_v18 = vpop.f32.mrf.mxu1 }
 0x1c9   : > { %642 = vst [vmem:[%s994_s16 + $0x28] sm:$0xff] %v594_v17  ;;  %v615_v19 = vadd.f32 %v836_v18, %v735_v1 }
 0x1ca   : > { %v606_v20 = vpop.f32.mrf.mxu1 }
 0x1cb   : > { %647 = vst [vmem:[%s994_s16 + $0x50] sm:$0xff] %v615_v19  ;;  %v607_v21 = vadd.f32 %v735_v1, %v606_v20 }
 0x1cc   : > { %v837_v22 = vpop.f32.mrf.mxu1 }
 0x1cd   : > { %645 = vst [vmem:[%s994_s16 + $0x40] sm:$0xff] %v607_v21  ;;  %v618_v23 = vadd.f32 %v837_v22, %v735_v1 }
 0x1ce   : > { %v609_v24 = vpop.f32.mrf.mxu1 }
 0x1cf   : > { %648 = vst [vmem:[%s994_s16 + $0x58] sm:$0xff] %v618_v23  ;;  %v610_v25 = vadd.f32 %v735_v1, %v609_v24 }
 0x1d0   : > { %v840_v26 = vpop.f32.mrf.mxu1 }
 0x1d1   : > { %646 = vst [vmem:[%s994_s16 + $0x48] sm:$0xff] %v610_v25  ;;  %v631_v27 = vadd.f32 %v840_v26, %v735_v1 }
 0x1d2   : > { %v622_v28 = vpop.f32.mrf.mxu1 }
 0x1d3   : > { %651 = vst [vmem:[%s994_s16 + $0x70] sm:$0xff] %v631_v27  ;;  %v623_v29 = vadd.f32 %v735_v1, %v622_v28 }
 0x1d4   : > { %v841_v30 = vpop.f32.mrf.mxu1 }
 0x1d5   : > { %649 = vst [vmem:[%s994_s16 + $0x60] sm:$0xff] %v623_v29  ;;  %v634_v31 = vadd.f32 %v841_v30, %v735_v1 }
 0x1d6   : > { %v625_v32 = vpop.f32.mrf.mxu1 }
 0x1d7   : > { %652 = vst [vmem:[%s994_s16 + $0x78] sm:$0xff] %v634_v31  ;;  %v626_v33 = vadd.f32 %v735_v1, %v625_v32 }
 0x1d9   : > { %650 = vst [vmem:[%s994_s16 + $0x68] sm:$0xff] %v626_v33 }
 0x1da PF: > { %s15_s18 = sadd.s32 1, %s880_s18  }
 0x1db   : > { %p12_p4 = scmp.ge.s32.totalorder %s15_s18, 18  }
 0x1dd   :  { %14 = sbr.rel (!%p12_p4) target bundleno = 1 (0x1), region = 70 }

</bundles_post_ra>
